<compile_context>
chip_gen: v7x
topology: tpu7x:2x2x1
jax: 0.10.0
libtpu: 0.0.40
codegen_flags: <defaults>
</compile_context>

<pallas_src>
import functools

import jax
import jax.numpy as jnp
import numpy as np
from jax import lax
from jax.experimental import pallas as pl
from jax.experimental.pallas import tpu as pltpu

BN_EPS = 1e-5
LANE = 128


def _round_up(v, m):
    return (v + m - 1) // m * m


# ---------------------------------------------------------------------------
# Kernel bodies (closures over static shape parameters)
# ---------------------------------------------------------------------------
def _make_conv1_kernel(nb, ho, wo, cin, cp, stride):
    """conv1 (3x3, stride 1 or 2) + per-tile BN partial stats."""
    m = nb * ho * wo

    def kernel(x_ref, w_ref, y_ref, s_ref):
        x = x_ref[...].astype(jnp.float32)
        w = w_ref[...]                                    # (9, cin, cp) bf16
        acc = jnp.zeros((m, cp), jnp.float32)
        for kh in range(3):
            for kw in range(3):
                if stride == 1:
                    tap = x[:, kh:kh + ho, kw:kw + wo, :]
                else:  # stride 2: taps come from the 2x2 phase decomposition
                    p = (kh % 2) * 2 + (kw % 2)
                    tap = x[:, p, kh // 2:kh // 2 + ho, kw // 2:kw // 2 + wo, :]
                tap = tap.reshape(m, cin).astype(jnp.bfloat16)
                acc = acc + jnp.dot(tap, w[kh * 3 + kw],
                                    preferred_element_type=jnp.float32)
        y_ref[...] = acc.reshape(nb, ho, wo, cp).astype(y_ref.dtype)
        s_ref[0, 0:1, :] = jnp.sum(acc, axis=0, keepdims=True)
        s_ref[0, 1:2, :] = jnp.sum(acc * acc, axis=0, keepdims=True)

    return kernel


def _make_bn_relu_conv2_kernel(nb, ho, wo, cp):
    """BN1 (precomputed scale/shift) + ReLU + conv2 (3x3 stride 1) + stats."""
    m = nb * ho * wo

    def kernel(y1_ref, sc_ref, w_ref, y2_ref, s_ref, rpad_ref):
        scale = sc_ref[0:1, :]
        shift = sc_ref[1:2, :]
        x = y1_ref[...].astype(jnp.float32)
        relu1 = jnp.maximum(x * scale + shift, 0.0)
        # relu1 stays resident in VMEM, zero-padded spatially for the taps.
        # Re-initialize every grid step so the "parallel" axis stays safe.
        rpad_ref[...] = jnp.zeros_like(rpad_ref)
        rpad_ref[:, 1:ho + 1, 1:wo + 1, :] = relu1
        rp = rpad_ref[...]
        w = w_ref[...]                                    # (9, cp, cp) bf16
        acc = jnp.zeros((m, cp), jnp.float32)
        for kh in range(3):
            for kw in range(3):
                tap = rp[:, kh:kh + ho, kw:kw + wo, :]
                tap = tap.reshape(m, cp).astype(jnp.bfloat16)
                acc = acc + jnp.dot(tap, w[kh * 3 + kw],
                                    preferred_element_type=jnp.float32)
        y2_ref[...] = acc.reshape(nb, ho, wo, cp).astype(y2_ref.dtype)
        s_ref[0, 0:1, :] = jnp.sum(acc, axis=0, keepdims=True)
        s_ref[0, 1:2, :] = jnp.sum(acc * acc, axis=0, keepdims=True)

    return kernel


def _bn_add_relu_kernel(y2_ref, sc_ref, res_ref, o_ref):
    """BN2 (precomputed scale/shift) + residual add + ReLU."""
    scale = sc_ref[0:1, :]
    shift = sc_ref[1:2, :]
    x = y2_ref[...].astype(jnp.float32)
    o_ref[...] = jnp.maximum(x * scale + shift + res_ref[...], 0.0)


# ---------------------------------------------------------------------------
# Host-side glue
# ---------------------------------------------------------------------------
def _bn_scale_shift(stats, gamma, beta, count):
    """Fold per-tile (sum, sumsq) partials into per-channel BN scale/shift."""
    s = jnp.sum(stats[:, 0, :], axis=0)
    ss = jnp.sum(stats[:, 1, :], axis=0)
    mean = s / count
    var = jnp.maximum(ss / count - mean * mean, 0.0)      # one-pass variance
    scale = gamma * lax.rsqrt(var + BN_EPS)
    shift = beta - mean * scale
    return jnp.stack([scale, shift], axis=0).astype(jnp.float32)   # (2, cp)


@functools.partial(jax.jit, static_argnames=("downsample", "block_n"))
def cifar_residual_block(x_nchw, params, downsample, block_n=None):
    """Forward pass equivalent to CIFARResidualBlock.forward (training BN)."""
    x = jnp.transpose(x_nchw, (0, 2, 3, 1)).astype(jnp.float32)    # NCHW->NHWC
    n, h, w, cin = x.shape
    cout = params["w1"].shape[-1]
    cp = _round_up(cout, LANE)
    stride = 2 if downsample else 1
    ho = (h - 1) // stride + 1
    wo = (w - 1) // stride + 1

    if block_n is None:
        block_n = next(c for c in (8, 4, 2, 1) if n % c == 0)
    assert n % block_n == 0
    num_tiles = n // block_n
    count = float(n * ho * wo)

    # ---- pack weights / BN affine params (channels padded to 128 lanes) ----
    w1p = jnp.pad(params["w1"], ((0, 0), (0, 0), (0, 0), (0, cp - cout)))
    w1p = w1p.reshape(9, cin, cp).astype(jnp.bfloat16)
    w2p = jnp.pad(params["w2"], ((0, 0), (0, 0), (0, cp - cout), (0, cp - cout)))
    w2p = w2p.reshape(9, cp, cp).astype(jnp.bfloat16)
    g1 = jnp.pad(params["g1"].astype(jnp.float32), (0, cp - cout))
    b1 = jnp.pad(params["b1"].astype(jnp.float32), (0, cp - cout))
    g2 = jnp.pad(params["g2"].astype(jnp.float32), (0, cp - cout))
    b2 = jnp.pad(params["b2"].astype(jnp.float32), (0, cp - cout))

    # ---- conv1 input: spatial zero-pad (+ 2x2 phase split when stride 2) ----
    xp = jnp.pad(x, ((0, 0), (1, 1), (1, 1), (0, 0))).astype(jnp.bfloat16)
    if stride == 1:
        x_in = xp                                         # (n, h+2, w+2, cin)
        x_idx = lambda b: (b, 0, 0, 0)
    else:
        hq, wq = (h + 3) // 2, (w + 3) // 2
        phases = []
        for pa in range(2):
            for pb in range(2):
                ph = xp[:, pa::2, pb::2, :]
                ph = jnp.pad(ph, ((0, 0), (0, hq - ph.shape[1]),
                                  (0, wq - ph.shape[2]), (0, 0)))
                phases.append(ph)
        x_in = jnp.stack(phases, axis=1)                  # (n, 4, hq, wq, cin)
        x_idx = lambda b: (b, 0, 0, 0, 0)

    cparams = pltpu.CompilerParams(dimension_semantics=("parallel",),
                                   vmem_limit_bytes=64 * 1024 * 1024)
    act_spec = pl.BlockSpec((block_n, ho, wo, cp), lambda b: (b, 0, 0, 0))
    stat_spec = pl.BlockSpec((1, 2, cp), lambda b: (b, 0, 0))
    sc_spec = pl.BlockSpec((2, cp), lambda b: (0, 0))

    # ------------------- kernel 1: conv1 + BN1 partial stats -----------------
    conv1_raw, stats1 = pl.pallas_call(
        _make_conv1_kernel(block_n, ho, wo, cin, cp, stride),
        grid=(num_tiles,),
        in_specs=[
            pl.BlockSpec((block_n,) + x_in.shape[1:], x_idx),
            pl.BlockSpec(w1p.shape, lambda b: (0, 0, 0)),
        ],
        out_specs=(act_spec, stat_spec),
        out_shape=(
            jax.ShapeDtypeStruct((n, ho, wo, cp), jnp.bfloat16),
            jax.ShapeDtypeStruct((num_tiles, 2, cp), jnp.float32),
        ),
        compiler_params=cparams,
        cost_estimate=pl.CostEstimate(
            flops=2 * n * ho * wo * 9 * cin * cp,
            transcendentals=0,
            bytes_accessed=(x_in.size + w1p.size + n * ho * wo * cp) * 2
            + num_tiles * 2 * cp * 4),
    )(x_in, w1p)

    sc1 = _bn_scale_shift(stats1, g1, b1, count)

    # ------------- kernel 2: BN1 + ReLU + conv2 + BN2 partial stats ----------
    conv2_raw, stats2 = pl.pallas_call(
        _make_bn_relu_conv2_kernel(block_n, ho, wo, cp),
        grid=(num_tiles,),
        in_specs=[act_spec, sc_spec,
                  pl.BlockSpec(w2p.shape, lambda b: (0, 0, 0))],
        out_specs=(act_spec, stat_spec),
        out_shape=(
            jax.ShapeDtypeStruct((n, ho, wo, cp), jnp.bfloat16),
            jax.ShapeDtypeStruct((num_tiles, 2, cp), jnp.float32),
        ),
        scratch_shapes=[pltpu.VMEM((block_n, ho + 2, wo + 2, cp), jnp.float32)],
        compiler_params=cparams,
        cost_estimate=pl.CostEstimate(
            flops=2 * n * ho * wo * 9 * cp * cp,
            transcendentals=0,
            bytes_accessed=(2 * n * ho * wo * cp + w2p.size) * 2
            + num_tiles * 2 * cp * 4),
    )(conv1_raw, sc1, w2p)

    sc2 = _bn_scale_shift(stats2, g2, b2, count)

    # ---- shortcut: nearest-neighbour downsample + zero channel pad ----------
    if downsample:
        if h == 2 * ho and w == 2 * wo:
            xi = x[:, ::2, ::2, :]        # exact nearest indices 0,2,4,...
        else:
            hi = jnp.floor(jnp.arange(ho) * (h / ho)).astype(jnp.int32)
            wi = jnp.floor(jnp.arange(wo) * (w / wo)).astype(jnp.int32)
            xi = x[:, hi][:, :, wi]
    else:
        xi = x
    shortcut = jnp.pad(xi, ((0, 0), (0, 0), (0, 0), (0, cp - cin)))

    # ----------------- kernel 3: BN2 + residual add + ReLU -------------------
    out_p = pl.pallas_call(
        _bn_add_relu_kernel,
        grid=(num_tiles,),
        in_specs=[act_spec, sc_spec, act_spec],
        out_specs=act_spec,
        out_shape=jax.ShapeDtypeStruct((n, ho, wo, cp), jnp.float32),
        compiler_params=cparams,
    )(conv2_raw, sc2, shortcut)

    out = out_p[:, :, :, :cout]
    return jnp.transpose(out, (0, 3, 1, 2))               # NHWC -> NCHW


# ---------------------------------------------------------------------------
# Pure-JAX reference (ground truth)
# ---------------------------------------------------------------------------
def _bn_train(z, g, b):
    m = z.mean(axis=(0, 1, 2), keepdims=True)
    v = ((z - m) ** 2).mean(axis=(0, 1, 2), keepdims=True)
    return (z - m) * lax.rsqrt(v + BN_EPS) * g + b


def reference_block(x_nchw, params, downsample):
    x = jnp.transpose(x_nchw, (0, 2, 3, 1)).astype(jnp.float32)
    n, h, w, cin = x.shape
    cout = params["w1"].shape[-1]
    stride = 2 if downsample else 1
    dn = ("NHWC", "HWIO", "NHWC")
    c1 = lax.conv_general_dilated(x, params["w1"], (stride, stride),
                                  ((1, 1), (1, 1)), dimension_numbers=dn)
    r1 = jnp.maximum(_bn_train(c1, params["g1"], params["b1"]), 0.0)
    c2 = lax.conv_general_dilated(r1, params["w2"], (1, 1),
                                  ((1, 1), (1, 1)), dimension_numbers=dn)
    res = _bn_train(c2, params["g2"], params["b2"])
    ho, wo = res.shape[1], res.shape[2]
    if downsample:
        hi = jnp.floor(jnp.arange(ho) * (h / ho)).astype(jnp.int32)
        wi = jnp.floor(jnp.arange(wo) * (w / wo)).astype(jnp.int32)
        xi = x[:, hi][:, :, wi]
    else:
        xi = x
    diff = cout - cin
    if diff > 0:
        xi = jnp.pad(xi, ((0, 0), (0, 0), (0, 0), (0, diff)))
    y = jnp.maximum(res + xi, 0.0)
    return y.transpose(0, 3, 1, 2)


def _make_params(key, cin, cout):
    kw1, kw2, kg1, kb1, kg2, kb2 = jax.random.split(key, 6)
    return {
        # Conv weights in HWIO layout (3, 3, Cin, Cout); bias=False.
        "w1": 0.1 * jax.random.normal(kw1, (3, 3, cin, cout), jnp.float32),
        "w2": 0.1 * jax.random.normal(kw2, (3, 3, cout, cout), jnp.float32),
        "g1": 1.0 + 0.1 * jax.random.normal(kg1, (cout,), jnp.float32),
        "b1": 0.05 * jax.random.normal(kb1, (cout,), jnp.float32),
        "g2": 1.0 + 0.1 * jax.random.normal(kg2, (cout,), jnp.float32),
        "b2": 0.05 * jax.random.normal(kb2, (cout,), jnp.float32),
    }


# ---------------------------------------------------------------------------
if __name__ == "__main__":
    key = jax.random.PRNGKey(0)
    k_x1, k_p1, k_x2, k_p2 = jax.random.split(key, 4)

    # Tolerance: matmul operands are bf16 (MXU native); accumulation and BN
    # math are f32, so the bf16-induced error stays ~1e-2 or below.
    RTOL = ATOL = 3e-2

    # Case 1: downsample block, Cin=4 -> Cout=8, x: [2, 4, 16, 16] (NCHW).
    x1 = jax.random.normal(k_x1, (2, 4, 16, 16), dtype=jnp.float32)
    p1 = _make_params(k_p1, 4, 8)
    out1 = jax.block_until_ready(
        cifar_residual_block(x1, p1, downsample=True, block_n=1))
    ref1 = jax.block_until_ready(reference_block(x1, p1, True))
    assert out1.shape == (2, 8, 8, 8), out1.shape
    np.testing.assert_allclose(np.asarray(out1), np.asarray(ref1),
                               rtol=RTOL, atol=ATOL)

    # Case 2: identity block, Cin=Cout=8, no downsampling.
    x2 = jax.random.normal(k_x2, (2, 8, 16, 16), dtype=jnp.float32)
    p2 = _make_params(k_p2, 8, 8)
    out2 = jax.block_until_ready(
        cifar_residual_block(x2, p2, downsample=False, block_n=1))
    ref2 = jax.block_until_ready(reference_block(x2, p2, False))
    assert out2.shape == (2, 8, 16, 16), out2.shape
    np.testing.assert_allclose(np.asarray(out2), np.asarray(ref2),
                               rtol=RTOL, atol=ATOL)

    print("KERNEL_OK")
</pallas_src>

<mosaic_0001>
module attributes {stable_mosaic.version = 11 : i64} {
  func.func @kernel(%arg0: i32, %arg1: memref<1x4x9x9x4xbf16, #tpu.memory_space<vmem>>, %arg2: memref<9x4x128xbf16, #tpu.memory_space<vmem>>, %arg3: memref<1x8x8x128xbf16, #tpu.memory_space<vmem>>, %arg4: memref<1x2x128xf32, #tpu.memory_space<vmem>>) attributes {dimension_semantics = [#tpu.dimension_semantics<parallel>], iteration_bounds = array<i64: 2>, scalar_prefetch = 0 : i64, scratch_operands = 0 : i64, tpu.core_type = #tpu.core_type<tc>, window_params = [{transform_indices = @transform_0, window_bounds = array<i64: 1, 4, 9, 9, 4>}, {pipeline_mode = #tpu.pipeline_mode<synchronous>, transform_indices = @transform_1, window_bounds = array<i64: 9, 4, 128>}, {transform_indices = @transform_2, window_bounds = array<i64: 1, 8, 8, 128>}, {transform_indices = @transform_3, window_bounds = array<i64: 1, 2, 128>}]} {
    %c0 = arith.constant 0 : index
    %c0_0 = arith.constant 0 : index
    %c0_1 = arith.constant 0 : index
    %c0_2 = arith.constant 0 : index
    %c0_3 = arith.constant 0 : index
    %0 = vector.load %arg1[%c0, %c0_0, %c0_1, %c0_2, %c0_3] : memref<1x4x9x9x4xbf16, #tpu.memory_space<vmem>>, vector<1x4x9x9x4xbf16>
    %1 = arith.extf %0 : vector<1x4x9x9x4xbf16> to vector<1x4x9x9x4xf32>
    %c0_4 = arith.constant 0 : index
    %c0_5 = arith.constant 0 : index
    %c0_6 = arith.constant 0 : index
    %2 = vector.load %arg2[%c0_4, %c0_5, %c0_6] : memref<9x4x128xbf16, #tpu.memory_space<vmem>>, vector<9x4x128xbf16>
    %cst = arith.constant 0.000000e+00 : f32
    %3 = vector.broadcast %cst : f32 to vector<64x128xf32>
    %4 = vector.extract_strided_slice %1 {offsets = [0, 0, 0, 0, 0], sizes = [1, 1, 8, 8, 4], strides = [1, 1, 1, 1, 1]} : vector<1x4x9x9x4xf32> to vector<1x1x8x8x4xf32>
    %5 = vector.shape_cast %4 : vector<1x1x8x8x4xf32> to vector<1x8x8x4xf32>
    %6 = vector.shape_cast %5 : vector<1x8x8x4xf32> to vector<64x4xf32>
    %7 = arith.truncf %6 : vector<64x4xf32> to vector<64x4xbf16>
    %8 = vector.extract_strided_slice %2 {offsets = [0, 0, 0], sizes = [1, 4, 128], strides = [1, 1, 1]} : vector<9x4x128xbf16> to vector<1x4x128xbf16>
    %9 = vector.shape_cast %8 : vector<1x4x128xbf16> to vector<4x128xbf16>
    %cst_7 = arith.constant dense<0.000000e+00> : vector<64x128xf32>
    %10 = tpu.matmul %7, %9, %cst_7 {dimension_numbers = #tpu.dot_dimension_numbers<[1], [0], [0], [1], [0, 0, 1, 1], [], []>} : vector<64x4xbf16>, vector<4x128xbf16>, vector<64x128xf32> -> vector<64x128xf32>
    %11 = arith.addf %3, %10 : vector<64x128xf32>
    %12 = vector.extract_strided_slice %1 {offsets = [0, 1, 0, 0, 0], sizes = [1, 1, 8, 8, 4], strides = [1, 1, 1, 1, 1]} : vector<1x4x9x9x4xf32> to vector<1x1x8x8x4xf32>
    %13 = vector.shape_cast %12 : vector<1x1x8x8x4xf32> to vector<1x8x8x4xf32>
    %14 = vector.shape_cast %13 : vector<1x8x8x4xf32> to vector<64x4xf32>
    %15 = arith.truncf %14 : vector<64x4xf32> to vector<64x4xbf16>
    %16 = vector.extract_strided_slice %2 {offsets = [1, 0, 0], sizes = [1, 4, 128], strides = [1, 1, 1]} : vector<9x4x128xbf16> to vector<1x4x128xbf16>
    %17 = vector.shape_cast %16 : vector<1x4x128xbf16> to vector<4x128xbf16>
    %cst_8 = arith.constant dense<0.000000e+00> : vector<64x128xf32>
    %18 = tpu.matmul %15, %17, %cst_8 {dimension_numbers = #tpu.dot_dimension_numbers<[1], [0], [0], [1], [0, 0, 1, 1], [], []>} : vector<64x4xbf16>, vector<4x128xbf16>, vector<64x128xf32> -> vector<64x128xf32>
    %19 = arith.addf %11, %18 : vector<64x128xf32>
    %20 = vector.extract_strided_slice %1 {offsets = [0, 0, 0, 1, 0], sizes = [1, 1, 8, 8, 4], strides = [1, 1, 1, 1, 1]} : vector<1x4x9x9x4xf32> to vector<1x1x8x8x4xf32>
    %21 = vector.shape_cast %20 : vector<1x1x8x8x4xf32> to vector<1x8x8x4xf32>
    %22 = vector.shape_cast %21 : vector<1x8x8x4xf32> to vector<64x4xf32>
    %23 = arith.truncf %22 : vector<64x4xf32> to vector<64x4xbf16>
    %24 = vector.extract_strided_slice %2 {offsets = [2, 0, 0], sizes = [1, 4, 128], strides = [1, 1, 1]} : vector<9x4x128xbf16> to vector<1x4x128xbf16>
    %25 = vector.shape_cast %24 : vector<1x4x128xbf16> to vector<4x128xbf16>
    %cst_9 = arith.constant dense<0.000000e+00> : vector<64x128xf32>
    %26 = tpu.matmul %23, %25, %cst_9 {dimension_numbers = #tpu.dot_dimension_numbers<[1], [0], [0], [1], [0, 0, 1, 1], [], []>} : vector<64x4xbf16>, vector<4x128xbf16>, vector<64x128xf32> -> vector<64x128xf32>
    %27 = arith.addf %19, %26 : vector<64x128xf32>
    %28 = vector.extract_strided_slice %1 {offsets = [0, 2, 0, 0, 0], sizes = [1, 1, 8, 8, 4], strides = [1, 1, 1, 1, 1]} : vector<1x4x9x9x4xf32> to vector<1x1x8x8x4xf32>
    %29 = vector.shape_cast %28 : vector<1x1x8x8x4xf32> to vector<1x8x8x4xf32>
    %30 = vector.shape_cast %29 : vector<1x8x8x4xf32> to vector<64x4xf32>
    %31 = arith.truncf %30 : vector<64x4xf32> to vector<64x4xbf16>
    %32 = vector.extract_strided_slice %2 {offsets = [3, 0, 0], sizes = [1, 4, 128], strides = [1, 1, 1]} : vector<9x4x128xbf16> to vector<1x4x128xbf16>
    %33 = vector.shape_cast %32 : vector<1x4x128xbf16> to vector<4x128xbf16>
    %cst_10 = arith.constant dense<0.000000e+00> : vector<64x128xf32>
    %34 = tpu.matmul %31, %33, %cst_10 {dimension_numbers = #tpu.dot_dimension_numbers<[1], [0], [0], [1], [0, 0, 1, 1], [], []>} : vector<64x4xbf16>, vector<4x128xbf16>, vector<64x128xf32> -> vector<64x128xf32>
    %35 = arith.addf %27, %34 : vector<64x128xf32>
    %36 = vector.extract_strided_slice %1 {offsets = [0, 3, 0, 0, 0], sizes = [1, 1, 8, 8, 4], strides = [1, 1, 1, 1, 1]} : vector<1x4x9x9x4xf32> to vector<1x1x8x8x4xf32>
    %37 = vector.shape_cast %36 : vector<1x1x8x8x4xf32> to vector<1x8x8x4xf32>
    %38 = vector.shape_cast %37 : vector<1x8x8x4xf32> to vector<64x4xf32>
    %39 = arith.truncf %38 : vector<64x4xf32> to vector<64x4xbf16>
    %40 = vector.extract_strided_slice %2 {offsets = [4, 0, 0], sizes = [1, 4, 128], strides = [1, 1, 1]} : vector<9x4x128xbf16> to vector<1x4x128xbf16>
    %41 = vector.shape_cast %40 : vector<1x4x128xbf16> to vector<4x128xbf16>
    %cst_11 = arith.constant dense<0.000000e+00> : vector<64x128xf32>
    %42 = tpu.matmul %39, %41, %cst_11 {dimension_numbers = #tpu.dot_dimension_numbers<[1], [0], [0], [1], [0, 0, 1, 1], [], []>} : vector<64x4xbf16>, vector<4x128xbf16>, vector<64x128xf32> -> vector<64x128xf32>
    %43 = arith.addf %35, %42 : vector<64x128xf32>
    %44 = vector.extract_strided_slice %1 {offsets = [0, 2, 0, 1, 0], sizes = [1, 1, 8, 8, 4], strides = [1, 1, 1, 1, 1]} : vector<1x4x9x9x4xf32> to vector<1x1x8x8x4xf32>
    %45 = vector.shape_cast %44 : vector<1x1x8x8x4xf32> to vector<1x8x8x4xf32>
    %46 = vector.shape_cast %45 : vector<1x8x8x4xf32> to vector<64x4xf32>
    %47 = arith.truncf %46 : vector<64x4xf32> to vector<64x4xbf16>
    %48 = vector.extract_strided_slice %2 {offsets = [5, 0, 0], sizes = [1, 4, 128], strides = [1, 1, 1]} : vector<9x4x128xbf16> to vector<1x4x128xbf16>
    %49 = vector.shape_cast %48 : vector<1x4x128xbf16> to vector<4x128xbf16>
    %cst_12 = arith.constant dense<0.000000e+00> : vector<64x128xf32>
    %50 = tpu.matmul %47, %49, %cst_12 {dimension_numbers = #tpu.dot_dimension_numbers<[1], [0], [0], [1], [0, 0, 1, 1], [], []>} : vector<64x4xbf16>, vector<4x128xbf16>, vector<64x128xf32> -> vector<64x128xf32>
    %51 = arith.addf %43, %50 : vector<64x128xf32>
    %52 = vector.extract_strided_slice %1 {offsets = [0, 0, 1, 0, 0], sizes = [1, 1, 8, 8, 4], strides = [1, 1, 1, 1, 1]} : vector<1x4x9x9x4xf32> to vector<1x1x8x8x4xf32>
    %53 = vector.shape_cast %52 : vector<1x1x8x8x4xf32> to vector<1x8x8x4xf32>
    %54 = vector.shape_cast %53 : vector<1x8x8x4xf32> to vector<64x4xf32>
    %55 = arith.truncf %54 : vector<64x4xf32> to vector<64x4xbf16>
    %56 = vector.extract_strided_slice %2 {offsets = [6, 0, 0], sizes = [1, 4, 128], strides = [1, 1, 1]} : vector<9x4x128xbf16> to vector<1x4x128xbf16>
    %57 = vector.shape_cast %56 : vector<1x4x128xbf16> to vector<4x128xbf16>
    %cst_13 = arith.constant dense<0.000000e+00> : vector<64x128xf32>
    %58 = tpu.matmul %55, %57, %cst_13 {dimension_numbers = #tpu.dot_dimension_numbers<[1], [0], [0], [1], [0, 0, 1, 1], [], []>} : vector<64x4xbf16>, vector<4x128xbf16>, vector<64x128xf32> -> vector<64x128xf32>
    %59 = arith.addf %51, %58 : vector<64x128xf32>
    %60 = vector.extract_strided_slice %1 {offsets = [0, 1, 1, 0, 0], sizes = [1, 1, 8, 8, 4], strides = [1, 1, 1, 1, 1]} : vector<1x4x9x9x4xf32> to vector<1x1x8x8x4xf32>
    %61 = vector.shape_cast %60 : vector<1x1x8x8x4xf32> to vector<1x8x8x4xf32>
    %62 = vector.shape_cast %61 : vector<1x8x8x4xf32> to vector<64x4xf32>
    %63 = arith.truncf %62 : vector<64x4xf32> to vector<64x4xbf16>
    %64 = vector.extract_strided_slice %2 {offsets = [7, 0, 0], sizes = [1, 4, 128], strides = [1, 1, 1]} : vector<9x4x128xbf16> to vector<1x4x128xbf16>
    %65 = vector.shape_cast %64 : vector<1x4x128xbf16> to vector<4x128xbf16>
    %cst_14 = arith.constant dense<0.000000e+00> : vector<64x128xf32>
    %66 = tpu.matmul %63, %65, %cst_14 {dimension_numbers = #tpu.dot_dimension_numbers<[1], [0], [0], [1], [0, 0, 1, 1], [], []>} : vector<64x4xbf16>, vector<4x128xbf16>, vector<64x128xf32> -> vector<64x128xf32>
    %67 = arith.addf %59, %66 : vector<64x128xf32>
    %68 = vector.extract_strided_slice %1 {offsets = [0, 0, 1, 1, 0], sizes = [1, 1, 8, 8, 4], strides = [1, 1, 1, 1, 1]} : vector<1x4x9x9x4xf32> to vector<1x1x8x8x4xf32>
    %69 = vector.shape_cast %68 : vector<1x1x8x8x4xf32> to vector<1x8x8x4xf32>
    %70 = vector.shape_cast %69 : vector<1x8x8x4xf32> to vector<64x4xf32>
    %71 = arith.truncf %70 : vector<64x4xf32> to vector<64x4xbf16>
    %72 = vector.extract_strided_slice %2 {offsets = [8, 0, 0], sizes = [1, 4, 128], strides = [1, 1, 1]} : vector<9x4x128xbf16> to vector<1x4x128xbf16>
    %73 = vector.shape_cast %72 : vector<1x4x128xbf16> to vector<4x128xbf16>
    %cst_15 = arith.constant dense<0.000000e+00> : vector<64x128xf32>
    %74 = tpu.matmul %71, %73, %cst_15 {dimension_numbers = #tpu.dot_dimension_numbers<[1], [0], [0], [1], [0, 0, 1, 1], [], []>} : vector<64x4xbf16>, vector<4x128xbf16>, vector<64x128xf32> -> vector<64x128xf32>
    %75 = arith.addf %67, %74 : vector<64x128xf32>
    %76 = vector.shape_cast %75 : vector<64x128xf32> to vector<1x8x8x128xf32>
    %77 = arith.truncf %76 : vector<1x8x8x128xf32> to vector<1x8x8x128xbf16>
    %c0_16 = arith.constant 0 : index
    %c0_17 = arith.constant 0 : index
    %c0_18 = arith.constant 0 : index
    %c0_19 = arith.constant 0 : index
    %78 = vector.load %arg3[%c0_16, %c0_17, %c0_18, %c0_19] : memref<1x8x8x128xbf16, #tpu.memory_space<vmem>>, vector<1x8x8x128xbf16>
    tpu.vector_store %arg3[%c0_16, %c0_17, %c0_18, %c0_19], %77 {strides = array<i32>} : memref<1x8x8x128xbf16, #tpu.memory_space<vmem>>, vector<1x8x8x128xbf16>,
    %cst_20 = arith.constant dense<0.000000e+00> : vector<128xf32>
    %79 = vector.multi_reduction <add>, %75, %cst_20 [0] : vector<64x128xf32> to vector<128xf32>
    %80 = vector.shape_cast %79 : vector<128xf32> to vector<1x128xf32>
    %c0_21 = arith.constant 0 : index
    %c0_22 = arith.constant 0 : index
    %c0_23 = arith.constant 0 : index
    %81 = vector.load %arg4[%c0_21, %c0_22, %c0_23] : memref<1x2x128xf32, #tpu.memory_space<vmem>>, vector<1x1x128xf32>
    %82 = vector.shape_cast %81 : vector<1x1x128xf32> to vector<1x128xf32>
    %83 = vector.shape_cast %80 : vector<1x128xf32> to vector<1x1x128xf32>
    tpu.vector_store %arg4[%c0_21, %c0_22, %c0_23], %83 {strides = array<i32>} : memref<1x2x128xf32, #tpu.memory_space<vmem>>, vector<1x1x128xf32>,
    %84 = arith.mulf %75, %75 : vector<64x128xf32>
    %cst_24 = arith.constant dense<0.000000e+00> : vector<128xf32>
    %85 = vector.multi_reduction <add>, %84, %cst_24 [0] : vector<64x128xf32> to vector<128xf32>
    %86 = vector.shape_cast %85 : vector<128xf32> to vector<1x128xf32>
    %c0_25 = arith.constant 0 : index
    %c1 = arith.constant 1 : index
    %c0_26 = arith.constant 0 : index
    %87 = vector.load %arg4[%c0_25, %c1, %c0_26] : memref<1x2x128xf32, #tpu.memory_space<vmem>>, vector<1x1x128xf32>
    %88 = vector.shape_cast %87 : vector<1x1x128xf32> to vector<1x128xf32>
    %89 = vector.shape_cast %86 : vector<1x128xf32> to vector<1x1x128xf32>
    tpu.vector_store %arg4[%c0_25, %c1, %c0_26], %89 {strides = array<i32>} : memref<1x2x128xf32, #tpu.memory_space<vmem>>, vector<1x1x128xf32>,
    return
  }
  func.func @transform_0(%arg0: i32) -> (i32, i32, i32, i32, i32) {
    %c0_i32 = arith.constant 0 : i32
    %c0_i32_0 = arith.constant 0 : i32
    %c0_i32_1 = arith.constant 0 : i32
    %c0_i32_2 = arith.constant 0 : i32
    %c0_i32_3 = arith.constant 0 : i32
    return %arg0, %c0_i32, %c0_i32_0, %c0_i32_1, %c0_i32_2 : i32, i32, i32, i32, i32
  }
  func.func @transform_1(%arg0: i32) -> (i32, i32, i32) {
    %c0_i32 = arith.constant 0 : i32
    %c0_i32_0 = arith.constant 0 : i32
    %c0_i32_1 = arith.constant 0 : i32
    %c0_i32_2 = arith.constant 0 : i32
    return %c0_i32, %c0_i32_0, %c0_i32_1 : i32, i32, i32
  }
  func.func @transform_2(%arg0: i32) -> (i32, i32, i32, i32) {
    %c0_i32 = arith.constant 0 : i32
    %c0_i32_0 = arith.constant 0 : i32
    %c0_i32_1 = arith.constant 0 : i32
    %c0_i32_2 = arith.constant 0 : i32
    return %arg0, %c0_i32, %c0_i32_0, %c0_i32_1 : i32, i32, i32, i32
  }
  func.func @transform_3(%arg0: i32) -> (i32, i32, i32) {
    %c0_i32 = arith.constant 0 : i32
    %c0_i32_0 = arith.constant 0 : i32
    %c0_i32_1 = arith.constant 0 : i32
    return %arg0, %c0_i32, %c0_i32_0 : i32, i32, i32
  }
}

module attributes {stable_mosaic.version = 11 : i64} {
  func.func @kernel(%arg0: i32, %arg1: memref<1x8x8x128xbf16, #tpu.memory_space<vmem>>, %arg2: memref<2x128xf32, #tpu.memory_space<vmem>>, %arg3: memref<9x128x128xbf16, #tpu.memory_space<vmem>>, %arg4: memref<1x8x8x128xbf16, #tpu.memory_space<vmem>>, %arg5: memref<1x2x128xf32, #tpu.memory_space<vmem>>, %arg6: memref<1x10x10x128xf32, #tpu.memory_space<vmem>>) attributes {dimension_semantics = [#tpu.dimension_semantics<parallel>], iteration_bounds = array<i64: 2>, scalar_prefetch = 0 : i64, scratch_operands = 1 : i64, tpu.core_type = #tpu.core_type<tc>, window_params = [{transform_indices = @transform_0, window_bounds = array<i64: 1, 8, 8, 128>}, {pipeline_mode = #tpu.pipeline_mode<synchronous>, transform_indices = @transform_1, window_bounds = array<i64: 2, 128>}, {pipeline_mode = #tpu.pipeline_mode<synchronous>, transform_indices = @transform_2, window_bounds = array<i64: 9, 128, 128>}, {transform_indices = @transform_3, window_bounds = array<i64: 1, 8, 8, 128>}, {transform_indices = @transform_4, window_bounds = array<i64: 1, 2, 128>}]} {
    %c0 = arith.constant 0 : index
    %c0_0 = arith.constant 0 : index
    %0 = vector.load %arg2[%c0, %c0_0] : memref<2x128xf32, #tpu.memory_space<vmem>>, vector<1x128xf32>
    %c1 = arith.constant 1 : index
    %c0_1 = arith.constant 0 : index
    %1 = vector.load %arg2[%c1, %c0_1] : memref<2x128xf32, #tpu.memory_space<vmem>>, vector<1x128xf32>
    %c0_2 = arith.constant 0 : index
    %c0_3 = arith.constant 0 : index
    %c0_4 = arith.constant 0 : index
    %c0_5 = arith.constant 0 : index
    %2 = vector.load %arg1[%c0_2, %c0_3, %c0_4, %c0_5] : memref<1x8x8x128xbf16, #tpu.memory_space<vmem>>, vector<1x8x8x128xbf16>
    %3 = arith.extf %2 : vector<1x8x8x128xbf16> to vector<1x8x8x128xf32>
    %4 = vector.shape_cast %0 : vector<1x128xf32> to vector<1x1x1x128xf32>
    %5 = vector.broadcast %4 : vector<1x1x1x128xf32> to vector<1x8x8x128xf32>
    %6 = arith.mulf %3, %5 : vector<1x8x8x128xf32>
    %7 = vector.shape_cast %1 : vector<1x128xf32> to vector<1x1x1x128xf32>
    %8 = vector.broadcast %7 : vector<1x1x1x128xf32> to vector<1x8x8x128xf32>
    %9 = arith.addf %6, %8 : vector<1x8x8x128xf32>
    %cst = arith.constant 0.000000e+00 : f32
    %10 = vector.broadcast %cst : f32 to vector<1x8x8x128xf32>
    %11 = arith.maximumf %9, %10 : vector<1x8x8x128xf32>
    %cst_6 = arith.constant 0.000000e+00 : f32
    %12 = vector.broadcast %cst_6 : f32 to vector<1x10x10x128xf32>
    %c0_7 = arith.constant 0 : index
    %c0_8 = arith.constant 0 : index
    %c0_9 = arith.constant 0 : index
    %c0_10 = arith.constant 0 : index
    %13 = vector.load %arg6[%c0_7, %c0_8, %c0_9, %c0_10] : memref<1x10x10x128xf32, #tpu.memory_space<vmem>>, vector<1x10x10x128xf32>
    tpu.vector_store %arg6[%c0_7, %c0_8, %c0_9, %c0_10], %12 {strides = array<i32>} : memref<1x10x10x128xf32, #tpu.memory_space<vmem>>, vector<1x10x10x128xf32>,
    %c0_11 = arith.constant 0 : index
    %c1_12 = arith.constant 1 : index
    %c1_13 = arith.constant 1 : index
    %c0_14 = arith.constant 0 : index
    %14 = vector.load %arg6[%c0_11, %c1_12, %c1_13, %c0_14] : memref<1x10x10x128xf32, #tpu.memory_space<vmem>>, vector<1x8x8x128xf32>
    tpu.vector_store %arg6[%c0_11, %c1_12, %c1_13, %c0_14], %11 {strides = array<i32>} : memref<1x10x10x128xf32, #tpu.memory_space<vmem>>, vector<1x8x8x128xf32>,
    %c0_15 = arith.constant 0 : index
    %c0_16 = arith.constant 0 : index
    %c0_17 = arith.constant 0 : index
    %c0_18 = arith.constant 0 : index
    %15 = vector.load %arg6[%c0_15, %c0_16, %c0_17, %c0_18] : memref<1x10x10x128xf32, #tpu.memory_space<vmem>>, vector<1x10x10x128xf32>
    %c0_19 = arith.constant 0 : index
    %c0_20 = arith.constant 0 : index
    %c0_21 = arith.constant 0 : index
    %16 = vector.load %arg3[%c0_19, %c0_20, %c0_21] : memref<9x128x128xbf16, #tpu.memory_space<vmem>>, vector<9x128x128xbf16>
    %cst_22 = arith.constant 0.000000e+00 : f32
    %17 = vector.broadcast %cst_22 : f32 to vector<64x128xf32>
    %18 = vector.extract_strided_slice %15 {offsets = [0, 0, 0, 0], sizes = [1, 8, 8, 128], strides = [1, 1, 1, 1]} : vector<1x10x10x128xf32> to vector<1x8x8x128xf32>
    %19 = vector.shape_cast %18 : vector<1x8x8x128xf32> to vector<64x128xf32>
    %20 = arith.truncf %19 : vector<64x128xf32> to vector<64x128xbf16>
    %21 = vector.extract_strided_slice %16 {offsets = [0, 0, 0], sizes = [1, 128, 128], strides = [1, 1, 1]} : vector<9x128x128xbf16> to vector<1x128x128xbf16>
    %22 = vector.shape_cast %21 : vector<1x128x128xbf16> to vector<128x128xbf16>
    %cst_23 = arith.constant dense<0.000000e+00> : vector<64x128xf32>
    %23 = tpu.matmul %20, %22, %cst_23 {dimension_numbers = #tpu.dot_dimension_numbers<[1], [0], [0], [1], [0, 0, 1, 1], [], []>} : vector<64x128xbf16>, vector<128x128xbf16>, vector<64x128xf32> -> vector<64x128xf32>
    %24 = arith.addf %17, %23 : vector<64x128xf32>
    %25 = vector.extract_strided_slice %15 {offsets = [0, 0, 1, 0], sizes = [1, 8, 8, 128], strides = [1, 1, 1, 1]} : vector<1x10x10x128xf32> to vector<1x8x8x128xf32>
    %26 = vector.shape_cast %25 : vector<1x8x8x128xf32> to vector<64x128xf32>
    %27 = arith.truncf %26 : vector<64x128xf32> to vector<64x128xbf16>
    %28 = vector.extract_strided_slice %16 {offsets = [1, 0, 0], sizes = [1, 128, 128], strides = [1, 1, 1]} : vector<9x128x128xbf16> to vector<1x128x128xbf16>
    %29 = vector.shape_cast %28 : vector<1x128x128xbf16> to vector<128x128xbf16>
    %cst_24 = arith.constant dense<0.000000e+00> : vector<64x128xf32>
    %30 = tpu.matmul %27, %29, %cst_24 {dimension_numbers = #tpu.dot_dimension_numbers<[1], [0], [0], [1], [0, 0, 1, 1], [], []>} : vector<64x128xbf16>, vector<128x128xbf16>, vector<64x128xf32> -> vector<64x128xf32>
    %31 = arith.addf %24, %30 : vector<64x128xf32>
    %32 = vector.extract_strided_slice %15 {offsets = [0, 0, 2, 0], sizes = [1, 8, 8, 128], strides = [1, 1, 1, 1]} : vector<1x10x10x128xf32> to vector<1x8x8x128xf32>
    %33 = vector.shape_cast %32 : vector<1x8x8x128xf32> to vector<64x128xf32>
    %34 = arith.truncf %33 : vector<64x128xf32> to vector<64x128xbf16>
    %35 = vector.extract_strided_slice %16 {offsets = [2, 0, 0], sizes = [1, 128, 128], strides = [1, 1, 1]} : vector<9x128x128xbf16> to vector<1x128x128xbf16>
    %36 = vector.shape_cast %35 : vector<1x128x128xbf16> to vector<128x128xbf16>
    %cst_25 = arith.constant dense<0.000000e+00> : vector<64x128xf32>
    %37 = tpu.matmul %34, %36, %cst_25 {dimension_numbers = #tpu.dot_dimension_numbers<[1], [0], [0], [1], [0, 0, 1, 1], [], []>} : vector<64x128xbf16>, vector<128x128xbf16>, vector<64x128xf32> -> vector<64x128xf32>
    %38 = arith.addf %31, %37 : vector<64x128xf32>
    %39 = vector.extract_strided_slice %15 {offsets = [0, 1, 0, 0], sizes = [1, 8, 8, 128], strides = [1, 1, 1, 1]} : vector<1x10x10x128xf32> to vector<1x8x8x128xf32>
    %40 = vector.shape_cast %39 : vector<1x8x8x128xf32> to vector<64x128xf32>
    %41 = arith.truncf %40 : vector<64x128xf32> to vector<64x128xbf16>
    %42 = vector.extract_strided_slice %16 {offsets = [3, 0, 0], sizes = [1, 128, 128], strides = [1, 1, 1]} : vector<9x128x128xbf16> to vector<1x128x128xbf16>
    %43 = vector.shape_cast %42 : vector<1x128x128xbf16> to vector<128x128xbf16>
    %cst_26 = arith.constant dense<0.000000e+00> : vector<64x128xf32>
    %44 = tpu.matmul %41, %43, %cst_26 {dimension_numbers = #tpu.dot_dimension_numbers<[1], [0], [0], [1], [0, 0, 1, 1], [], []>} : vector<64x128xbf16>, vector<128x128xbf16>, vector<64x128xf32> -> vector<64x128xf32>
    %45 = arith.addf %38, %44 : vector<64x128xf32>
    %46 = vector.extract_strided_slice %15 {offsets = [0, 1, 1, 0], sizes = [1, 8, 8, 128], strides = [1, 1, 1, 1]} : vector<1x10x10x128xf32> to vector<1x8x8x128xf32>
    %47 = vector.shape_cast %46 : vector<1x8x8x128xf32> to vector<64x128xf32>
    %48 = arith.truncf %47 : vector<64x128xf32> to vector<64x128xbf16>
    %49 = vector.extract_strided_slice %16 {offsets = [4, 0, 0], sizes = [1, 128, 128], strides = [1, 1, 1]} : vector<9x128x128xbf16> to vector<1x128x128xbf16>
    %50 = vector.shape_cast %49 : vector<1x128x128xbf16> to vector<128x128xbf16>
    %cst_27 = arith.constant dense<0.000000e+00> : vector<64x128xf32>
    %51 = tpu.matmul %48, %50, %cst_27 {dimension_numbers = #tpu.dot_dimension_numbers<[1], [0], [0], [1], [0, 0, 1, 1], [], []>} : vector<64x128xbf16>, vector<128x128xbf16>, vector<64x128xf32> -> vector<64x128xf32>
    %52 = arith.addf %45, %51 : vector<64x128xf32>
    %53 = vector.extract_strided_slice %15 {offsets = [0, 1, 2, 0], sizes = [1, 8, 8, 128], strides = [1, 1, 1, 1]} : vector<1x10x10x128xf32> to vector<1x8x8x128xf32>
    %54 = vector.shape_cast %53 : vector<1x8x8x128xf32> to vector<64x128xf32>
    %55 = arith.truncf %54 : vector<64x128xf32> to vector<64x128xbf16>
    %56 = vector.extract_strided_slice %16 {offsets = [5, 0, 0], sizes = [1, 128, 128], strides = [1, 1, 1]} : vector<9x128x128xbf16> to vector<1x128x128xbf16>
    %57 = vector.shape_cast %56 : vector<1x128x128xbf16> to vector<128x128xbf16>
    %cst_28 = arith.constant dense<0.000000e+00> : vector<64x128xf32>
    %58 = tpu.matmul %55, %57, %cst_28 {dimension_numbers = #tpu.dot_dimension_numbers<[1], [0], [0], [1], [0, 0, 1, 1], [], []>} : vector<64x128xbf16>, vector<128x128xbf16>, vector<64x128xf32> -> vector<64x128xf32>
    %59 = arith.addf %52, %58 : vector<64x128xf32>
    %60 = vector.extract_strided_slice %15 {offsets = [0, 2, 0, 0], sizes = [1, 8, 8, 128], strides = [1, 1, 1, 1]} : vector<1x10x10x128xf32> to vector<1x8x8x128xf32>
    %61 = vector.shape_cast %60 : vector<1x8x8x128xf32> to vector<64x128xf32>
    %62 = arith.truncf %61 : vector<64x128xf32> to vector<64x128xbf16>
    %63 = vector.extract_strided_slice %16 {offsets = [6, 0, 0], sizes = [1, 128, 128], strides = [1, 1, 1]} : vector<9x128x128xbf16> to vector<1x128x128xbf16>
    %64 = vector.shape_cast %63 : vector<1x128x128xbf16> to vector<128x128xbf16>
    %cst_29 = arith.constant dense<0.000000e+00> : vector<64x128xf32>
    %65 = tpu.matmul %62, %64, %cst_29 {dimension_numbers = #tpu.dot_dimension_numbers<[1], [0], [0], [1], [0, 0, 1, 1], [], []>} : vector<64x128xbf16>, vector<128x128xbf16>, vector<64x128xf32> -> vector<64x128xf32>
    %66 = arith.addf %59, %65 : vector<64x128xf32>
    %67 = vector.extract_strided_slice %15 {offsets = [0, 2, 1, 0], sizes = [1, 8, 8, 128], strides = [1, 1, 1, 1]} : vector<1x10x10x128xf32> to vector<1x8x8x128xf32>
    %68 = vector.shape_cast %67 : vector<1x8x8x128xf32> to vector<64x128xf32>
    %69 = arith.truncf %68 : vector<64x128xf32> to vector<64x128xbf16>
    %70 = vector.extract_strided_slice %16 {offsets = [7, 0, 0], sizes = [1, 128, 128], strides = [1, 1, 1]} : vector<9x128x128xbf16> to vector<1x128x128xbf16>
    %71 = vector.shape_cast %70 : vector<1x128x128xbf16> to vector<128x128xbf16>
    %cst_30 = arith.constant dense<0.000000e+00> : vector<64x128xf32>
    %72 = tpu.matmul %69, %71, %cst_30 {dimension_numbers = #tpu.dot_dimension_numbers<[1], [0], [0], [1], [0, 0, 1, 1], [], []>} : vector<64x128xbf16>, vector<128x128xbf16>, vector<64x128xf32> -> vector<64x128xf32>
    %73 = arith.addf %66, %72 : vector<64x128xf32>
    %74 = vector.extract_strided_slice %15 {offsets = [0, 2, 2, 0], sizes = [1, 8, 8, 128], strides = [1, 1, 1, 1]} : vector<1x10x10x128xf32> to vector<1x8x8x128xf32>
    %75 = vector.shape_cast %74 : vector<1x8x8x128xf32> to vector<64x128xf32>
    %76 = arith.truncf %75 : vector<64x128xf32> to vector<64x128xbf16>
    %77 = vector.extract_strided_slice %16 {offsets = [8, 0, 0], sizes = [1, 128, 128], strides = [1, 1, 1]} : vector<9x128x128xbf16> to vector<1x128x128xbf16>
    %78 = vector.shape_cast %77 : vector<1x128x128xbf16> to vector<128x128xbf16>
    %cst_31 = arith.constant dense<0.000000e+00> : vector<64x128xf32>
    %79 = tpu.matmul %76, %78, %cst_31 {dimension_numbers = #tpu.dot_dimension_numbers<[1], [0], [0], [1], [0, 0, 1, 1], [], []>} : vector<64x128xbf16>, vector<128x128xbf16>, vector<64x128xf32> -> vector<64x128xf32>
    %80 = arith.addf %73, %79 : vector<64x128xf32>
    %81 = vector.shape_cast %80 : vector<64x128xf32> to vector<1x8x8x128xf32>
    %82 = arith.truncf %81 : vector<1x8x8x128xf32> to vector<1x8x8x128xbf16>
    %c0_32 = arith.constant 0 : index
    %c0_33 = arith.constant 0 : index
    %c0_34 = arith.constant 0 : index
    %c0_35 = arith.constant 0 : index
    %83 = vector.load %arg4[%c0_32, %c0_33, %c0_34, %c0_35] : memref<1x8x8x128xbf16, #tpu.memory_space<vmem>>, vector<1x8x8x128xbf16>
    tpu.vector_store %arg4[%c0_32, %c0_33, %c0_34, %c0_35], %82 {strides = array<i32>} : memref<1x8x8x128xbf16, #tpu.memory_space<vmem>>, vector<1x8x8x128xbf16>,
    %cst_36 = arith.constant dense<0.000000e+00> : vector<128xf32>
    %84 = vector.multi_reduction <add>, %80, %cst_36 [0] : vector<64x128xf32> to vector<128xf32>
    %85 = vector.shape_cast %84 : vector<128xf32> to vector<1x128xf32>
    %c0_37 = arith.constant 0 : index
    %c0_38 = arith.constant 0 : index
    %c0_39 = arith.constant 0 : index
    %86 = vector.load %arg5[%c0_37, %c0_38, %c0_39] : memref<1x2x128xf32, #tpu.memory_space<vmem>>, vector<1x1x128xf32>
    %87 = vector.shape_cast %86 : vector<1x1x128xf32> to vector<1x128xf32>
    %88 = vector.shape_cast %85 : vector<1x128xf32> to vector<1x1x128xf32>
    tpu.vector_store %arg5[%c0_37, %c0_38, %c0_39], %88 {strides = array<i32>} : memref<1x2x128xf32, #tpu.memory_space<vmem>>, vector<1x1x128xf32>,
    %89 = arith.mulf %80, %80 : vector<64x128xf32>
    %cst_40 = arith.constant dense<0.000000e+00> : vector<128xf32>
    %90 = vector.multi_reduction <add>, %89, %cst_40 [0] : vector<64x128xf32> to vector<128xf32>
    %91 = vector.shape_cast %90 : vector<128xf32> to vector<1x128xf32>
    %c0_41 = arith.constant 0 : index
    %c1_42 = arith.constant 1 : index
    %c0_43 = arith.constant 0 : index
    %92 = vector.load %arg5[%c0_41, %c1_42, %c0_43] : memref<1x2x128xf32, #tpu.memory_space<vmem>>, vector<1x1x128xf32>
    %93 = vector.shape_cast %92 : vector<1x1x128xf32> to vector<1x128xf32>
    %94 = vector.shape_cast %91 : vector<1x128xf32> to vector<1x1x128xf32>
    tpu.vector_store %arg5[%c0_41, %c1_42, %c0_43], %94 {strides = array<i32>} : memref<1x2x128xf32, #tpu.memory_space<vmem>>, vector<1x1x128xf32>,
    return
  }
  func.func @transform_0(%arg0: i32) -> (i32, i32, i32, i32) {
    %c0_i32 = arith.constant 0 : i32
    %c0_i32_0 = arith.constant 0 : i32
    %c0_i32_1 = arith.constant 0 : i32
    %c0_i32_2 = arith.constant 0 : i32
    return %arg0, %c0_i32, %c0_i32_0, %c0_i32_1 : i32, i32, i32, i32
  }
  func.func @transform_1(%arg0: i32) -> (i32, i32) {
    %c0_i32 = arith.constant 0 : i32
    %c0_i32_0 = arith.constant 0 : i32
    %c0_i32_1 = arith.constant 0 : i32
    return %c0_i32, %c0_i32_0 : i32, i32
  }
  func.func @transform_2(%arg0: i32) -> (i32, i32, i32) {
    %c0_i32 = arith.constant 0 : i32
    %c0_i32_0 = arith.constant 0 : i32
    %c0_i32_1 = arith.constant 0 : i32
    %c0_i32_2 = arith.constant 0 : i32
    return %c0_i32, %c0_i32_0, %c0_i32_1 : i32, i32, i32
  }
  func.func @transform_3(%arg0: i32) -> (i32, i32, i32, i32) {
    %c0_i32 = arith.constant 0 : i32
    %c0_i32_0 = arith.constant 0 : i32
    %c0_i32_1 = arith.constant 0 : i32
    %c0_i32_2 = arith.constant 0 : i32
    return %arg0, %c0_i32, %c0_i32_0, %c0_i32_1 : i32, i32, i32, i32
  }
  func.func @transform_4(%arg0: i32) -> (i32, i32, i32) {
    %c0_i32 = arith.constant 0 : i32
    %c0_i32_0 = arith.constant 0 : i32
    %c0_i32_1 = arith.constant 0 : i32
    return %arg0, %c0_i32, %c0_i32_0 : i32, i32, i32
  }
}

module attributes {stable_mosaic.version = 11 : i64} {
  func.func @_bn_add_relu_kernel(%arg0: i32, %arg1: memref<1x8x8x128xbf16, #tpu.memory_space<vmem>>, %arg2: memref<2x128xf32, #tpu.memory_space<vmem>>, %arg3: memref<1x8x8x128xf32, #tpu.memory_space<vmem>>, %arg4: memref<1x8x8x128xf32, #tpu.memory_space<vmem>>) attributes {dimension_semantics = [#tpu.dimension_semantics<parallel>], iteration_bounds = array<i64: 2>, scalar_prefetch = 0 : i64, scratch_operands = 0 : i64, tpu.core_type = #tpu.core_type<tc>, window_params = [{transform_indices = @transform_0, window_bounds = array<i64: 1, 8, 8, 128>}, {pipeline_mode = #tpu.pipeline_mode<synchronous>, transform_indices = @transform_1, window_bounds = array<i64: 2, 128>}, {transform_indices = @transform_2, window_bounds = array<i64: 1, 8, 8, 128>}, {transform_indices = @transform_3, window_bounds = array<i64: 1, 8, 8, 128>}]} {
    %c0 = arith.constant 0 : index
    %c0_0 = arith.constant 0 : index
    %0 = vector.load %arg2[%c0, %c0_0] : memref<2x128xf32, #tpu.memory_space<vmem>>, vector<1x128xf32>
    %c1 = arith.constant 1 : index
    %c0_1 = arith.constant 0 : index
    %1 = vector.load %arg2[%c1, %c0_1] : memref<2x128xf32, #tpu.memory_space<vmem>>, vector<1x128xf32>
    %c0_2 = arith.constant 0 : index
    %c0_3 = arith.constant 0 : index
    %c0_4 = arith.constant 0 : index
    %c0_5 = arith.constant 0 : index
    %2 = vector.load %arg1[%c0_2, %c0_3, %c0_4, %c0_5] : memref<1x8x8x128xbf16, #tpu.memory_space<vmem>>, vector<1x8x8x128xbf16>
    %3 = arith.extf %2 : vector<1x8x8x128xbf16> to vector<1x8x8x128xf32>
    %4 = vector.shape_cast %0 : vector<1x128xf32> to vector<1x1x1x128xf32>
    %5 = vector.broadcast %4 : vector<1x1x1x128xf32> to vector<1x8x8x128xf32>
    %6 = arith.mulf %3, %5 : vector<1x8x8x128xf32>
    %7 = vector.shape_cast %1 : vector<1x128xf32> to vector<1x1x1x128xf32>
    %8 = vector.broadcast %7 : vector<1x1x1x128xf32> to vector<1x8x8x128xf32>
    %9 = arith.addf %6, %8 : vector<1x8x8x128xf32>
    %c0_6 = arith.constant 0 : index
    %c0_7 = arith.constant 0 : index
    %c0_8 = arith.constant 0 : index
    %c0_9 = arith.constant 0 : index
    %10 = vector.load %arg3[%c0_6, %c0_7, %c0_8, %c0_9] : memref<1x8x8x128xf32, #tpu.memory_space<vmem>>, vector<1x8x8x128xf32>
    %11 = arith.addf %9, %10 : vector<1x8x8x128xf32>
    %cst = arith.constant 0.000000e+00 : f32
    %12 = vector.broadcast %cst : f32 to vector<1x8x8x128xf32>
    %13 = arith.maximumf %11, %12 : vector<1x8x8x128xf32>
    %c0_10 = arith.constant 0 : index
    %c0_11 = arith.constant 0 : index
    %c0_12 = arith.constant 0 : index
    %c0_13 = arith.constant 0 : index
    %14 = vector.load %arg4[%c0_10, %c0_11, %c0_12, %c0_13] : memref<1x8x8x128xf32, #tpu.memory_space<vmem>>, vector<1x8x8x128xf32>
    tpu.vector_store %arg4[%c0_10, %c0_11, %c0_12, %c0_13], %13 {strides = array<i32>} : memref<1x8x8x128xf32, #tpu.memory_space<vmem>>, vector<1x8x8x128xf32>,
    return
  }
  func.func @transform_0(%arg0: i32) -> (i32, i32, i32, i32) {
    %c0_i32 = arith.constant 0 : i32
    %c0_i32_0 = arith.constant 0 : i32
    %c0_i32_1 = arith.constant 0 : i32
    %c0_i32_2 = arith.constant 0 : i32
    return %arg0, %c0_i32, %c0_i32_0, %c0_i32_1 : i32, i32, i32, i32
  }
  func.func @transform_1(%arg0: i32) -> (i32, i32) {
    %c0_i32 = arith.constant 0 : i32
    %c0_i32_0 = arith.constant 0 : i32
    %c0_i32_1 = arith.constant 0 : i32
    return %c0_i32, %c0_i32_0 : i32, i32
  }
  func.func @transform_2(%arg0: i32) -> (i32, i32, i32, i32) {
    %c0_i32 = arith.constant 0 : i32
    %c0_i32_0 = arith.constant 0 : i32
    %c0_i32_1 = arith.constant 0 : i32
    %c0_i32_2 = arith.constant 0 : i32
    return %arg0, %c0_i32, %c0_i32_0, %c0_i32_1 : i32, i32, i32, i32
  }
  func.func @transform_3(%arg0: i32) -> (i32, i32, i32, i32) {
    %c0_i32 = arith.constant 0 : i32
    %c0_i32_0 = arith.constant 0 : i32
    %c0_i32_1 = arith.constant 0 : i32
    %c0_i32_2 = arith.constant 0 : i32
    return %arg0, %c0_i32, %c0_i32_0, %c0_i32_1 : i32, i32, i32, i32
  }
}

</mosaic_0001>

<bundles_post_ra>
// kernel: cifar_residual_block.5
= control target key start
LH: loop header
LB: loop body
LE: loop exit
PB: predicated region body
PF: predicated region fallthrough
CT: control target
= control target key end

     0   :  { %8 = vsyncpa [#allocation3], 0  ;;  %s997_s0 = inlined_call_operand.hbm [shape: bf16[2,8,8,128], index: 0, kind: input, shape index: {}]   ;;  %s998_s1 = inlined_call_operand.hbm [shape: f32[2,128], index: 1, kind: input, shape index: {}]   ;;  %s999_s2 = inlined_call_operand.hbm [shape: f32[2,8,8,128], index: 2, kind: input, shape index: {}]   ;;  %s1000_s3 = inlined_call_operand.hbm [shape: f32[2,8,8,128], index: 3, kind: output, shape index: {}]  }
   0x1   :  { %10 = vsyncpa [#allocation3 + $0x1], 0 }
   0x2   :  { %11 = vsyncpa [#allocation6], 0 }
   0x3   :  { %12 = vsyncpa [#allocation4], 0 }
   0x4   :  { %14 = vsyncpa [#allocation4 + $0x1], 0  ;;  %s736_s12 = smov 0   ;;  %s738_s13 = smov 0  }
   0x5   :  { %s740_s14 = smov 0   ;;  %s742_s15 = smov 0  }
   0x6 LB: > { %s757_s16 = sadd.s32 1, %s704_s15   ;;  %s27_s17 = sadd.s32 1, %s700_s14  ;;  %s704_s15 = sphi %s742_s15, %s1021_s15   ;;  %s700_s14 = sphi %s740_s14, %s1020_s14   ;;  %s696_s13 = sphi %s738_s13, %s1019_s13   ;;  %s692_s12 = sphi %s736_s12, %s1018_s12  }
   0x7   : > { %s24_s18 = ssub.s32 %s704_s15, %s757_s16  ;;  %p34_p0 = scmp.ne.s32.totalorder %s700_s14, %s696_s13 }
   0x8   : > { %p25_p1 = scmp.eq.s32.totalorder %s24_s18, 0  ;;  %p35_p2 = scmp.eq.s32.totalorder %s704_s15, 0 }
   0x9   : > { %p500_p4 = scmp.lt.s32.totalorder %s704_s15, 2  ;;  %s148_s20 = sand.u32 1, %s704_s15  }
   0xa   : > { %s768_s19 = scalar_select %p25_p1, %s700_s14, %s27_s17  }
   0xb   : > { %p36_p5 = por %p35_p2, %p34_p0  ;;  %s150_s21 = sand.u32 1, %s700_s14  }
   0xc   : > { %s434_s22 = sshll.u32 %s150_s21, 5  ;;  %s452_s23 = sshll.u32 %s704_s15, 9 }
   0xd   : > { %s781_s26 = scalar_lea.hbm %s997_s0, %s452_s23  ;;  %s152_s27 = scalar_lea.vmem [#allocation2], %s434_s22 }
   0xe   : > { %s159_s28 = sshll.u32 %s152_s27, 4  ;;  %p783_p6 = pnand %p500_p4, %p36_p5  ;;  %s787_s28 = int_to_ptr.vmem [resolvable:$true] %s159_s28 }
   0xf   : > { %s789_s30 = scalar_lea.sflag [#allocation3], %s148_s20  ;;  %s542_s4 = scalar_lea.hbm %s781_s26, 512 }
  0x10   : > { %p543_p7 = scmp.ne.s32.totalorder %s781_s26, %s542_s4  ;;  %p544_p8 = pneg %p783_p6 }
  0x11   : > { %s547_s7 = scalar_lea.hbm %s997_s0, 1024  ;;  %p548_p11 = scmp.lt.u32.totalorder %s781_s26, %s997_s0 }
  0x12   : > { %p545_p9 = pnand %p544_p8, %p543_p7  ;;  %p549_p12 = scmp.lt.u32.totalorder %s547_s7, %s542_s4 }
  0x13   : > { %p551_p1 = scmp.lt.u32.totalorder %s542_s4, %s781_s26 }
  0x14   : > { %p546_p10 = pneg %p545_p9  ;;  %p550_p13 = por %p549_p12, %p548_p11 }
  0x16   : > { %p552_p2 = por %p551_p1, %p550_p13 }
  0x18   : > { %p553_p4 = pnand %p552_p2, %p546_p10 }
  0x1a   : > { %556 = shalt.err (!%p553_p4)
}
  0x1b   : > { %s557_s10 = scalar_lea.vmem %s787_s28, 512  ;;  %s706_s11 = smov [#allocation2]  }
  0x1c   : > { %p558_p5 = scmp.ne.s32.totalorder %s787_s28, %s557_s10  ;;  %s562_s17 = sshll.u32 %s706_s11, 4  ;;  %s563_s17 = int_to_ptr.vmem [resolvable:$false] %s562_s17 }
  0x1d   : > { %s564_s18 = scalar_lea.vmem %s563_s17, 1024  ;;  %p565_p3 = scmp.lt.s32.totalorder %s787_s28, %s563_s17 }
  0x1e   : > { %p560_p7 = pnand %p558_p5, %p544_p8  ;;  %p566_p11 = scmp.lt.s32.totalorder %s564_s18, %s557_s10 }
  0x20   : > { %p561_p9 = pneg %p560_p7  ;;  %p567_p12 = por %p566_p11, %p565_p3 }
  0x22   : > { %p568_p13 = pnand %p567_p12, %p561_p9 }
  0x24   : > { %571 = shalt.err (!%p568_p13)
}
  0x25   : > { %s707_s20 = smov 64   ;;  %s708_s22 = smov 4  }
  0x26   : > { %491 = dma.hbm_to_vmem [thread:$0]  (!%p783_p6), %s781_s26, 512, %s787_s28, %s789_s30, %s707_s20, %s707_s20, %s708_s22  }
  0x27   : > { %s437_s23 = sshll.u32 %s150_s21, 6  ;;  %s820_s27 = sadd.s32 4294967295, %s704_s15  }
  0x28   : > { %s173_s24 = scalar_lea.vmem [#allocation7], %s437_s23  ;;  %s430_s4 = sadd.s32 4294967294, %s704_s15  }
  0x29   : > { %s180_s25 = sshll.u32 %s173_s24, 4  ;;  %p40_p3 = scmp.ne.s32.totalorder %s696_s13, %s692_s12  ;;  %s860_s25 = int_to_ptr.vmem [resolvable:$true] %s180_s25 }
  0x2a   : > { %p1001_p10 = scmp.eq.s32.totalorder %s820_s27, 0  ;;  %p111_p1 = scmp.eq.s32.totalorder %s820_s27, 1 }
  0x2b   : > { %p117_p2 = scmp.eq.s32.totalorder %s430_s4, 1  ;;  %p431_p4 = scmp.ge.s32.totalorder %s704_s15, 1 }
  0x2c   : > { %p830_p5 = por %p1001_p10, %p40_p3  ;;  %p837_p7 = por %p111_p1, %p34_p0 }
  0x2d   : > { %p841_p9 = por %p117_p2, %p40_p3  ;;  %p124_p11 = scmp.lt.s32.totalorder %s704_s15, 3 }
  0x2e   : > { %s1006_s26 = scalar_select %p830_p5, 1, 0 }
  0x2f   : > { %s1007_s21 = scalar_select %p837_p7, 1, 0 }
  0x30   : > { %s1008_s28 = scalar_select %p841_p9, 1, 0 }
  0x31   : > { %p846_p12 = pnand %p431_p4, %p124_p11  ;;  %s709_s6 = smov [#allocation5]  }
  0x32   : > { %s137_s7 = sshll.u32 %s709_s6, 4  ;;  %s453_s8 = sshll.u32 %s704_s15, 10  ;;  %s850_s7 = int_to_ptr.vmem [resolvable:$true] %s137_s7 }
  0x33   : > { %s1009_s5 = scalar_select %p846_p12, 1, 0 }
  0x34   : > { %p484_p0 = pneg %p846_p12  ;;  %s858_s11 = scalar_lea.hbm %s999_s2, %s453_s8 }
  0x35   : > { %s572_s18 = scalar_lea.hbm %s858_s11, 1024  ;;  %s577_s23 = scalar_lea.hbm %s999_s2, 2048 }
  0x36   : > { %p864_p13 = pnand %p484_p0, %p1001_p10  ;;  %p573_p3 = scmp.ne.s32.totalorder %s858_s11, %s572_s18 }
  0x37   : > { %p578_p4 = scmp.lt.u32.totalorder %s858_s11, %s999_s2  ;;  %p579_p11 = scmp.lt.u32.totalorder %s577_s23, %s572_s18 }
  0x38   : > { %p575_p1 = pnand %p573_p3, %p544_p8  ;;  %p581_p0 = scmp.lt.u32.totalorder %s572_s18, %s858_s11 }
  0x39   : > { %p580_p9 = por %p579_p11, %p578_p4 }
  0x3a   : > { %p576_p2 = pneg %p575_p1 }
  0x3b   : > { %p582_p10 = por %p581_p0, %p580_p9 }
  0x3d   : > { %p583_p7 = pnand %p582_p10, %p576_p2 }
  0x3f   : > { %586 = shalt.err (!%p583_p7)
}
  0x40   : > { %s587_s6 = scalar_lea.vmem %s860_s25, 1024  ;;  %s710_s8 = smov [#allocation7]  }
  0x41   : > { %p588_p3 = scmp.ne.s32.totalorder %s860_s25, %s587_s6  ;;  %s592_s9 = sshll.u32 %s710_s8, 4  ;;  %s593_s9 = int_to_ptr.vmem [resolvable:$false] %s592_s9 }
  0x42   : > { %s594_s10 = scalar_lea.vmem %s593_s9, 2048  ;;  %p595_p12 = scmp.lt.s32.totalorder %s860_s25, %s593_s9 }
  0x43   : > { %p590_p1 = pnand %p588_p3, %p544_p8  ;;  %p596_p4 = scmp.lt.s32.totalorder %s594_s10, %s587_s6 }
  0x45   : > { %p591_p5 = pneg %p590_p1  ;;  %p597_p11 = por %p596_p4, %p595_p12 }
  0x47   : > { %p598_p9 = pnand %p597_p11, %p591_p5 }
  0x49   : > { %601 = shalt.err (!%p598_p9)
}
  0x4a   : > { %s711_s18 = smov 128   ;;  %s712_s20 = smov 8  }
  0x4b   : > { %494 = dma.hbm_to_vmem [thread:$0]  (!%p783_p6), %s858_s11, 1024, %s860_s25, %s789_s30, %s711_s18, %s711_s18, %s712_s20  }
  0x4c   : > { %s602_s24 = scalar_lea.hbm %s998_s1, 32  ;;  %p604_p10 = pneg %p864_p13 }
  0x4d   : > { %p603_p8 = scmp.ne.s32.totalorder %s998_s1, %s602_s24  ;;  %p609_p12 = scmp.lt.u32.totalorder %s602_s24, %s998_s1 }
  0x4f   : > { %p605_p5 = pnand %p604_p10, %p603_p8 }
  0x51   : > { %p606_p7 = pneg %p605_p5 }
  0x53   : > { %p611_p2 = pnand %p609_p12, %p606_p7 }
  0x55   : > { %614 = shalt.err (!%p611_p2)
}
  0x56   : > { %s615_s29 = scalar_lea.vmem %s850_s7, 32  ;;  %p623_p1 = scmp.lt.s32.totalorder %s850_s7, %s850_s7 }
  0x57   : > { %p616_p6 = scmp.ne.s32.totalorder %s850_s7, %s615_s29  ;;  %p624_p4 = scmp.lt.s32.totalorder %s615_s29, %s615_s29 }
  0x59   : > { %p618_p0 = pnand %p616_p6, %p604_p10  ;;  %p625_p11 = por %p624_p4, %p623_p1 }
  0x5b   : > { %p619_p3 = pneg %p618_p0 }
  0x5d   : > { %p626_p9 = pnand %p625_p11, %p619_p3 }
  0x5f   : > { %629 = shalt.err (!%p626_p9)
}
  0x60   : > { %487 = dma.hbm_to_vmem [thread:$0]  (!%p864_p13), %s998_s1, 32, %s850_s7, [#allocation6]  }
  0x61   : > { %p1011_p8 = scmp.ne.s32.totalorder %s1009_s5, 0 }
  0x62   : > { %s194_s11 = sand.u32 (!%p1011_p8), 1, %s820_s27   ;;  %s917_s10 = sand.u32 (!%p1011_p8), 1, %s696_s13  }
  0x63   : > { %192 = sbr.rel (%p1011_p8) target bundleno = 142 (0x8e), region = 32  ;;  %s441_s18 = sshll.u32 (!%p1011_p8), %s917_s10, 5 }
  0x64   : > { %s195_s20 = scalar_lea.sflag (!%p1011_p8), [#allocation3], %s194_s11  ;;  %s198_s22 = scalar_lea.vmem (!%p1011_p8), [#allocation2], %s441_s18 }
  0x65   : > { %p1012_p10 = scmp.ne.s32.totalorder (!%p1011_p8), %s1006_s26, 0 }
  0x6a   : > { %675 = dma.done.wait (%p1012_p10), %s195_s20, 512  }
  0x6b   : > { %677 = vsyncadd (%p1012_p10), %s195_s20, 4294966784  ;;  %p1013_p13 = scmp.eq.s32.totalorder %s820_s27, 0 }
  0x6d   : > { %679 = dma.done.wait (%p1013_p13), [#allocation6], 32   ;;  %p1014_p5 = pmov %p1013_p13 }
  0x6e   : > { %s443_s5 = sshll.u32 %s917_s10, 6 }
  0x6f   : > { %681 = vsyncadd (%p1014_p5), [#allocation6], 4294967264  ;;  %s931_s7 = scalar_lea.vmem [#allocation7], %s443_s5 }
  0x70   : > { %683 = dma.done.wait (%p1012_p10), %s195_s20, 1024  }
  0x71   : > { %685 = vsyncadd (%p1012_p10), %s195_s20, 4294966272  ;;  %v445_v0 = vld [vmem:[#allocation5] ss:$0 sm:$0xff]  ;;  %v471_v4 = vld [vmem:[%s198_s22 + $0x8] sm:$0xff]   ;;  %s238_s26 = scalar_lea.vmem [#allocation8], %s443_s5  ;;  %s454_s23 = sshll.u32 %s820_s27, 10 }
  0x72   : > { %v456_v1 = vld [vmem:[%s198_s22] sm:$0xff]   ;;  %v461_v6 = vunpack.c.l.bf16 %v471_v4  ;;  %v462_v7 = vunpack.c.h.bf16 %v471_v4  ;;  %v472_v8 = vld [vmem:[%s198_s22 + $0x10] sm:$0xff]   ;;  %v473_v13 = vld [vmem:[%s198_s22 + $0x18] sm:$0xff]   ;;  %s327_s17 = sshll.u32 %s238_s26, 4  ;;  %s953_s4 = scalar_lea.hbm %s1000_s3, %s454_s23  ;;  %s948_s17 = int_to_ptr.vmem [resolvable:$true] %s327_s17 }
  0x73   : > { %v457_v2 = vunpack.c.l.bf16 %v456_v1  ;;  %v458_v3 = vunpack.c.h.bf16 %v456_v1  ;;  %v446_v5 = vld [vmem:[#allocation5 + $0x1] ss:$0 sm:$0xff]  ;;  %v465_v11 = vunpack.c.l.bf16 %v472_v8  ;;  %v466_v12 = vunpack.c.h.bf16 %v472_v8  ;;  %v281_v14 = vld [vmem:[%s931_s7] sm:$0xff]  ;;  %v282_v15 = vld [vmem:[%s931_s7 + $0x8] sm:$0xff]  ;;  %s314_s8 = scalar_lea.sflag [#allocation4], %s917_s10  ;;  %s630_s6 = scalar_lea.vmem %s948_s17, 1024 }
  0x74   : > { %v263_v16 = vmul.f32 %v461_v6, %v445_v0  ;;  %v264_v17 = vmul.f32 %v462_v7, %v445_v0  ;;  %v469_v18 = vunpack.c.l.bf16 %v473_v13  ;;  %v470_v19 = vunpack.c.h.bf16 %v473_v13  ;;  %v283_v22 = vld [vmem:[%s931_s7 + $0x10] sm:$0xff]  ;;  %v284_v23 = vld [vmem:[%s931_s7 + $0x18] sm:$0xff]  ;;  %v285_v28 = vld [vmem:[%s931_s7 + $0x20] sm:$0xff]  ;;  %p631_p7 = scmp.ne.s32.totalorder %s948_s17, %s630_s6  ;;  %p1015_p12 = scmp.ne.s32.totalorder %s1007_s21, 0 }
  0x75   : > { %v261_v9 = vmul.f32 %v457_v2, %v445_v0  ;;  %v262_v10 = vmul.f32 %v458_v3, %v445_v0  ;;  %v265_v24 = vmul.f32 %v465_v11, %v445_v0  ;;  %v266_v25 = vmul.f32 %v466_v12, %v445_v0  ;;  %v286_v29 = vld [vmem:[%s931_s7 + $0x28] sm:$0xff]  ;;  %v287_v36 = vld [vmem:[%s931_s7 + $0x30] sm:$0xff]  ;;  %v288_v37 = vld [vmem:[%s931_s7 + $0x38] sm:$0xff]  ;;  %s713_s9 = smov [#allocation8]  }
  0x76   : > { %v275_v26 = vadd.f32 %v446_v5, %v263_v16  ;;  %v276_v27 = vadd.f32 %v446_v5, %v264_v17  ;;  %v267_v30 = vmul.f32 %v469_v18, %v445_v0  ;;  %v268_v31 = vmul.f32 %v470_v19, %v445_v0  ;;  %p632_p2 = pnand %p631_p7, %p1015_p12  ;;  %s634_s29 = sshll.u32 %s713_s9, 4  ;;  %s635_s29 = int_to_ptr.vmem [resolvable:$false] %s634_s29 }
  0x77   : > { %v273_v20 = vadd.f32 %v446_v5, %v261_v9  ;;  %v274_v21 = vadd.f32 %v446_v5, %v262_v10  ;;  %v277_v34 = vadd.f32 %v446_v5, %v265_v24  ;;  %v278_v35 = vadd.f32 %v446_v5, %v266_v25  ;;  %s636_s30 = scalar_lea.vmem %s635_s29, 2048  ;;  %p637_p0 = scmp.lt.s32.totalorder %s948_s17, %s635_s29 }
  0x78   : > { %v291_v38 = vadd.f32 %v283_v22, %v275_v26  ;;  %v292_v39 = vadd.f32 %v284_v23, %v276_v27  ;;  %v279_v40 = vadd.f32 %v446_v5, %v267_v30  ;;  %v280_v41 = vadd.f32 %v446_v5, %v268_v31  ;;  %p633_p6 = pneg %p632_p2  ;;  %p638_p3 = scmp.lt.s32.totalorder %s636_s30, %s630_s6 }
  0x79   : > { %v289_v32 = vadd.f32 %v281_v14, %v273_v20  ;;  %v290_v33 = vadd.f32 %v282_v15, %v274_v21  ;;  %v293_v44 = vadd.f32 %v285_v28, %v277_v34  ;;  %v294_v45 = vadd.f32 %v286_v29, %v278_v35 }
  0x7a   : > { %v299_v46 = vmax.f32 %v291_v38, 0.0  ;;  %v300_v47 = vmax.f32 %v292_v39, 0.0  ;;  %v295_v48 = vadd.f32 %v287_v36, %v279_v40  ;;  %v296_v49 = vadd.f32 %v288_v37, %v280_v41  ;;  %p639_p1 = por %p638_p3, %p637_p0 }
  0x7b   : > { %v297_v42 = vmax.f32 %v289_v32, 0.0  ;;  %v298_v43 = vmax.f32 %v290_v33, 0.0  ;;  %v301_v50 = vmax.f32 %v293_v44, 0.0  ;;  %v302_v51 = vmax.f32 %v294_v45, 0.0 }
  0x7c   : > { %307 = vst [vmem:[%s238_s26 + $0x10] sm:$0xff] %v299_v46  ;;  %308 = vst [vmem:[%s238_s26 + $0x18] sm:$0xff] %v300_v47  ;;  %v303_v52 = vmax.f32 %v295_v48, 0.0  ;;  %v304_v53 = vmax.f32 %v296_v49, 0.0  ;;  %p640_p4 = pnand %p639_p1, %p633_p6 }
  0x7d   : > { %305 = vst [vmem:[%s238_s26] sm:$0xff] %v297_v42  ;;  %306 = vst [vmem:[%s238_s26 + $0x8] sm:$0xff] %v298_v43 }
  0x7e   : > { %309 = vst [vmem:[%s238_s26 + $0x20] sm:$0xff] %v301_v50  ;;  %310 = vst [vmem:[%s238_s26 + $0x28] sm:$0xff] %v302_v51 }
  0x7f   : > { %311 = vst [vmem:[%s238_s26 + $0x30] sm:$0xff] %v303_v52  ;;  %312 = vst [vmem:[%s238_s26 + $0x38] sm:$0xff] %v304_v53 }
  0x80   : > { %643 = shalt.err (!%p640_p4)
}
  0x81   : > { %s644_s25 = scalar_lea.hbm %s953_s4, 1024  ;;  %s648_s20 = scalar_lea.hbm %s1000_s3, 2048 }
  0x82   : > { %p645_p11 = scmp.ne.s32.totalorder %s953_s4, %s644_s25  ;;  %p649_p10 = scmp.lt.u32.totalorder %s953_s4, %s1000_s3 }
  0x83   : > { %p650_p13 = scmp.lt.u32.totalorder %s648_s20, %s644_s25  ;;  %p652_p7 = scmp.lt.u32.totalorder %s644_s25, %s953_s4 }
  0x84   : > { %p646_p9 = pnand %p645_p11, %p1015_p12 }
  0x85   : > { %p651_p5 = por %p650_p13, %p649_p10 }
  0x86   : > { %p647_p8 = pneg %p646_p9 }
  0x87   : > { %p653_p2 = por %p652_p7, %p651_p5 }
  0x89   : > { %p654_p6 = pnand %p653_p2, %p647_p8 }
  0x8b   : > { %657 = shalt.err (!%p654_p6)
}
  0x8c   : > { %s714_s7 = smov 128   ;;  %s715_s26 = smov 8  }
  0x8d   : > { %482 = dma.vmem_to_hbm [thread:$0]  (%p1015_p12), %s948_s17, 1024, %s953_s4, %s314_s8, %s714_s7, %s714_s7, %s715_s26  }
  0x8e PF: > { %s342_s23 = sand.u32 1, %s692_s12   ;;  %p1016_p0 = scmp.ne.s32.totalorder %s1008_s28, 0 }
  0x8f   : > { %p1017_p3 = scmp.ge.s32.totalorder %s704_s15, 2  ;;  %s343_s24 = scalar_lea.sflag [#allocation4], %s342_s23 }
  0x91   : > { %p496_p1 = pnand %p1017_p3, %p1016_p0 }
  0x93   : > { %687 = dma.done.wait (!%p496_p1), %s343_s24, 1024  }
  0x94   : > { %689 = vsyncadd (!%p496_p1), %s343_s24, 4294966272  ;;  %p17_p4 = scmp.ge.s32.totalorder %s757_s16, 4   ;;  %s1018_s12 = smov %s696_s13 }
  0x95   : > { %s1019_s13 = smov %s700_s14  ;;  %s1020_s14 = smov %s768_s19 }
  0x96   : > { %s1021_s15 = smov %s757_s16  ;;  %19 = sbr.rel (!%p17_p4) target bundleno = 6 (0x6), region = 92 }
  0x9d   :  { %348 = vsyncpa [#allocation3], 1 }
  0x9e   :  { %350 = vsyncpa [#allocation3 + $0x1], 1 }
  0x9f   :  { %351 = vsyncpa [#allocation6], 1 }
  0xa0   :  { %352 = vsyncpa [#allocation4], 1 }
  0xa1   :  { %354 = vsyncpa [#allocation4 + $0x1], 1 }

// kernel: cifar_residual_block.3
= control target key start
LH: loop header
LB: loop body
LE: loop exit
PB: predicated region body
PF: predicated region fallthrough
CT: control target
= control target key end

     0   :  { %9 = vsyncpa [#allocation3], 0  ;;  %s2519_s0 = inlined_call_operand.hbm [shape: bf16[2,4,9,9,4], index: 0, kind: input, shape index: {}]   ;;  %s2520_s1 = inlined_call_operand.hbm [shape: bf16[9,4,128], index: 1, kind: input, shape index: {}]   ;;  %s2521_s2 = inlined_call_operand.hbm [shape: bf16[2,8,8,128], index: 2, kind: output, shape index: {0}]   ;;  %s2522_s3 = inlined_call_operand.hbm [shape: f32[2,2,128], index: 3, kind: output, shape index: {1}]  }
   0x1   :  { %11 = vsyncpa [#allocation3 + $0x1], 0 }
   0x2   :  { %12 = vsyncpa [#allocation6], 0 }
   0x3   :  { %13 = vsyncpa [#allocation4], 0 }
   0x4   :  { %15 = vsyncpa [#allocation4 + $0x1], 0 }
   0x5   :  { %16 = vsyncpa [#allocation9], 0 }
   0x6   :  { %18 = vsyncpa [#allocation9 + $0x1], 0  ;;  %s2041_s12 = smov 0   ;;  %s2043_s13 = smov 0  }
   0x7   :  { %s2045_s14 = smov 0   ;;  %s2047_s15 = smov 0  }
   0x8 LB: > { %s2062_s16 = sadd.s32 4294967295, %s2009_s15   ;;  %s1443_s17 = sadd.s32 4294967294, %s2009_s15   ;;  %s2009_s15 = sphi %s2047_s15, %s2542_s15   ;;  %s2005_s14 = sphi %s2045_s14, %s2541_s14   ;;  %s2001_s13 = sphi %s2043_s13, %s2540_s13   ;;  %s1997_s12 = sphi %s2041_s12, %s2539_s12  }
   0x9   : > { %p44_p0 = scmp.ne.s32.totalorder %s2001_s13, %s1997_s12  ;;  %p2523_p1 = scmp.eq.s32.totalorder %s2062_s16, 0 }
   0xa   : > { %p95_p3 = scmp.eq.s32.totalorder %s1443_s17, 1  ;;  %p1444_p5 = scmp.ge.s32.totalorder %s2009_s15, 1 }
   0xb   : > { %p2071_p4 = por %p2523_p1, %p44_p0  ;;  %p128_p7 = scmp.lt.s32.totalorder %s2009_s15, 3 }
   0xc   : > { %p2076_p6 = por %p95_p3, %p44_p0  ;;  %s2011_s21 = smov [#allocation5]  }
   0xd   : > { %s2526_s18 = scalar_select %p2071_p4, 1, 0 }
   0xe   : > { %s2527_s19 = scalar_select %p2076_p6, 1, 0 }
   0xf   : > { %p2081_p8 = pnand %p1444_p5, %p128_p7  ;;  %s140_s22 = sshll.u32 %s2011_s21, 4  ;;  %s2085_s22 = int_to_ptr.vmem [resolvable:$true] %s140_s22 }
  0x10   : > { %s2097_s24 = sadd.s32 1, %s2009_s15   ;;  %s31_s25 = sadd.s32 1, %s2005_s14 }
  0x11   : > { %s2528_s20 = scalar_select %p2081_p8, 1, 0 }
  0x12   : > { %p1767_p9 = pneg %p2081_p8  ;;  %s28_s26 = ssub.s32 %s2009_s15, %s2097_s24 }
  0x13   : > { %s1849_s29 = scalar_lea.hbm %s2520_s1, 288 }
  0x14   : > { %p2092_p11 = pnand %p1767_p9, %p2523_p1  ;;  %p1850_p12 = scmp.ne.s32.totalorder %s2520_s1, %s1849_s29 }
  0x15   : > { %p1856_p5 = scmp.lt.u32.totalorder %s1849_s29, %s2520_s1 }
  0x16   : > { %p1851_p13 = pneg %p2092_p11 }
  0x18   : > { %p1852_p0 = pnand %p1851_p13, %p1850_p12 }
  0x1a   : > { %p1853_p3 = pneg %p1852_p0 }
  0x1c   : > { %p1858_p7 = pnand %p1856_p5, %p1853_p3 }
  0x1e   : > { %1861 = shalt.err (!%p1858_p7)
}
  0x1f   : > { %s1862_s7 = scalar_lea.vmem %s2085_s22, 288  ;;  %p1870_p2 = scmp.lt.s32.totalorder %s2085_s22, %s2085_s22 }
  0x20   : > { %p1863_p9 = scmp.ne.s32.totalorder %s2085_s22, %s1862_s7  ;;  %p1871_p6 = scmp.lt.s32.totalorder %s1862_s7, %s1862_s7 }
  0x22   : > { %p1865_p10 = pnand %p1863_p9, %p1851_p13  ;;  %p1872_p4 = por %p1871_p6, %p1870_p2 }
  0x24   : > { %p1866_p1 = pneg %p1865_p10 }
  0x26   : > { %p1873_p8 = pnand %p1872_p4, %p1866_p1 }
  0x28   : > { %1876 = shalt.err (!%p1873_p8)
}
  0x29   : > { %s2012_s8 = smov 32   ;;  %s2013_s9 = smov 2  }
  0x2a   : > { %1770 = dma.hbm_to_vmem [thread:$0]  (!%p2092_p11), %s2520_s1, 288, %s2085_s22, [#allocation6], %s2012_s8, %s2012_s8, %s2013_s9  }
  0x2b   : > { %p29_p2 = scmp.eq.s32.totalorder %s28_s26, 0  ;;  %p38_p1 = scmp.ne.s32.totalorder %s2005_s14, %s2001_s13 }
  0x2c   : > { %p39_p4 = scmp.eq.s32.totalorder %s2009_s15, 0  ;;  %p1783_p6 = scmp.lt.s32.totalorder %s2009_s15, 2 }
  0x2d   : > { %s2128_s17 = scalar_select %p29_p2, %s2005_s14, %s31_s25  }
  0x2e   : > { %p40_p8 = por %p39_p4, %p38_p1  ;;  %p2530_p10 = scmp.eq.s32.totalorder %s2062_s16, 1 }
  0x2f   : > { %s154_s27 = sand.u32 1, %s2005_s14   ;;  %s1755_s28 = smul.u32 4608, %s2009_s15 }
  0x30   : > { %p2132_p12 = por %p2530_p10, %p38_p1  ;;  %s1754_s29 = smul.u32 288, %s154_s27 }
  0x31   : > { %s2141_s4 = scalar_lea.hbm %s2519_s0, %s1755_s28  ;;  %p2143_p11 = pnand %p1783_p6, %p40_p8 }
  0x32   : > { %s158_s25 = scalar_lea.vmem [#allocation2], %s1754_s29  ;;  %s2149_s5 = scalar_lea.sflag [#allocation3], %s154_s27 }
  0x33   : > { %s165_s26 = sshll.u32 %s158_s25, 4  ;;  %s1877_s6 = scalar_lea.hbm %s2141_s4, 4608  ;;  %s2147_s26 = int_to_ptr.vmem [resolvable:$true] %s165_s26 }
  0x34   : > { %p1878_p13 = scmp.ne.s32.totalorder %s2141_s4, %s1877_s6  ;;  %p1879_p0 = pneg %p2143_p11 }
  0x35   : > { %s1882_s9 = scalar_lea.hbm %s2519_s0, 9216  ;;  %p1883_p7 = scmp.lt.u32.totalorder %s2141_s4, %s2519_s0 }
  0x36   : > { %p1880_p3 = pnand %p1879_p0, %p1878_p13  ;;  %p1884_p9 = scmp.lt.u32.totalorder %s1882_s9, %s1877_s6 }
  0x37   : > { %p1886_p1 = scmp.lt.u32.totalorder %s1877_s6, %s2141_s4 }
  0x38   : > { %p1881_p5 = pneg %p1880_p3  ;;  %p1885_p2 = por %p1884_p9, %p1883_p7 }
  0x3a   : > { %p1887_p4 = por %p1886_p1, %p1885_p2 }
  0x3c   : > { %p1888_p6 = pnand %p1887_p4, %p1881_p5 }
  0x3e   : > { %1891 = shalt.err (!%p1888_p6)
}
  0x3f   : > { %s1892_s27 = scalar_lea.vmem %s2147_s26, 4608  ;;  %s2014_s28 = smov [#allocation2]  }
  0x40   : > { %p1893_p8 = scmp.ne.s32.totalorder %s2147_s26, %s1892_s27  ;;  %s1897_s29 = sshll.u32 %s2014_s28, 4  ;;  %s1898_s29 = int_to_ptr.vmem [resolvable:$false] %s1897_s29 }
  0x41   : > { %s1899_s23 = scalar_lea.vmem %s1898_s29, 9216  ;;  %p1900_p3 = scmp.lt.s32.totalorder %s2147_s26, %s1898_s29 }
  0x42   : > { %p1895_p10 = pnand %p1893_p8, %p1879_p0  ;;  %p1901_p7 = scmp.lt.s32.totalorder %s1899_s23, %s1892_s27 }
  0x44   : > { %p1896_p13 = pneg %p1895_p10  ;;  %p1902_p9 = por %p1901_p7, %p1900_p3 }
  0x46   : > { %p1903_p2 = pnand %p1902_p9, %p1896_p13 }
  0x48   : > { %1906 = shalt.err (!%p1903_p2)
}
  0x49   : > { %s2015_s30 = smov 64   ;;  %s2016_s25 = smov 4  }
  0x4a   : > { %1774 = dma.hbm_to_vmem [thread:$0]  (!%p2143_p11), %s2141_s4, 4608, %s2147_s26, %s2149_s5, %s2015_s30, %s2015_s30, %s2016_s25  }
  0x4b   : > { %p2533_p0 = scmp.ne.s32.totalorder %s2528_s20, 0 }
  0x4c   : > { %s2180_s6 = sand.u32 (!%p2533_p0), 1, %s2001_s13   ;;  %p2534_p5 = scmp.ne.s32.totalorder (!%p2533_p0), %s2526_s18, 0 }
  0x4d   : > { %177 = sbr.rel (%p2533_p0) target bundleno = 424 (0x1a8), region = 28  ;;  %s180_s8 = scalar_lea.sflag (!%p2533_p0), [#allocation3], %s2180_s6 }
  0x4e   : > { %s1756_s7 = smul.u32 (!%p2533_p0), 288, %s2180_s6 }
  0x50   : > { %s2184_s9 = scalar_lea.vmem (!%p2533_p0), [#allocation2], %s1756_s7 }
  0x54   : > { %1980 = dma.done.wait (%p2534_p5), %s180_s8, 4608  }
  0x55   : > { %1982 = vsyncadd (%p2534_p5), %s180_s8, 4294962688  ;;  %p2535_p11 = scmp.eq.s32.totalorder %s2062_s16, 0 }
  0x57   : > { %1984 = dma.done.wait (%p2535_p11), [#allocation6], 288   ;;  %p2536_p1 = pmov %p2535_p11 }
  0x58   : > { %vm348_vm0 = vcmask 1041408   ;;  %vm335_vm1 = vcmask 31744   ;;  %v319_v0 = vld [vmem:[#allocation5 + $0x2] sm:$0x3]  ;;  %v2194_v1 = vld [vmem:[#allocation5 + $0x8] sm:$0x3] }
  0x59   : > { %1986 = vsyncadd (%p2536_p1), [#allocation6], 4294967008  ;;  %v234_v2 = vld [vmem:[%s2184_s9 + $0x48] sm:$0xf]  ;;  %1744 = vmatprep.subr.msk.bf16.mxu1 %vm348_vm0, %v319_v0  ;;  %1748 = vmatprep.subr.msk.bf16.mxu0 %vm348_vm0, %v2194_v1  ;;  %v350_v3 = vsel %vm348_vm0, %v319_v0, 0  ;;  %v2203_v4 = vsel %vm348_vm0, %v2194_v1, 0 }
  0x5a   : > { %v2206_v5 = vld [vmem:[%s2184_s9 + $0x50] sm:$0xf]  ;;  %v2209_v6 = vld [vmem:[%s2184_s9 + $0x58] sm:$0xf]  ;;  %1589 = vmatpush3.bf16.msra.mxu1 %v350_v3  ;;  %1629 = vmatpush3.bf16.msra.mxu0 %v2203_v4  ;;  %v2213_v7 = vld [vmem:[%s2184_s9 + $0x60] sm:$0xf] }
  0x5b   : > { %v2216_v8 = vld [vmem:[%s2184_s9 + $0x68] sm:$0xf]  ;;  %v1456_v9 = vcombine.low %v234_v2, %v2206_v5  ;;  %v1457_v10 = vcombine.low %v2209_v6, %v2213_v7  ;;  %v1829_v11 = vld [vmem:[%s2184_s9 + $0xd8] ss:$8 sps:$4 sm:$0xff]   ;;  %v2229_v16 = vld [vmem:[%s2184_s9 + $0x70] sm:$0xf] }
  0x5c   : > { %v318_v12 = vld [vmem:[#allocation5] sm:$0x3]  ;;  %v1830_v13 = vld [vmem:[%s2184_s9 + $0xe8] ss:$8 sps:$4 sm:$0xff]   ;;  %1630 = vmatprep.mubr.msk.bf16.mxu0 %vm335_vm1, %v1829_v11  ;;  %v1458_v18 = vcombine.low %v2216_v8, %v2229_v16  ;;  %v2237_v19 = vld [vmem:[%s2184_s9 + $0x78] sm:$0xf] }
  0x5d   : > { %1590 = vmatprep.mubr.msk.bf16.mxu1 %vm335_vm1, %v1456_v9  ;;  %1745 = vmatprep.subr.msk.bf16.mxu1 %vm348_vm0, %v318_v12  ;;  %v323_v14 = vld [vmem:[#allocation5 + $0xa] sm:$0x3]  ;;  %v430_v15 = vsel %vm348_vm0, %v318_v12, 0  ;;  %v2240_v20 = vld [vmem:[%s2184_s9 + $0x80] sm:$0xf]  ;;  %vm513_vm2 = vcmask 1046528  }
  0x5e   : > { %1591 = vmatmul.mubr.msk.bf16.vlgmr.msra.gmra.mrb[0].mxu1 %vm335_vm1, %v1457_v10  ;;  %1631 = vmatmul.mubr.msk.bf16.vlgmr.msra.gmra.mrb[0].mxu0 %vm335_vm1, %v1830_v13  ;;  %v887_v17 = vsel %vm348_vm0, %v323_v14, 0  ;;  %v2243_v21 = vld [vmem:[%s2184_s9 + $0x90] sm:$0xf]  ;;  %v244_v22 = vld [vmem:[%s2184_s9 + $0x94] sm:$0x1]  ;;  %v1459_v30 = vcombine.low %v2237_v19, %v2240_v20  ;;  %s1450_s18 = sshll.u32 %s2180_s6, 5 }
  0x5f   : > { %1750 = vmatprep.subr.msk.bf16.mxu0 %vm348_vm0, %v323_v14  ;;  %1599 = vmatpush3.bf16.msra.mxu1 %v430_v15  ;;  %v2247_v23 = vld [vmem:[%s2184_s9 + $0x98] sm:$0xf]  ;;  %v246_v24 = vld [vmem:[%s2184_s9 + $0x9c] sm:$0x1]  ;;  %v294_v25 = vunpack.c.l.bf16 %v2243_v21  ;;  %v295_v26 = vunpack.c.l.bf16 %v244_v22  ;;  %v2254_v28 = vld [vmem:[%s2184_s9 + $0xa0] sm:$0xf] }
  0x60   : > { %1639 = vmatpush3.bf16.msra.mxu0 %v887_v17  ;;  %1594 = vmatprep.mubr.msk.bf16.mxu1 %vm335_vm1, %v1458_v18  ;;  %v296_v27 = vunpack.c.l.bf16 %v2247_v23  ;;  %v248_v29 = vld [vmem:[%s2184_s9 + $0xa4] sm:$0x1]  ;;  %v297_v31 = vunpack.c.l.bf16 %v246_v24  ;;  %v2260_v32 = vld [vmem:[%s2184_s9 + $0xa8] sm:$0xf]  ;;  %v250_v33 = vld [vmem:[%s2184_s9 + $0xac] sm:$0x1]  ;;  %v298_v34 = vunpack.c.l.bf16 %v2254_v28 }
  0x61   : > { %v299_v35 = vunpack.c.l.bf16 %v248_v29  ;;  %v324_v36 = vld [vmem:[#allocation5 + $0xc] sm:$0x3]  ;;  %v838_v37 = vrot.slane %v294_v25, 1  ;;  %v839_v38 = vrot.slane %v295_v26, 1  ;;  %v300_v40 = vunpack.c.l.bf16 %v2260_v32  ;;  %v216_v41 = vld [vmem:[%s2184_s9] sm:$0xf] }
  0x62   : > { %v841_v39 = vrot.slane %v296_v27, 1  ;;  %1751 = vmatprep.subr.msk.bf16.mxu0 %vm348_vm0, %v324_v36  ;;  %v842_v42 = vrot.slane %v297_v31, 1  ;;  %v301_v43 = vunpack.c.l.bf16 %v250_v33  ;;  %v844_v44 = vrot.slane %v298_v34, 1  ;;  %v2268_v46 = vld [vmem:[%s2184_s9 + $0x8] sm:$0xf]  ;;  %s2431_s20 = scalar_lea.vmem [#allocation7], %s1450_s18 }
  0x63   : > { %v845_v45 = vrot.slane %v299_v35, 1  ;;  %v840_v47 = vsel %vm513_vm2, %v838_v37, %v839_v38  ;;  %v847_v48 = vrot.slane %v300_v40, 1  ;;  %v267_v49 = vunpack.c.l.bf16 %v216_v41  ;;  %v2272_v50 = vld [vmem:[%s2184_s9 + $0x10] sm:$0xf]  ;;  %v2275_v51 = vld [vmem:[%s2184_s9 + $0x18] sm:$0xf] }
  0x64   : > { %v843_v52 = vsel %vm513_vm2, %v841_v39, %v842_v42  ;;  %v848_v54 = vrot.slane %v301_v43, 1  ;;  %v269_v55 = vunpack.c.l.bf16 %v2268_v46  ;;  %v320_v56 = vld [vmem:[#allocation5 + $0x4] sm:$0x3]  ;;  %v2282_v57 = vld [vmem:[%s2184_s9 + $0xb0] sm:$0xf]  ;;  %v979_v59 = vsel %vm348_vm0, %v324_v36, 0 }
  0x65   : > { %v846_v53 = vsel %vm513_vm2, %v844_v44, %v845_v45  ;;  %v870_v58 = vpack.c.bf16 %v843_v52, %v840_v47  ;;  %v1452_v60 = vcombine.low %v216_v41, %v2268_v46  ;;  %v271_v61 = vunpack.c.l.bf16 %v2272_v50  ;;  %1746 = vmatprep.subr.msk.bf16.mxu1 %vm348_vm0, %v320_v56  ;;  %v252_v62 = vld [vmem:[%s2184_s9 + $0xb4] sm:$0x1]  ;;  %v2290_v63 = vld [vmem:[%s2184_s9 + $0xb8] sm:$0xf]  ;;  %v254_v10 = vld [vmem:[%s2184_s9 + $0xbc] sm:$0x1] }
  0x66   : > { %1595 = vmatmul.mubr.msk.bf16.gmra.mrb[4].mxu1 %vm335_vm1, %v1459_v30  ;;  %v849_v0 = vsel %vm513_vm2, %v847_v48, %v848_v54  ;;  %v2293_v2 = vrot.slane %v267_v49, 1  ;;  %v2295_v3 = vrot.slane %v269_v55, 1  ;;  %v273_v9 = vunpack.c.l.bf16 %v2275_v51  ;;  %v2300_v11 = vld [vmem:[%s2184_s9 + $0xc0] sm:$0xf]  ;;  %v256_v17 = vld [vmem:[%s2184_s9 + $0xc4] sm:$0x1] }
  0x67   : > { %1640 = vmatprep.mubr.msk.bf16.mxu0 %vm335_vm1, %v870_v58  ;;  %v871_v12 = vpack.c.bf16 %v849_v0, %v846_v53  ;;  %1600 = vmatprep.mubr.msk.bf16.mxu1 %vm335_vm1, %v1452_v60  ;;  %v1453_v13 = vcombine.low %v2272_v50, %v2275_v51  ;;  %v2306_v14 = vrot.slane %v271_v61, 1  ;;  %v302_v15 = vunpack.c.l.bf16 %v2282_v57  ;;  %v2311_v18 = vld [vmem:[%s2184_s9 + $0xc8] sm:$0xf]  ;;  %v258_v27 = vld [vmem:[%s2184_s9 + $0xcc] sm:$0x1]  ;;  %s1315_s4 = sshll.u32 %s2431_s20, 4  ;;  %s2437_s4 = int_to_ptr.vmem [resolvable:$true] %s1315_s4 }
  0x68   : > { %v563_v22 = vsel %vm348_vm0, %v320_v56, 0  ;;  %v303_v24 = vunpack.c.l.bf16 %v252_v62  ;;  %v304_v25 = vunpack.c.l.bf16 %v2290_v63  ;;  %v305_v26 = vunpack.c.l.bf16 %v254_v10  ;;  %v2320_v34 = vld [vmem:[%s2184_s9 + $0x20] sm:$0xf]  ;;  %v2323_v39 = vld [vmem:[%s2184_s9 + $0x28] sm:$0xf]  ;;  %s1519_s22 = sshll.u32 %s2062_s16, 9 }
  0x69   : > { %v850_v29 = vrot.slane %v302_v15, 1  ;;  %v306_v30 = vunpack.c.l.bf16 %v2300_v11  ;;  %v307_v31 = vunpack.c.l.bf16 %v256_v17  ;;  %v308_v33 = vunpack.c.l.bf16 %v2311_v18  ;;  %v325_v44 = vld [vmem:[#allocation5 + $0xe] sm:$0x3]  ;;  %v2331_v52 = vld [vmem:[%s2184_s9 + $0x30] sm:$0xf]  ;;  %s2442_s10 = scalar_lea.hbm %s2521_s2, %s1519_s22  ;;  %s1297_s11 = scalar_lea.sflag [#allocation4], %s2180_s6 }
  0x6a   : > { %1641 = vmatmul.mubr.msk.bf16.vlgmr.msra.gmra.mrb[0].mxu0 %vm335_vm1, %v871_v12  ;;  %v851_v35 = vrot.slane %v303_v24, 1  ;;  %v853_v36 = vrot.slane %v304_v25, 1  ;;  %v854_v37 = vrot.slane %v305_v26, 1  ;;  %v309_v38 = vunpack.c.l.bf16 %v258_v27  ;;  %v2338_v56 = vld [vmem:[%s2184_s9 + $0x38] sm:$0xf]  ;;  %s1907_s27 = scalar_lea.vmem %s2437_s4, 512 }
  0x6b   : > { %1649 = vmatpush3.bf16.msra.mxu0 %v979_v59  ;;  %v856_v40 = vrot.slane %v306_v30, 1  ;;  %v857_v41 = vrot.slane %v307_v31, 1  ;;  %v859_v42 = vrot.slane %v308_v33, 1  ;;  %v275_v43 = vunpack.c.l.bf16 %v2320_v34  ;;  %v217_v58 = vld [vmem:[%s2184_s9 + $0x4] sm:$0x1]  ;;  %p1908_p4 = scmp.ne.s32.totalorder %s2437_s4, %s1907_s27  ;;  %s2017_s28 = smov [#allocation7]  }
  0x6c   : > { %v852_v45 = vsel %vm513_vm2, %v850_v29, %v851_v35  ;;  %v855_v47 = vsel %vm513_vm2, %v853_v36, %v854_v37  ;;  %v860_v48 = vrot.slane %v309_v38, 1  ;;  %v277_v49 = vunpack.c.l.bf16 %v2323_v39  ;;  %1752 = vmatprep.subr.msk.bf16.mxu0 %vm348_vm0, %v325_v44  ;;  %v219_v59 = vld [vmem:[%s2184_s9 + $0xc] sm:$0x1]  ;;  %v221_v61 = vld [vmem:[%s2184_s9 + $0x14] sm:$0x1]  ;;  %s1911_s29 = sshll.u32 %s2017_s28, 4  ;;  %s1912_s29 = int_to_ptr.vmem [resolvable:$false] %s1911_s29 }
  0x6d   : > { %v872_v53 = vpack.c.bf16 %v855_v47, %v852_v45  ;;  %v858_v54 = vsel %vm513_vm2, %v856_v40, %v857_v41  ;;  %v1454_v55 = vcombine.low %v2320_v34, %v2323_v39  ;;  %v223_v62 = vld [vmem:[%s2184_s9 + $0x1c] sm:$0x1]  ;;  %v321_v0 = vld [vmem:[#allocation5 + $0x6] sm:$0x3]  ;;  %v523_v10 = vrot.slane %v273_v9, 1  ;;  %p1909_p6 = pnand %p1908_p4, %p2132_p12  ;;  %s1913_s23 = scalar_lea.vmem %s1912_s29, 1024 }
  0x6e   : > { %1601 = vmatmul.mubr.msk.bf16.vlgmr.msra.gmra.mrb[0].mxu1 %vm335_vm1, %v1453_v13  ;;  %v861_v60 = vsel %vm513_vm2, %v859_v42, %v860_v48  ;;  %v526_v13 = vrot.slane %v275_v43, 1  ;;  %v1492_v15 = vcombine.low %v2268_v46, %v2272_v50  ;;  %v529_v17 = vrot.slane %v277_v49, 1  ;;  %v225_v9 = vld [vmem:[%s2184_s9 + $0x24] sm:$0x1]  ;;  %v227_v29 = vld [vmem:[%s2184_s9 + $0x2c] sm:$0x1]  ;;  %p1914_p10 = scmp.lt.s32.totalorder %s2437_s4, %s1912_s29  ;;  %p1915_p13 = scmp.lt.s32.totalorder %s1913_s23, %s1907_s27 }
  0x6f   : > { %1609 = vmatpush3.bf16.msra.mxu1 %v563_v22  ;;  %1644 = vmatprep.mubr.msk.bf16.mxu0 %vm335_vm1, %v872_v53  ;;  %v873_v12 = vpack.c.bf16 %v861_v60, %v858_v54  ;;  %v1455_v22 = vcombine.low %v2331_v52, %v2338_v56  ;;  %v268_v24 = vunpack.c.l.bf16 %v217_v58  ;;  %v270_v25 = vunpack.c.l.bf16 %v219_v59  ;;  %v229_v30 = vld [vmem:[%s2184_s9 + $0x34] sm:$0x1]  ;;  %v231_v33 = vld [vmem:[%s2184_s9 + $0x3c] sm:$0x1]  ;;  %v326_v59 = vld [vmem:[#allocation5 + $0x10] sm:$0x3]  ;;  %p1910_p8 = pneg %p1909_p6 }
  0x70   : > { %1604 = vmatprep.mubr.msk.bf16.mxu1 %vm335_vm1, %v1454_v55  ;;  %1747 = vmatprep.subr.msk.bf16.mxu1 %vm348_vm0, %v321_v0  ;;  %v272_v26 = vunpack.c.l.bf16 %v221_v61  ;;  %v274_v27 = vunpack.c.l.bf16 %v223_v62  ;;  %v1493_v31 = vcombine.low %v2275_v51, %v2320_v34  ;;  %v279_v35 = vunpack.c.l.bf16 %v2331_v52  ;;  %p1916_p3 = por %p1915_p13, %p1914_p10 }
  0x71   : > { %v515_v46 = vrot.slane %v268_v24, 1  ;;  %v518_v50 = vrot.slane %v270_v25, 1  ;;  %v276_v38 = vunpack.c.l.bf16 %v225_v9  ;;  %v281_v40 = vunpack.c.l.bf16 %v2338_v56 }
  0x72   : > { %1645 = vmatmul.mubr.msk.bf16.gmra.mrb[4].mxu0 %vm335_vm1, %v873_v12  ;;  %v521_v36 = vrot.slane %v272_v26, 1  ;;  %v524_v37 = vrot.slane %v274_v27, 1  ;;  %v278_v34 = vunpack.c.l.bf16 %v227_v29  ;;  %v1494_v48 = vcombine.low %v2323_v39, %v2331_v52  ;;  %p1917_p7 = pnand %p1916_p3, %p1910_p8 }
  0x73   : > { %1650 = vmatprep.mubr.msk.bf16.mxu0 %vm335_vm1, %v1492_v15  ;;  %v516_v41 = vsel %vm513_vm2, %v2293_v2, %v515_v46  ;;  %v519_v51 = vsel %vm513_vm2, %v2295_v3, %v518_v50  ;;  %v527_v47 = vrot.slane %v276_v38, 1  ;;  %v280_v53 = vunpack.c.l.bf16 %v229_v30 }
  0x74   : > { %v546_v42 = vpack.c.bf16 %v519_v51, %v516_v41  ;;  %v522_v43 = vsel %vm513_vm2, %v2306_v14, %v521_v36  ;;  %v2370_v45 = vsel %vm513_vm2, %v523_v10, %v524_v37  ;;  %v530_v49 = vrot.slane %v278_v34, 1 }
  0x75   : > { %v282_v54 = vunpack.c.l.bf16 %v231_v33  ;;  %v1071_v2 = vsel %vm348_vm0, %v325_v44, 0  ;;  %v528_v3 = vsel %vm513_vm2, %v526_v13, %v527_v47  ;;  %v532_v55 = vrot.slane %v279_v35, 1  ;;  %v232_v44 = vld [vmem:[%s2184_s9 + $0x40] sm:$0xf] }
  0x76   : > { %1605 = vmatmul.mubr.msk.bf16.gmra.mrb[4].mxu1 %vm335_vm1, %v1455_v22  ;;  %v547_v14 = vpack.c.bf16 %v2370_v45, %v522_v43  ;;  %v531_v58 = vsel %vm513_vm2, %v529_v17, %v530_v49  ;;  %v535_v60 = vrot.slane %v281_v40, 1  ;;  %v533_v52 = vrot.slane %v280_v53, 1 }
  0x77   : > { %1610 = vmatprep.mubr.msk.bf16.mxu1 %vm335_vm1, %v546_v42  ;;  %v548_v39 = vpack.c.bf16 %v531_v58, %v528_v3  ;;  %v536_v61 = vrot.slane %v282_v54, 1  ;;  %v655_v62 = vsel %vm348_vm0, %v321_v0, 0  ;;  %v1495_v10 = vcombine.low %v2338_v56, %v232_v44 }
  0x78   : > { %v534_v12 = vsel %vm513_vm2, %v532_v55, %v533_v52  ;;  %v1500_v15 = vcombine.low %v2206_v5, %v2209_v6  ;;  %v1472_v17 = vcombine.low %v2243_v21, %v2247_v23  ;;  %v1501_v56 = vcombine.low %v2213_v7, %v2216_v8  ;;  %v242_v7 = vld [vmem:[%s2184_s9 + $0x88] sm:$0xf] }
  0x79   : > { %v537_v13 = vsel %vm513_vm2, %v535_v60, %v536_v61  ;;  %v1502_v5 = vcombine.low %v2229_v16, %v2237_v19  ;;  %v1473_v6 = vcombine.low %v2254_v28, %v2260_v32  ;;  %v1474_v21 = vcombine.low %v2282_v57, %v2290_v63  ;;  %v233_v19 = vld [vmem:[%s2184_s9 + $0x44] sm:$0x1]  ;;  %v1847_v28 = vld [vmem:[%s2184_s9 + $0xf8] ss:$8 sps:$4 sm:$0xff]  }
  0x7a   : > { %1651 = vmatmul.mubr.msk.bf16.vlgmr.msra.gmra.mrb[0].mxu0 %vm335_vm1, %v1493_v31  ;;  %v549_v0 = vpack.c.bf16 %v537_v13, %v534_v12  ;;  %v1503_v8 = vcombine.low %v2240_v20, %v242_v7  ;;  %v1152_v16 = vpack.c.bf16 %v522_v43, %v519_v51  ;;  %v1475_v23 = vcombine.low %v2300_v11, %v2311_v18  ;;  %v1848_v18 = vld [vmem:[%s2184_s9 + $0x108] ss:$8 sps:$4 sm:$0xff]  }
  0x7b   : > { %1659 = vmatpush3.bf16.msra.mxu0 %v1071_v2  ;;  %1654 = vmatprep.mubr.msk.bf16.mxu0 %vm335_vm1, %v1494_v48  ;;  %v283_v32 = vunpack.c.l.bf16 %v232_v44  ;;  %v284_v57 = vunpack.c.l.bf16 %v233_v19  ;;  %v1154_v63 = vpack.c.bf16 %v534_v12, %v531_v58 }
  0x7c   : > { %1753 = vmatprep.subr.msk.bf16.mxu0 %vm348_vm0, %v326_v59 }
  0x7d   : > { %v1148_v20 = vrot.slane %v283_v32, 1  ;;  %v1149_v22 = vrot.slane %v284_v57, 1 }
  0x7e   : > { %1611 = vmatmul.mubr.msk.bf16.vlgmr.msra.gmra.mrb[0].mxu1 %vm335_vm1, %v547_v14 }
  0x7f   : > { %1619 = vmatpush3.bf16.msra.mxu1 %v655_v62  ;;  %1614 = vmatprep.mubr.msk.bf16.mxu1 %vm335_vm1, %v548_v39  ;;  %v1150_v11 = vsel %vm513_vm2, %v1148_v20, %v1149_v22 }
  0x80   : > { %1749 = vmatprep.subr.msk.bf16.mxu1 %vm348_vm0, %v2194_v1  ;;  %v1169_v1 = vsel %vm348_vm0, %v326_v59, 0  ;;  %v1155_v24 = vpack.c.bf16 %v1150_v11, %v537_v13 }
  0x82   : > { %1655 = vmatmul.mubr.msk.bf16.gmra.mrb[4].mxu0 %vm335_vm1, %v1495_v10 }
  0x83   : > { %1660 = vmatprep.mubr.msk.bf16.mxu0 %vm335_vm1, %v1500_v15 }
  0x86   : > { %1615 = vmatmul.mubr.msk.bf16.gmra.mrb[4].mxu1 %vm335_vm1, %v549_v0 }
  0x87   : > { %1620 = vmatprep.mubr.msk.bf16.mxu1 %vm335_vm1, %v1472_v17 }
  0x8a   : > { %1661 = vmatmul.mubr.msk.bf16.vlgmr.msra.gmra.mrb[0].mxu0 %vm335_vm1, %v1501_v56 }
  0x8b   : > { %1669 = vmatpush3.bf16.msra.mxu0 %v1169_v1  ;;  %1664 = vmatprep.mubr.msk.bf16.mxu0 %vm335_vm1, %v1502_v5 }
  0x8e   : > { %1621 = vmatmul.mubr.msk.bf16.vlgmr.msra.gmra.mrb[0].mxu1 %vm335_vm1, %v1473_v6 }
  0x8f   : > { %1679 = vmatpush3.bf16.msra.mxu1 %v2203_v4  ;;  %1624 = vmatprep.mubr.msk.bf16.mxu1 %vm335_vm1, %v1474_v21  ;;  %v1153_v4 = vpack.c.bf16 %v528_v3, %v2370_v45 }
  0x92   : > { %1665 = vmatmul.mubr.msk.bf16.gmra.mrb[4].mxu0 %vm335_vm1, %v1503_v8 }
  0x93   : > { %1670 = vmatprep.mubr.msk.bf16.mxu0 %vm335_vm1, %v1152_v16 }
  0x96   : > { %1625 = vmatmul.mubr.msk.bf16.gmra.mrb[4].mxu1 %vm335_vm1, %v1475_v23 }
  0x97   : > { %1634 = vmatprep.mubr.msk.bf16.mxu1 %vm335_vm1, %v1847_v28 }
  0x9a   : > { %1671 = vmatmul.mubr.msk.bf16.vlgmr.msra.gmra.mrb[0].mxu0 %vm335_vm1, %v1153_v4 }
  0x9b   : > { %1674 = vmatprep.mubr.msk.bf16.mxu0 %vm335_vm1, %v1154_v63 }
  0xa2   : > { %1635 = vmatmul.mubr.msk.bf16.vlgmr.msra.gmra.mrb[4].mxu1 %vm335_vm1, %v1848_v18  ;;  %1675 = vmatmul.mubr.msk.bf16.gmra.mrb[4].mxu0 %vm335_vm1, %v1155_v24 }
 0x161   : > { %v1622_v25 = vpop.f32.mrb[0].mxu1 }
 0x162   : > { %v691_v9 = vpop.f32.mrb[1].mxu1 }
 0x163   : > { %v1623_v26 = vpop.f32.mrb[2].mxu1 }
 0x164   : > { %v694_v27 = vpop.f32.mrb[3].mxu1 }
 0x16d   : > { %v1672_v29 = vpop.f32.mrb[0].mxu0 }
 0x16e   : > { %v1680_v30 = vadd.f32 %v1672_v29, %v1622_v25  ;;  %v1205_v31 = vpop.f32.mrb[1].mxu0 }
 0x16f   : > { %v1681_v46 = vadd.f32 %v1205_v31, %v691_v9  ;;  %v1673_v50 = vpop.f32.mrb[2].mxu0 }
 0x170   : > { %v1682_v33 = vadd.f32 %v1673_v50, %v1623_v26  ;;  %v1208_v35 = vpop.f32.mrb[3].mxu0  ;;  %v1276_v42 = vmul.f32 %v1680_v30, %v1680_v30 }
 0x171   : > { %v1683_v36 = vadd.f32 %v1208_v35, %v694_v27  ;;  %v1274_v38 = vmul.f32 %v1681_v46, %v1681_v46 }
 0x172   : > { %v1528_v37 = vpack.c.bf16 %v1682_v33, %v1680_v30  ;;  %v1277_v2 = vmul.f32 %v1682_v33, %v1682_v33 }
 0x173   : > { %v1523_v40 = vpack.c.bf16 %v1683_v36, %v1681_v46  ;;  %v1260_v41 = vadd.f32 %v1683_v36, %v1681_v46  ;;  %v1275_v51 = vmul.f32 %v1683_v36, %v1683_v36 }
 0x174   : > { %1540 = vst [vmem:[%s2431_s20 + $0x8] sm:$0xff] %v1528_v37  }
 0x175   : > { %v1636_v34 = vpop.f32.mrb[4].mxu1  ;;  %1524 = vst [vmem:[%s2431_s20] sm:$0xff] %v1523_v40   ;;  %v1261_v43 = vadd.f32 %v1680_v30, %v1260_v41  ;;  %v1282_v45 = vadd.f32 %v1275_v51, %v1274_v38  ;;  %v1676_v47 = vpop.f32.mrb[4].mxu0 }
 0x176   : > { %v799_v48 = vpop.f32.mrb[5].mxu1  ;;  %v1684_v49 = vadd.f32 %v1676_v47, %v1636_v34  ;;  %v1221_v53 = vpop.f32.mrb[5].mxu0 }
 0x177   : > { %v1637_v54 = vpop.f32.mrb[6].mxu1  ;;  %v1283_v3 = vadd.f32 %v1282_v45, %v1276_v42  ;;  %v1685_v55 = vadd.f32 %v1221_v53, %v799_v48  ;;  %v1262_v14 = vadd.f32 %v1682_v33, %v1261_v43  ;;  %v1677_v58 = vpop.f32.mrb[6].mxu0 }
 0x178   : > { %v802_v59 = vpop.f32.mrb[7].mxu1  ;;  %v1686_v60 = vadd.f32 %v1677_v58, %v1637_v54  ;;  %v1224_v39 = vpop.f32.mrb[7].mxu0  ;;  %v1280_v17 = vmul.f32 %v1684_v49, %v1684_v49 }
 0x179   : > { %v1263_v52 = vadd.f32 %v1685_v55, %v1262_v14  ;;  %v1278_v61 = vmul.f32 %v1685_v55, %v1685_v55  ;;  %v1284_v62 = vadd.f32 %v1283_v3, %v1277_v2  ;;  %v1687_v44 = vadd.f32 %v1224_v39, %v802_v59 }
 0x17a   : > { %v1538_v10 = vpack.c.bf16 %v1686_v60, %v1684_v49 }
 0x17b   : > { %v1285_v12 = vadd.f32 %v1284_v62, %v1278_v61  ;;  %v1533_v13 = vpack.c.bf16 %v1687_v44, %v1685_v55  ;;  %v1264_v15 = vadd.f32 %v1687_v44, %v1263_v52  ;;  %v1279_v0 = vmul.f32 %v1687_v44, %v1687_v44 }
 0x17c   : > { %1542 = vst [vmem:[%s2431_s20 + $0x18] sm:$0xff] %v1538_v10  }
 0x17d   : > { %1541 = vst [vmem:[%s2431_s20 + $0x10] sm:$0xff] %v1533_v13   ;;  %v1265_v56 = vadd.f32 %v1684_v49, %v1264_v15  ;;  %v1286_v5 = vadd.f32 %v1285_v12, %v1279_v0 }
 0x17e   : > { %1920 = shalt.err (!%p1917_p7)
}
 0x17f   : > { %s1921_s30 = scalar_lea.hbm %s2442_s10, 512  ;;  %s1925_s8 = scalar_lea.hbm %s2521_s2, 1024 }
 0x180   : > { %p1922_p9 = scmp.ne.s32.totalorder %s2442_s10, %s1921_s30  ;;  %p1926_p5 = scmp.lt.u32.totalorder %s2442_s10, %s2521_s2 }
 0x181   : > { %p1927_p11 = scmp.lt.u32.totalorder %s1925_s8, %s1921_s30  ;;  %p1929_p4 = scmp.lt.u32.totalorder %s1921_s30, %s2442_s10 }
 0x182   : > { %p1923_p2 = pnand %p1922_p9, %p2132_p12 }
 0x183   : > { %p1928_p1 = por %p1927_p11, %p1926_p5 }
 0x184   : > { %p1924_p0 = pneg %p1923_p2 }
 0x185   : > { %p1930_p6 = por %p1929_p4, %p1928_p1 }
 0x187   : > { %p1931_p8 = pnand %p1930_p6, %p1924_p0 }
 0x189   : > { %1934 = shalt.err (!%p1931_p8)
}
 0x18a   : > { %s2018_s20 = smov 64   ;;  %s2019_s22 = smov 4   ;;  %v1281_v1 = vmul.f32 %v1686_v60, %v1686_v60  ;;  %v1266_v6 = vadd.f32 %v1686_v60, %v1265_v56  ;;  %v1287_v21 = vadd.f32 %v1286_v5, %v1280_v17 }
 0x18b   : > { %1763 = dma.vmem_to_hbm [thread:$0]  (%p2132_p12), %s2437_s4, 512, %s2442_s10, %s1297_s11, %s2018_s20, %s2018_s20, %s2019_s22  }
 0x18c   : > { %v1267_v7 = vrot.slane %v1266_v6, 4  ;;  %v1288_v8 = vadd.f32 %v1287_v21, %v1281_v1  ;;  %s1451_s26 = sshll.u32 %s2180_s6, 1  ;;  %s1516_s5 = sshll.u32 %s2062_s16, 5 }
 0x18d   : > { %s214_s27 = scalar_lea.vmem [#allocation8], %s1451_s26  ;;  %s2475_s11 = scalar_lea.hbm %s2522_s3, %s1516_s5 }
 0x18e   : > { %v1268_v16 = vadd.f32 %v1267_v7, %v1266_v6  ;;  %v1289_v19 = vrot.slane %v1288_v8, 4  ;;  %s1331_s28 = sshll.u32 %s214_s27, 4  ;;  %s1302_s29 = scalar_lea.sflag [#allocation9], %s2180_s6  ;;  %s2477_s28 = int_to_ptr.vmem [resolvable:$true] %s1331_s28 }
 0x18f   : > { %s1935_s23 = scalar_lea.vmem %s2477_s28, 32  ;;  %s2020_s16 = smov [#allocation8]  }
 0x190   : > { %v1269_v23 = vrot.slane %v1268_v16, 2  ;;  %v1290_v28 = vadd.f32 %v1289_v19, %v1288_v8  ;;  %p1936_p10 = scmp.ne.s32.totalorder %s2477_s28, %s1935_s23  ;;  %s1939_s30 = sshll.u32 %s2020_s16, 4  ;;  %s1940_s30 = int_to_ptr.vmem [resolvable:$false] %s1939_s30 }
 0x191   : > { %s1941_s25 = scalar_lea.vmem %s1940_s30, 64  ;;  %p1942_p7 = scmp.lt.s32.totalorder %s2477_s28, %s1940_s30 }
 0x192   : > { %v1270_v32 = vadd.f32 %v1269_v23, %v1268_v16  ;;  %v1291_v57 = vrot.slane %v1290_v28, 2  ;;  %p1937_p13 = pnand %p1936_p10, %p2132_p12  ;;  %p1943_p9 = scmp.lt.s32.totalorder %s1941_s25, %s1935_s23 }
 0x194   : > { %v1271_v4 = vrot.slane %v1270_v32, 1  ;;  %v1292_v20 = vadd.f32 %v1291_v57, %v1290_v28  ;;  %p1938_p3 = pneg %p1937_p13  ;;  %p1944_p2 = por %p1943_p9, %p1942_p7 }
 0x196   : > { %v1272_v63 = vadd.f32 %v1271_v4, %v1270_v32  ;;  %v1293_v22 = vrot.slane %v1292_v20, 1  ;;  %p1945_p0 = pnand %p1944_p2, %p1938_p3 }
 0x198   : > { %1273 = vst [vmem:[%s214_s27] sm:$0x1] %v1272_v63  ;;  %v1294_v11 = vadd.f32 %v1293_v22, %v1292_v20 }
 0x19a   : > { %1295 = vst [vmem:[%s214_s27 + $0x1] sm:$0x1] %v1294_v11 }
 0x19b   : > { %1948 = shalt.err (!%p1945_p0)
}
 0x19c   : > { %s1949_s6 = scalar_lea.hbm %s2475_s11, 32  ;;  %s1953_s9 = scalar_lea.hbm %s2522_s3, 64 }
 0x19d   : > { %p1950_p5 = scmp.ne.s32.totalorder %s2475_s11, %s1949_s6  ;;  %p1954_p4 = scmp.lt.u32.totalorder %s2475_s11, %s2522_s3 }
 0x19e   : > { %p1955_p6 = scmp.lt.u32.totalorder %s1953_s9, %s1949_s6  ;;  %p1957_p10 = scmp.lt.u32.totalorder %s1949_s6, %s2475_s11 }
 0x19f   : > { %p1951_p11 = pnand %p1950_p5, %p2132_p12 }
 0x1a0   : > { %p1956_p8 = por %p1955_p6, %p1954_p4 }
 0x1a1   : > { %p1952_p1 = pneg %p1951_p11 }
 0x1a2   : > { %p1958_p13 = por %p1957_p10, %p1956_p8 }
 0x1a4   : > { %p1959_p3 = pnand %p1958_p13, %p1952_p1 }
 0x1a6   : > { %1962 = shalt.err (!%p1959_p3)
}
 0x1a7   : > { %1764 = dma.vmem_to_hbm [thread:$0]  (%p2132_p12), %s2477_s28, 32, %s2475_s11, %s1302_s29  }
 0x1a8 PF: > { %s1343_s22 = sand.u32 1, %s1997_s12   ;;  %p2537_p7 = scmp.ne.s32.totalorder %s2527_s19, 0 }
 0x1a9   : > { %p2538_p9 = scmp.ge.s32.totalorder %s2009_s15, 2  ;;  %s1344_s26 = scalar_lea.sflag [#allocation4], %s1343_s22 }
 0x1ab   : > { %p1776_p2 = pnand %p2538_p9, %p2537_p7 }
 0x1ad   : > { %1988 = dma.done.wait (!%p1776_p2), %s1344_s26, 512  }
 0x1ae   : > { %1990 = vsyncadd (!%p1776_p2), %s1344_s26, 4294966784  ;;  %s1353_s5 = scalar_lea.sflag [#allocation9], %s1343_s22 }
 0x1af   : > { %1992 = dma.done.wait (!%p1776_p2), %s1353_s5, 32  }
 0x1b0   : > { %1994 = vsyncadd (!%p1776_p2), %s1353_s5, 4294967264  ;;  %p21_p12 = scmp.ge.s32.totalorder %s2097_s24, 4   ;;  %s2539_s12 = smov %s2001_s13 }
 0x1b1   : > { %s2540_s13 = smov %s2005_s14  ;;  %s2541_s14 = smov %s2128_s17 }
 0x1b2   : > { %s2542_s15 = smov %s2097_s24  ;;  %23 = sbr.rel (!%p21_p12) target bundleno = 8 (0x8), region = 94 }
 0x1b9   :  { %1358 = vsyncpa [#allocation3], 1 }
 0x1ba   :  { %1360 = vsyncpa [#allocation3 + $0x1], 1 }
 0x1bb   :  { %1361 = vsyncpa [#allocation6], 1 }
 0x1bc   :  { %1362 = vsyncpa [#allocation4], 1 }
 0x1bd   :  { %1364 = vsyncpa [#allocation4 + $0x1], 1 }
 0x1be   :  { %1365 = vsyncpa [#allocation9], 1 }
 0x1bf   :  { %1367 = vsyncpa [#allocation9 + $0x1], 1 }

// kernel: cifar_residual_block.4
= control target key start
LH: loop header
LB: loop body
LE: loop exit
PB: predicated region body
PF: predicated region fallthrough
CT: control target
= control target key end

     0   :  { %s3353_s0 = inlined_call_operand.hbm [shape: bf16[2,8,8,128], index: 0, kind: input, shape index: {}]   ;;  %s3354_s1 = inlined_call_operand.hbm [shape: f32[2,128], index: 1, kind: input, shape index: {}]   ;;  %s3355_s2 = inlined_call_operand.hbm [shape: bf16[9,128,128], index: 2, kind: input, shape index: {}]   ;;  %s3356_s3 = inlined_call_operand.hbm [shape: bf16[2,8,8,128], index: 3, kind: output, shape index: {0}]   ;;  %s3357_s4 = inlined_call_operand.hbm [shape: f32[2,2,128], index: 4, kind: output, shape index: {1}]  }
   0x1   :  { %3363 = sst [smem:[#allocation16_spill]] %s3354_s1 }
   0x2   :  { %10 = vsyncpa [#allocation4], 0 }
   0x3   :  { %12 = vsyncpa [#allocation4 + $0x1], 0 }
   0x4   :  { %13 = vsyncpa [#allocation7], 0 }
   0x5   :  { %14 = vsyncpa [#allocation5], 0 }
   0x6   :  { %16 = vsyncpa [#allocation5 + $0x1], 0 }
   0x7   :  { %17 = vsyncpa [#allocation11], 0 }
   0x8   :  { %19 = vsyncpa [#allocation11 + $0x1], 0  ;;  %s2825_s15 = smov 0   ;;  %s2827_s16 = smov 0  }
   0x9   :  { %s2829_s17 = smov 0   ;;  %s2831_s18 = smov 0  }
   0xa LB: > { %s2846_s19 = sadd.s32 4294967295, %s2788_s18   ;;  %s1908_s20 = sadd.s32 4294967294, %s2788_s18   ;;  %s2788_s18 = sphi %s2831_s18, %s3384_s18   ;;  %s2784_s17 = sphi %s2829_s17, %s3383_s17   ;;  %s2780_s16 = sphi %s2827_s16, %s3382_s16   ;;  %s2776_s15 = sphi %s2825_s15, %s3381_s15  }
   0xb   : > { %s2850_s21 = sadd.s32 1, %s2788_s18   ;;  %s32_s22 = sadd.s32 1, %s2784_s17 }
   0xc   : > { %s29_s23 = ssub.s32 %s2788_s18, %s2850_s21  ;;  %p39_p0 = scmp.ne.s32.totalorder %s2784_s17, %s2780_s16 }
   0xd   : > { %p30_p1 = scmp.eq.s32.totalorder %s29_s23, 0  ;;  %p40_p2 = scmp.eq.s32.totalorder %s2788_s18, 0 }
   0xe   : > { %p45_p3 = scmp.ne.s32.totalorder %s2780_s16, %s2776_s15  ;;  %p3358_p4 = scmp.eq.s32.totalorder %s2846_s19, 0 }
   0xf   : > { %s2862_s24 = scalar_select %p30_p1, %s2784_s17, %s32_s22  }
  0x10   : > { %p2864_p5 = por %p40_p2, %p39_p0  ;;  %p2870_p6 = por %p3358_p4, %p45_p3 }
  0x11   : > { %p111_p7 = scmp.eq.s32.totalorder %s2846_s19, 1  ;;  %p117_p8 = scmp.eq.s32.totalorder %s1908_s20, 1 }
  0x12   : > { %s3365_s26 = scalar_select %p2870_p6, 1, 0 }
  0x13   : > { %p1909_p9 = scmp.ge.s32.totalorder %s2788_s18, 1  ;;  %p150_p10 = scmp.lt.s32.totalorder %s2788_s18, 3 }
  0x14   : > { %p2877_p11 = por %p111_p7, %p39_p0  ;;  %p2881_p12 = por %p117_p8, %p45_p3 }
  0x15   : > { %p2885_p13 = pnand %p1909_p9, %p150_p10  ;;  %s2790_s30 = smov [#allocation6]  }
  0x16   : > { %s3366_s27 = scalar_select %p2877_p11, 1, 0 }
  0x17   : > { %s3367_s28 = scalar_select %p2881_p12, 1, 0 }
  0x18   : > { %s3368_s29 = scalar_select %p2885_p13, 1, 0 }
  0x19   : > { %p2465_p2 = pneg %p2885_p13  ;;  %s163_s5 = sshll.u32 %s2790_s30, 4  ;;  %s164_s5 = int_to_ptr.vmem [resolvable:$true] %s163_s5 }
  0x1a   : > { %p2485_p4 = scmp.lt.s32.totalorder %s2788_s18, 2  ;;  %p3369_p0 = scmp.eq.s32.totalorder %s2846_s19, 0 }
  0x1b   : > { %s2791_s8 = smov [#allocation8]   ;;  %s3372_s1 = sld [smem:[#allocation16_spill]] }
  0x1c   : > { %p2895_p7 = pnand %p2465_p2, %p3369_p0  ;;  %p2901_p3 = pnand %p2485_p4, %p2864_p5 }
  0x1d   : > { %s173_s9 = sshll.u32 %s2791_s8, 4  ;;  %s2905_s9 = int_to_ptr.vmem [resolvable:$true] %s173_s9 }
  0x1e   : > { %s3371_s7 = scalar_select %p2901_p3, 1, 0 }
  0x1f   : > { %p2602_p9 = pneg %p2895_p7 }
  0x21   : > { %s2600_s12 = scalar_lea.hbm %s3372_s1, 32 }
  0x22   : > { %p2601_p8 = scmp.ne.s32.totalorder %s3372_s1, %s2600_s12  ;;  %p2607_p10 = scmp.lt.u32.totalorder %s2600_s12, %s3372_s1 }
  0x24   : > { %p2603_p4 = pnand %p2602_p9, %p2601_p8 }
  0x26   : > { %p2604_p5 = pneg %p2603_p4 }
  0x28   : > { %p2609_p2 = pnand %p2607_p10, %p2604_p5 }
  0x2a   : > { %2612 = shalt.err (!%p2609_p2)
}
  0x2b   : > { %s2613_s23 = scalar_lea.vmem %s164_s5, 32  ;;  %p2621_p11 = scmp.lt.s32.totalorder %s164_s5, %s164_s5 }
  0x2c   : > { %p2614_p0 = scmp.ne.s32.totalorder %s164_s5, %s2613_s23  ;;  %p2622_p6 = scmp.lt.s32.totalorder %s2613_s23, %s2613_s23 }
  0x2e   : > { %p2616_p1 = pnand %p2614_p0, %p2602_p9  ;;  %p2623_p13 = por %p2622_p6, %p2621_p11 }
  0x30   : > { %p2617_p12 = pneg %p2616_p1 }
  0x32   : > { %p2624_p3 = pnand %p2623_p13, %p2617_p12 }
  0x34   : > { %2627 = shalt.err (!%p2624_p3)
}
  0x35   : > { %2468 = dma.hbm_to_vmem [thread:$0]  (!%p2895_p7), %s3372_s1, 32, %s164_s5, [#allocation7]  }
  0x36   : > { %s187_s8 = sand.u32 1, %s2784_s17   ;;  %s2628_s12 = scalar_lea.hbm %s3355_s2, 9216 }
  0x37   : > { %p2629_p1 = scmp.ne.s32.totalorder %s3355_s2, %s2628_s12  ;;  %p2635_p12 = scmp.lt.u32.totalorder %s2628_s12, %s3355_s2 }
  0x39   : > { %p2631_p6 = pnand %p2629_p1, %p2602_p9 }
  0x3b   : > { %p2632_p11 = pneg %p2631_p6 }
  0x3d   : > { %p2637_p13 = pnand %p2635_p12, %p2632_p11 }
  0x3f   : > { %2640 = shalt.err (!%p2637_p13)
}
  0x40   : > { %s2641_s5 = scalar_lea.vmem %s2905_s9, 9216  ;;  %p2649_p5 = scmp.lt.s32.totalorder %s2905_s9, %s2905_s9 }
  0x41   : > { %p2642_p3 = scmp.ne.s32.totalorder %s2905_s9, %s2641_s5  ;;  %p2650_p10 = scmp.lt.s32.totalorder %s2641_s5, %s2641_s5 }
  0x43   : > { %p2644_p8 = pnand %p2642_p3, %p2602_p9  ;;  %p2651_p2 = por %p2650_p10, %p2649_p5 }
  0x45   : > { %p2645_p4 = pneg %p2644_p8 }
  0x47   : > { %p2652_p0 = pnand %p2651_p2, %p2645_p4 }
  0x49   : > { %2655 = shalt.err (!%p2652_p0)
}
  0x4a   : > { %s2792_s23 = smov 64   ;;  %s2793_s25 = smov 4  }
  0x4b   : > { %2471 = dma.hbm_to_vmem [thread:$0]  (!%p2895_p7), %s3355_s2, 9216, %s2905_s9, [#allocation7], %s2792_s23, %s2792_s23, %s2793_s25  }
  0x4c   : > { %s1913_s11 = sshll.u32 %s187_s8, 5  ;;  %s2003_s12 = sshll.u32 %s2788_s18, 9 }
  0x4d   : > { %s2962_s20 = scalar_lea.hbm %s3353_s0, %s2003_s12  ;;  %s191_s22 = scalar_lea.vmem [#allocation3], %s1913_s11 }
  0x4e   : > { %s198_s6 = sshll.u32 %s191_s22, 4  ;;  %s2966_s5 = scalar_lea.sflag [#allocation4], %s187_s8  ;;  %s2964_s6 = int_to_ptr.vmem [resolvable:$true] %s198_s6 }
  0x4f   : > { %s2656_s1 = scalar_lea.hbm %s2962_s20, 512  ;;  %p3373_p7 = scmp.ne.s32.totalorder %s3371_s7, 0 }
  0x50   : > { %p2657_p9 = scmp.ne.s32.totalorder %s2962_s20, %s2656_s1  ;;  %s2661_s10 = scalar_lea.hbm %s3353_s0, 1024 }
  0x51   : > { %p2658_p1 = pneg %p3373_p7  ;;  %p2662_p12 = scmp.lt.u32.totalorder %s2962_s20, %s3353_s0 }
  0x52   : > { %p2663_p13 = scmp.lt.u32.totalorder %s2661_s10, %s2656_s1  ;;  %p2665_p8 = scmp.lt.u32.totalorder %s2656_s1, %s2962_s20 }
  0x53   : > { %p2659_p6 = pnand %p2658_p1, %p2657_p9 }
  0x54   : > { %p2664_p3 = por %p2663_p13, %p2662_p12 }
  0x55   : > { %p2660_p11 = pneg %p2659_p6 }
  0x56   : > { %p2666_p4 = por %p2665_p8, %p2664_p3 }
  0x58   : > { %p2667_p5 = pnand %p2666_p4, %p2660_p11 }
  0x5a   : > { %2670 = shalt.err (!%p2667_p5)
}
  0x5b   : > { %s2671_s8 = scalar_lea.vmem %s2964_s6, 512  ;;  %s2794_s11 = smov [#allocation3]  }
  0x5c   : > { %p2672_p10 = scmp.ne.s32.totalorder %s2964_s6, %s2671_s8  ;;  %s2676_s14 = sshll.u32 %s2794_s11, 4  ;;  %s2677_s14 = int_to_ptr.vmem [resolvable:$false] %s2676_s14 }
  0x5d   : > { %s2678_s22 = scalar_lea.vmem %s2677_s14, 1024  ;;  %p2679_p9 = scmp.lt.s32.totalorder %s2964_s6, %s2677_s14 }
  0x5e   : > { %p2674_p2 = pnand %p2672_p10, %p2658_p1  ;;  %p2680_p6 = scmp.lt.s32.totalorder %s2678_s22, %s2671_s8 }
  0x60   : > { %p2675_p0 = pneg %p2674_p2  ;;  %p2681_p12 = por %p2680_p6, %p2679_p9 }
  0x62   : > { %p2682_p13 = pnand %p2681_p12, %p2675_p0 }
  0x64   : > { %2685 = shalt.err (!%p2682_p13)
}
  0x65   : > { %2475 = dma.hbm_to_vmem [thread:$0]  (!%p3373_p7), %s2962_s20, 512, %s2964_s6, %s2966_s5, %s2792_s23, %s2792_s23, %s2793_s25  }
  0x66   : > { %p3374_p1 = scmp.ne.s32.totalorder %s3368_s29, 0 }
  0x67   : > { %s3000_s1 = sand.u32 (!%p3374_p1), 1, %s2780_s16   ;;  %p3375_p11 = scmp.ne.s32.totalorder (!%p3374_p1), %s3365_s26, 0 }
  0x68   : > { %210 = sbr.rel (%p3374_p1) target bundleno = 547 (0x223), region = 32  ;;  %s1917_s9 = sshll.u32 (!%p3374_p1), %s3000_s1, 5 }
  0x69   : > { %s213_s30 = scalar_lea.sflag (!%p3374_p1), [#allocation4], %s3000_s1  ;;  %s3006_s7 = scalar_lea.vmem (!%p3374_p1), [#allocation3], %s1917_s9 }
  0x6f   : > { %2759 = dma.done.wait (%p3375_p11), %s213_s30, 512  }
  0x70   : > { %2761 = vsyncadd (%p3375_p11), %s213_s30, 4294966784  ;;  %p3376_p7 = scmp.eq.s32.totalorder %s2846_s19, 0 }
  0x72   : > { %2763 = dma.done.wait (%p3376_p7), [#allocation7], 9248   ;;  %p3377_p3 = pmov %p3376_p7 }
  0x73   : > { %v2795_v0 = vmov 0.0   ;;  %v2528_v1 = vld [vmem:[#allocation8 + $0x40] sm:$0xff]   ;;  %v2530_v3 = vld [vmem:[#allocation8 + $0x48] sm:$0xff]   ;;  %v2532_v5 = vld [vmem:[#allocation8 + $0x50] sm:$0xff]   ;;  %vm518_vm0 = vcmask 1046528   ;;  %vm781_vm1 = vcmask 1045504  }
  0x74   : > { %2765 = vsyncadd (%p3377_p3), [#allocation7], 4294958048  ;;  %306 = vst [vmem:[#allocation2 + $0x8] sm:$0x3] %v2795_v0  ;;  %v2529_v2 = vld [vmem:[#allocation8 + $0x100] sm:$0xff]   ;;  %2155 = vmatprep.subr.bf16.mxu1 %v2528_v1  ;;  %v2531_v4 = vld [vmem:[#allocation8 + $0x108] sm:$0xff]  }
  0x75   : > { %307 = vst [vmem:[#allocation2 + $0x10] sm:$0xff] %v2795_v0  ;;  %308 = vst [vmem:[#allocation2 + $0x18] sm:$0x3] %v2795_v0  ;;  %2251 = vmatprep.subr.bf16.mxu0 %v2529_v2  ;;  %2156 = vmatpush3.bf16.msra.mxu1 %v2528_v1  ;;  %v2533_v6 = vld [vmem:[#allocation8 + $0x110] sm:$0xff]   ;;  %v2534_v7 = vld [vmem:[#allocation8 + $0x58] sm:$0xff]   ;;  %v3051_v39 = vrot.slane %v2795_v0, 1 }
  0x76   : > { %309 = vst [vmem:[#allocation2 + $0x20] sm:$0xff] %v2795_v0  ;;  %310 = vst [vmem:[#allocation2 + $0x28] sm:$0x3] %v2795_v0  ;;  %2252 = vmatpush3.bf16.msra.mxu0 %v2529_v2  ;;  %2157 = vmatprep.subr.bf16.mxu1 %v2530_v3  ;;  %v2535_v8 = vld [vmem:[#allocation8 + $0x118] sm:$0xff]   ;;  %v2536_v9 = vld [vmem:[#allocation8 + $0x60] sm:$0xff]   ;;  %s246_s26 = scalar_lea.vmem [#allocation9], %s1917_s9 }
  0x77   : > { %311 = vst [vmem:[#allocation2 + $0x30] sm:$0xff] %v2795_v0  ;;  %312 = vst [vmem:[#allocation2 + $0x38] sm:$0x3] %v2795_v0  ;;  %2253 = vmatprep.subr.bf16.mxu0 %v2531_v4  ;;  %v2537_v10 = vld [vmem:[#allocation8 + $0x120] sm:$0xff]   ;;  %v2538_v11 = vld [vmem:[#allocation8 + $0x68] sm:$0xff]   ;;  %s1771_s29 = sshll.u32 %s246_s26, 4  ;;  %s3265_s29 = int_to_ptr.vmem [resolvable:$true] %s1771_s29 }
  0x78   : > { %313 = vst [vmem:[#allocation2 + $0x40] sm:$0xff] %v2795_v0  ;;  %314 = vst [vmem:[#allocation2 + $0x48] sm:$0x3] %v2795_v0  ;;  %v3034_v12 = vld [vmem:[#allocation6] ss:$0 sm:$0xff]  ;;  %v2539_v14 = vld [vmem:[#allocation8 + $0x128] sm:$0xff]  }
  0x79   : > { %315 = vst [vmem:[#allocation2 + $0x50] sm:$0xff] %v2795_v0  ;;  %316 = vst [vmem:[#allocation2 + $0x58] sm:$0x3] %v2795_v0  ;;  %2158 = vmatpush3.bf16.msra.mxu1 %v2530_v3  ;;  %v2006_v13 = vld [vmem:[%s3006_s7] sm:$0xff]   ;;  %v2041_v18 = vld [vmem:[%s3006_s7 + $0x8] sm:$0xff]   ;;  %s2004_s23 = sshll.u32 %s2846_s19, 9 }
  0x7a   : > { %317 = vst [vmem:[#allocation2 + $0x60] sm:$0xff] %v2795_v0  ;;  %318 = vst [vmem:[#allocation2 + $0x68] sm:$0x3] %v2795_v0  ;;  %2254 = vmatpush3.bf16.msra.mxu0 %v2531_v4  ;;  %2159 = vmatprep.subr.bf16.mxu1 %v2532_v5  ;;  %v2007_v15 = vunpack.c.l.bf16 %v2006_v13  ;;  %v2008_v16 = vunpack.c.h.bf16 %v2006_v13  ;;  %v3037_v17 = vld [vmem:[#allocation6 + $0x1] ss:$0 sm:$0xff]  ;;  %v2011_v20 = vunpack.c.l.bf16 %v2041_v18  ;;  %v2012_v22 = vunpack.c.h.bf16 %v2041_v18  ;;  %v2540_v23 = vld [vmem:[#allocation8 + $0x70] sm:$0xff]   ;;  %s3272_s6 = scalar_lea.hbm %s3356_s3, %s2004_s23 }
  0x7b   : > { %319 = vst [vmem:[#allocation2 + $0x70] sm:$0xff] %v2795_v0  ;;  %320 = vst [vmem:[#allocation2 + $0x78] sm:$0x3] %v2795_v0  ;;  %2255 = vmatprep.subr.bf16.mxu0 %v2533_v6  ;;  %v2541_v24 = vld [vmem:[#allocation8 + $0x130] sm:$0xff]   ;;  %v2542_v29 = vld [vmem:[#allocation8 + $0x78] sm:$0xff]   ;;  %s1753_s5 = scalar_lea.sflag [#allocation5], %s3000_s1 }
  0x7c   : > { %321 = vst [vmem:[#allocation2 + $0x80] sm:$0xff] %v2795_v0  ;;  %322 = vst [vmem:[#allocation2 + $0x88] sm:$0x3] %v2795_v0  ;;  %v277_v19 = vmul.f32 %v2007_v15, %v3034_v12  ;;  %v278_v21 = vmul.f32 %v2008_v16, %v3034_v12  ;;  %v279_v26 = vmul.f32 %v2011_v20, %v3034_v12  ;;  %v2543_v30 = vld [vmem:[#allocation8 + $0x138] sm:$0xff]   ;;  %v3048_v35 = vld [vmem:[#allocation2 + $0x8] sm:$0x3] }
  0x7d   : > { %324 = vst [vmem:[#allocation2 + $0x98] sm:$0x3] %v2795_v0  ;;  %2160 = vmatpush3.bf16.msra.mxu1 %v2532_v5  ;;  %v280_v28 = vmul.f32 %v2012_v22, %v3034_v12  ;;  %v2544_v38 = vld [vmem:[#allocation8] sm:$0xff]   ;;  %v520_v40 = vrot.slane %v3048_v35, 1  ;;  %v2042_v42 = vld [vmem:[%s3006_s7 + $0x10] sm:$0xff]   ;;  %v2043_v2 = vld [vmem:[%s3006_s7 + $0x18] sm:$0xff]  }
  0x7e   : > { %2256 = vmatpush3.bf16.msra.mxu0 %v2533_v6  ;;  %2161 = vmatprep.subr.bf16.mxu1 %v2534_v7  ;;  %v289_v25 = vadd.f32 %v3037_v17, %v277_v19  ;;  %v290_v27 = vadd.f32 %v3037_v17, %v278_v21  ;;  %v291_v32 = vadd.f32 %v3037_v17, %v279_v26  ;;  %v2545_v41 = vld [vmem:[#allocation8 + $0x140] sm:$0xff]   ;;  %v2015_v43 = vunpack.c.l.bf16 %v2042_v42  ;;  %v2546_v13 = vld [vmem:[#allocation8 + $0x8] sm:$0xff]   ;;  %v2548_v22 = vld [vmem:[#allocation8 + $0x10] sm:$0xff]   ;;  %s2686_s10 = scalar_lea.vmem %s3265_s29, 512  ;;  %p3378_p4 = scmp.ne.s32.totalorder %s3366_s27, 0 }
  0x7f   : > { %2257 = vmatprep.subr.bf16.mxu0 %v2535_v8  ;;  %v292_v34 = vadd.f32 %v3037_v17, %v280_v28  ;;  %v2016_v44 = vunpack.c.h.bf16 %v2042_v42  ;;  %v521_v50 = vsel %vm518_vm0, %v3051_v39, %v520_v40  ;;  %v2019_v15 = vunpack.c.l.bf16 %v2043_v2  ;;  %v2547_v18 = vld [vmem:[#allocation8 + $0x148] sm:$0xff]   ;;  %v2550_v26 = vld [vmem:[#allocation8 + $0x18] sm:$0xff]   ;;  %p2687_p8 = scmp.ne.s32.totalorder %s3265_s29, %s2686_s10  ;;  %s2796_s12 = smov [#allocation9]  }
  0x80   : > { %v297_v31 = vmax.f32 %v289_v25, 0.0  ;;  %v298_v33 = vmax.f32 %v290_v27, 0.0  ;;  %v299_v36 = vmax.f32 %v291_v32, 0.0  ;;  %v281_v48 = vmul.f32 %v2015_v43, %v3034_v12  ;;  %s2690_s13 = sshll.u32 %s2796_s12, 4  ;;  %s2691_s13 = int_to_ptr.vmem [resolvable:$false] %s2690_s13 }
  0x81   : > { %2162 = vmatpush3.bf16.msra.mxu1 %v2534_v7  ;;  %v300_v37 = vmax.f32 %v292_v34, 0.0  ;;  %v282_v49 = vmul.f32 %v2016_v44, %v3034_v12  ;;  %v2020_v19 = vunpack.c.h.bf16 %v2043_v2  ;;  %v283_v20 = vmul.f32 %v2019_v15, %v3034_v12  ;;  %p2688_p5 = pnand %p2687_p8, %p3378_p4  ;;  %s2692_s8 = scalar_lea.vmem %s2691_s13, 1024 }
  0x82   : > { %2258 = vmatpush3.bf16.msra.mxu0 %v2535_v8  ;;  %2163 = vmatprep.subr.bf16.mxu1 %v2536_v9  ;;  %326 = vst [vmem:[#allocation2 + $0x11] sm:$0xff] %v297_v31  ;;  %327 = vst [vmem:[#allocation2 + $0x21] sm:$0xff] %v298_v33  ;;  %v293_v59 = vadd.f32 %v3037_v17, %v281_v48  ;;  %v2552_v48 = vld [vmem:[#allocation8 + $0x20] sm:$0xff]   ;;  %p2693_p2 = scmp.lt.s32.totalorder %s3265_s29, %s2691_s13  ;;  %p2694_p0 = scmp.lt.s32.totalorder %s2692_s8, %s2686_s10 }
  0x83   : > { %2259 = vmatprep.subr.bf16.mxu0 %v2537_v10  ;;  %328 = vst [vmem:[#allocation2 + $0x31] sm:$0xff] %v299_v36  ;;  %329 = vst [vmem:[#allocation2 + $0x41] sm:$0xff] %v300_v37  ;;  %v294_v60 = vadd.f32 %v3037_v17, %v282_v49  ;;  %v284_v21 = vmul.f32 %v2020_v19, %v3034_v12  ;;  %v2556_v19 = vld [vmem:[#allocation8 + $0x30] sm:$0xff]   ;;  %p2689_p10 = pneg %p2688_p5 }
  0x84   : > { %p2695_p9 = por %p2694_p0, %p2693_p2 }
  0x85   : > { %2164 = vmatpush3.bf16.msra.mxu1 %v2536_v9  ;;  %v301_v9 = vmax.f32 %v293_v59, 0.0  ;;  %v296_v25 = vadd.f32 %v3037_v17, %v284_v21 }
  0x86   : > { %2260 = vmatpush3.bf16.msra.mxu0 %v2537_v10  ;;  %2165 = vmatprep.subr.bf16.mxu1 %v2538_v11  ;;  %p2696_p6 = pnand %p2695_p9, %p2689_p10 }
  0x87   : > { %2261 = vmatprep.subr.bf16.mxu0 %v2539_v14  ;;  %330 = vst [vmem:[#allocation2 + $0x51] sm:$0xff] %v301_v9 }
  0x89   : > { %2166 = vmatpush3.bf16.msra.mxu1 %v2538_v11  ;;  %v3055_v45 = vld [vmem:[#allocation2 + $0x10] sm:$0xff]  ;;  %v3057_v46 = vld [vmem:[#allocation2 + $0x18] sm:$0x3]  ;;  %v3059_v47 = vld [vmem:[#allocation2 + $0x20] sm:$0xff] }
  0x8a   : > { %2262 = vmatpush3.bf16.msra.mxu0 %v2539_v14  ;;  %2167 = vmatprep.subr.bf16.mxu1 %v2540_v23  ;;  %v522_v51 = vrot.slane %v3055_v45, 1  ;;  %v523_v52 = vrot.slane %v3057_v46, 1  ;;  %v3067_v53 = vld [vmem:[#allocation2 + $0x28] sm:$0x3]  ;;  %v525_v54 = vrot.slane %v3059_v47, 1  ;;  %v3070_v55 = vld [vmem:[#allocation2 + $0x30] sm:$0xff]  ;;  %v939_v28 = vpack.c.bf16 %v3059_v47, %v3055_v45 }
  0x8b   : > { %2263 = vmatprep.subr.bf16.mxu0 %v2541_v24  ;;  %v3072_v56 = vld [vmem:[#allocation2 + $0x38] sm:$0x3]  ;;  %v526_v57 = vrot.slane %v3067_v53, 1  ;;  %v3075_v58 = vld [vmem:[#allocation2 + $0x40] sm:$0xff]  ;;  %v528_v62 = vrot.slane %v3070_v55, 1  ;;  %v302_v14 = vmax.f32 %v294_v60, 0.0 }
  0x8c   : > { %v524_v61 = vsel %vm518_vm0, %v522_v51, %v523_v52  ;;  %v529_v63 = vrot.slane %v3072_v56, 1  ;;  %v3082_v1 = vld [vmem:[#allocation2 + $0x48] sm:$0x3]  ;;  %v531_v5 = vrot.slane %v3075_v58, 1  ;;  %v940_v12 = vpack.c.bf16 %v3075_v58, %v3070_v55 }
  0x8d   : > { %2168 = vmatpush3.bf16.msra.mxu1 %v2540_v23  ;;  %v551_v3 = vpack.c.bf16 %v524_v61, %v521_v50  ;;  %v527_v4 = vsel %vm518_vm0, %v525_v54, %v526_v57  ;;  %v532_v6 = vrot.slane %v3082_v1, 1  ;;  %331 = vst [vmem:[#allocation2 + $0x61] sm:$0xff] %v302_v14  ;;  %v295_v23 = vadd.f32 %v3037_v17, %v283_v20  ;;  %v2553_v51 = vld [vmem:[#allocation8 + $0x160] sm:$0xff]  }
  0x8e   : > { %2264 = vmatpush3.bf16.msra.mxu0 %v2541_v24  ;;  %2169 = vmatprep.subr.bf16.mxu1 %v2542_v29  ;;  %v530_v7 = vsel %vm518_vm0, %v528_v62, %v529_v63  ;;  %v1070_v8 = vpack.c.bf16 %v527_v4, %v524_v61  ;;  %v2549_v24 = vld [vmem:[#allocation8 + $0x150] sm:$0xff]   ;;  %v786_v31 = vrot.slane %v3057_v46, 2  ;;  %v789_v17 = vrot.slane %v3067_v53, 2  ;;  %v2554_v53 = vld [vmem:[#allocation8 + $0x28] sm:$0xff]  }
  0x8f   : > { %2265 = vmatprep.subr.bf16.mxu0 %v2543_v30  ;;  %2171 = vmatprep.mubr.bf16.mxu1 %v551_v3  ;;  %v3089_v10 = vpack.c.bf16 %v530_v7, %v527_v4  ;;  %v533_v11 = vsel %vm518_vm0, %v531_v5, %v532_v6  ;;  %v303_v27 = vmax.f32 %v295_v23, 0.0  ;;  %v3102_v32 = vld [vmem:[#allocation2 + $0x50] sm:$0xff]  ;;  %v3104_v33 = vld [vmem:[#allocation2 + $0x58] sm:$0x3]  ;;  %v785_v44 = vrot.slane %v3055_v45, 2 }
  0x90   : > { %2267 = vmatprep.mubr.bf16.mxu0 %v1070_v8  ;;  %v1071_v16 = vpack.c.bf16 %v533_v11, %v530_v7  ;;  %v534_v34 = vrot.slane %v3102_v32, 1  ;;  %v535_v36 = vrot.slane %v3104_v33, 1  ;;  %v788_v46 = vrot.slane %v3059_v47, 2  ;;  %v2555_v62 = vld [vmem:[#allocation8 + $0x168] sm:$0xff]   ;;  %v2557_v23 = vld [vmem:[#allocation8 + $0x170] sm:$0xff]  }
  0x91   : > { %2170 = vmatpush3.bf16.msra.mxu1 %v2542_v29  ;;  %v2551_v29 = vld [vmem:[#allocation8 + $0x158] sm:$0xff]   ;;  %332 = vst [vmem:[#allocation2 + $0x71] sm:$0xff] %v303_v27  ;;  %v3129_v59 = vsel %vm781_vm1, %v785_v44, %v786_v31  ;;  %v3135_v61 = vrot.slane %v2795_v0, 2  ;;  %v498_v8 = vpack.c.bf16 %v3055_v45, %v2795_v0 }
  0x92   : > { %2266 = vmatpush3.bf16.msra.mxu0 %v2543_v30  ;;  %2179 = vmatprep.subr.bf16.mxu1 %v2544_v38  ;;  %v304_v30 = vmax.f32 %v296_v25, 0.0  ;;  %v536_v43 = vsel %vm518_vm0, %v534_v34, %v535_v36  ;;  %v3132_v60 = vsel %vm781_vm1, %v788_v46, %v789_v17  ;;  %v2558_v31 = vld [vmem:[#allocation8 + $0x38] sm:$0xff]   ;;  %v794_v34 = vrot.slane %v3075_v58, 2 }
  0x93   : > { %2275 = vmatprep.subr.bf16.mxu0 %v2545_v41  ;;  %v3120_v49 = vpack.c.bf16 %v536_v43, %v533_v11  ;;  %v1199_v9 = vpack.c.bf16 %v3132_v60, %v3129_v59  ;;  %v353_v11 = vld [vmem:[#allocation2 + $0x98] sm:$0x3]  ;;  %v2559_v36 = vld [vmem:[#allocation8 + $0x178] sm:$0xff]  }
  0x94   : > { %2172 = vmatmul.mubr.bf16.vlgmr.msra.gmra.mrb[0].mxu1 %v3089_v10  ;;  %v3109_v37 = vld [vmem:[#allocation2 + $0x60] sm:$0xff]  ;;  %333 = vst [vmem:[#allocation2 + $0x81] sm:$0xff] %v304_v30  ;;  %v795_v30 = vrot.slane %v3082_v1, 2 }
  0x95   : > { %2180 = vmatpush3.bf16.msra.mxu1 %v2544_v38  ;;  %2268 = vmatmul.mubr.bf16.vlgmr.msra.gmra.mrb[0].mxu0 %v1071_v16  ;;  %v3111_v38 = vld [vmem:[#allocation2 + $0x68] sm:$0x3]  ;;  %v537_v40 = vrot.slane %v3109_v37, 1  ;;  %v941_v42 = vpack.c.bf16 %v3109_v37, %v3102_v32  ;;  %v800_v1 = vrot.slane %v3109_v37, 2  ;;  %v2591_v45 = vld [vmem:[#allocation8 + $0x1f8] sm:$0xff]  }
  0x96   : > { %2276 = vmatpush3.bf16.msra.mxu0 %v2545_v41  ;;  %2181 = vmatprep.subr.bf16.mxu1 %v2546_v13  ;;  %v538_v41 = vrot.slane %v3111_v38, 1  ;;  %v3184_v46 = vsel %vm781_vm1, %v794_v34, %v795_v30  ;;  %v2576_v30 = vld [vmem:[#allocation8 + $0xc0] sm:$0xff]   ;;  %v2578_v34 = vld [vmem:[#allocation8 + $0xc8] sm:$0xff]  }
  0x97   : > { %2277 = vmatprep.subr.bf16.mxu0 %v2547_v18  ;;  %2175 = vmatprep.mubr.bf16.mxu1 %v3120_v49 }
  0x98   : > { %v539_v50 = vsel %vm518_vm0, %v537_v40, %v538_v41  ;;  %v3124_v54 = vld [vmem:[#allocation2 + $0x70] sm:$0xff]  ;;  %v3126_v57 = vld [vmem:[#allocation2 + $0x78] sm:$0x3]  ;;  %v797_v40 = vrot.slane %v3102_v32, 2  ;;  %v801_v41 = vrot.slane %v3111_v38, 2 }
  0x99   : > { %2182 = vmatpush3.bf16.msra.mxu1 %v2546_v13  ;;  %v1072_v52 = vpack.c.bf16 %v539_v50, %v536_v43  ;;  %v540_v63 = vrot.slane %v3124_v54, 1  ;;  %v541_v2 = vrot.slane %v3126_v57, 1  ;;  %v2560_v43 = vld [vmem:[#allocation8 + $0x80] sm:$0xff]  }
  0x9a   : > { %2278 = vmatpush3.bf16.msra.mxu0 %v2547_v18  ;;  %2183 = vmatprep.subr.bf16.mxu1 %v2548_v22  ;;  %v1575_v18 = vrot.slane %v353_v11, 2 }
  0x9b   : > { %2279 = vmatprep.subr.bf16.mxu0 %v2549_v24  ;;  %2271 = vmatprep.mubr.bf16.mxu0 %v1072_v52  ;;  %v3139_v3 = vld [vmem:[#allocation2 + $0x80] sm:$0xff]  ;;  %v351_v4 = vld [vmem:[#allocation2 + $0x88] sm:$0x3]  ;;  %v542_v7 = vsel %vm518_vm0, %v540_v63, %v541_v2  ;;  %v3194_v52 = vsel %vm781_vm1, %v800_v1, %v801_v41  ;;  %v2563_v63 = vld [vmem:[#allocation8 + $0x188] sm:$0xff]   ;;  %v3200_v2 = vpack.c.bf16 %v3102_v32, %v3075_v58 }
  0x9c   : > { %v1066_v5 = vrot.slane %v3139_v3, 1  ;;  %v1067_v6 = vrot.slane %v351_v4, 1  ;;  %v1195_v13 = vrot.slane %v3139_v3, 2  ;;  %v3148_v14 = vpack.c.bf16 %v542_v7, %v539_v50  ;;  %v2597_v58 = vld [vmem:[#allocation8 + $0x228] sm:$0xff]   ;;  %v2599_v32 = vld [vmem:[#allocation8 + $0x238] sm:$0xff]  }
  0x9d   : > { %2184 = vmatpush3.bf16.msra.mxu1 %v2548_v22  ;;  %v1196_v16 = vrot.slane %v351_v4, 2  ;;  %v942_v21 = vpack.c.bf16 %v3139_v3, %v3124_v54  ;;  %v1449_v22 = vrot.slane %v353_v11, 1  ;;  %v3162_v25 = vsel %vm781_vm1, %v3135_v61, %v1575_v18  ;;  %v2566_v11 = vld [vmem:[#allocation8 + $0x98] sm:$0xff]   ;;  %v2568_v18 = vld [vmem:[#allocation8 + $0xa0] sm:$0xff]  }
  0x9e   : > { %2280 = vmatpush3.bf16.msra.mxu0 %v2549_v24  ;;  %2185 = vmatprep.subr.bf16.mxu1 %v2550_v26  ;;  %v3151_v15 = vsel %vm518_vm0, %v1066_v5, %v1067_v6  ;;  %v499_v50 = vpack.c.bf16 %v3070_v55, %v3059_v47  ;;  %v783_v4 = vrot.slane %v3048_v35, 2  ;;  %v2564_v6 = vld [vmem:[#allocation8 + $0x90] sm:$0xff]   ;;  %v501_v35 = vpack.c.bf16 %v3124_v54, %v3109_v37  ;;  %v2592_v47 = vld [vmem:[#allocation8 + $0x200] sm:$0xff]  }
  0x9f   : > { %2281 = vmatprep.subr.bf16.mxu0 %v2551_v29  ;;  %v1073_v20 = vpack.c.bf16 %v3151_v15, %v542_v7  ;;  %2176 = vmatmul.mubr.bf16.gmra.mrb[4].mxu1 %v3148_v14  ;;  %v3158_v24 = vsel %vm781_vm1, %v1195_v13, %v1196_v16  ;;  %v2567_v13 = vld [vmem:[#allocation8 + $0x198] sm:$0xff]   ;;  %v1324_v41 = vpack.c.bf16 %v2795_v0, %v3139_v3  ;;  %v2586_v0 = vld [vmem:[#allocation8 + $0xe8] sm:$0xff]  }
  0xa0   : > { %2195 = vmatprep.mubr.bf16.mxu1 %v498_v8  ;;  %v1578_v27 = vpack.c.bf16 %v3162_v25, %v3158_v24  ;;  %v784_v8 = vsel %vm781_vm1, %v3135_v61, %v783_v4  ;;  %v2570_v61 = vld [vmem:[#allocation8 + $0xa8] sm:$0xff]  }
  0xa1   : > { %2186 = vmatpush3.bf16.msra.mxu1 %v2550_v26  ;;  %v792_v26 = vrot.slane %v3072_v56, 2  ;;  %2272 = vmatmul.mubr.bf16.gmra.mrb[4].mxu0 %v1073_v20  ;;  %v791_v56 = vrot.slane %v3070_v55, 2  ;;  %v814_v16 = vpack.c.bf16 %v3129_v59, %v784_v8  ;;  %v2571_v20 = vld [vmem:[#allocation8 + $0x1a8] sm:$0xff]   ;;  %v2572_v59 = vld [vmem:[#allocation8 + $0xb0] sm:$0xff]   ;;  %v2596_v55 = vld [vmem:[#allocation8 + $0x220] sm:$0xff]  }
  0xa2   : > { %2282 = vmatpush3.bf16.msra.mxu0 %v2551_v29  ;;  %2187 = vmatprep.subr.bf16.mxu1 %v2552_v48  ;;  %v3169_v29 = vsel %vm518_vm0, %v3051_v39, %v1449_v22  ;;  %v798_v39 = vrot.slane %v3104_v33, 2  ;;  %v2573_v22 = vld [vmem:[#allocation8 + $0x1b0] sm:$0xff]  }
  0xa3   : > { %2283 = vmatprep.subr.bf16.mxu0 %v2553_v51  ;;  %2291 = vmatprep.mubr.bf16.mxu0 %v1199_v9  ;;  %v1452_v17 = vpack.c.bf16 %v3169_v29, %v3151_v15  ;;  %v3181_v44 = vsel %vm781_vm1, %v791_v56, %v792_v26  ;;  %v2575_v26 = vld [vmem:[#allocation8 + $0x1b8] sm:$0xff]  }
  0xa4   : > { %v1200_v33 = vpack.c.bf16 %v3184_v46, %v3181_v44  ;;  %v3191_v38 = vsel %vm781_vm1, %v797_v40, %v798_v39  ;;  %v3218_v56 = vpack.c.bf16 %v3181_v44, %v3132_v60  ;;  %v2580_v39 = vld [vmem:[#allocation8 + $0xd0] sm:$0xff]   ;;  %v2583_v44 = vld [vmem:[#allocation8 + $0x1d8] sm:$0xff]  }
  0xa5   : > { %2188 = vmatpush3.bf16.msra.mxu1 %v2552_v48  ;;  %v2561_v48 = vld [vmem:[#allocation8 + $0x180] sm:$0xff]   ;;  %v1201_v5 = vpack.c.bf16 %v3194_v52, %v3191_v38  ;;  %v3222_v40 = vpack.c.bf16 %v3191_v38, %v3184_v46  ;;  %v2581_v60 = vld [vmem:[#allocation8 + $0x1d0] sm:$0xff]   ;;  %v2590_v38 = vld [vmem:[#allocation8 + $0xf8] sm:$0xff]  }
  0xa6   : > { %2284 = vmatpush3.bf16.msra.mxu0 %v2553_v51  ;;  %2189 = vmatprep.subr.bf16.mxu1 %v2554_v53  ;;  %v2562_v51 = vld [vmem:[#allocation8 + $0x88] sm:$0xff]   ;;  %v2584_v46 = vld [vmem:[#allocation8 + $0xe0] sm:$0xff]  }
  0xa7   : > { %2285 = vmatprep.subr.bf16.mxu0 %v2555_v62 }
  0xa9   : > { %2190 = vmatpush3.bf16.msra.mxu1 %v2554_v53  ;;  %v803_v53 = vrot.slane %v3124_v54, 2 }
  0xaa   : > { %2286 = vmatpush3.bf16.msra.mxu0 %v2555_v62  ;;  %2191 = vmatprep.subr.bf16.mxu1 %v2556_v19  ;;  %v804_v62 = vrot.slane %v3126_v57, 2  ;;  %v2565_v57 = vld [vmem:[#allocation8 + $0x190] sm:$0xff]  }
  0xab   : > { %2287 = vmatprep.subr.bf16.mxu0 %v2557_v23 }
  0xac   : > { %v3206_v7 = vsel %vm781_vm1, %v803_v53, %v804_v62 }
  0xad   : > { %2192 = vmatpush3.bf16.msra.mxu1 %v2556_v19  ;;  %v1202_v9 = vpack.c.bf16 %v3158_v24, %v3206_v7  ;;  %v2569_v19 = vld [vmem:[#allocation8 + $0x1a0] sm:$0xff]   ;;  %v3229_v1 = vpack.c.bf16 %v3206_v7, %v3194_v52  ;;  %v2595_v52 = vld [vmem:[#allocation8 + $0x218] sm:$0xff]  }
  0xae   : > { %2288 = vmatpush3.bf16.msra.mxu0 %v2557_v23  ;;  %2193 = vmatprep.subr.bf16.mxu1 %v2558_v31  ;;  %v2574_v23 = vld [vmem:[#allocation8 + $0xb8] sm:$0xff]  }
  0xaf   : > { %2289 = vmatprep.subr.bf16.mxu0 %v2559_v36 }
  0xb1   : > { %2194 = vmatpush3.bf16.msra.mxu1 %v2558_v31  ;;  %v2577_v31 = vld [vmem:[#allocation8 + $0x1c0] sm:$0xff]  }
  0xb2   : > { %2290 = vmatpush3.bf16.msra.mxu0 %v2559_v36  ;;  %2203 = vmatprep.subr.bf16.mxu1 %v2560_v43  ;;  %v2579_v36 = vld [vmem:[#allocation8 + $0x1c8] sm:$0xff]  }
  0xb3   : > { %2299 = vmatprep.subr.bf16.mxu0 %v2561_v48 }
  0xb4   : > { %2196 = vmatmul.mubr.bf16.vlgmr.msra.gmra.mrb[0].mxu1 %v499_v50 }
  0xb5   : > { %2204 = vmatpush3.bf16.msra.mxu1 %v2560_v43  ;;  %2292 = vmatmul.mubr.bf16.vlgmr.msra.gmra.mrb[0].mxu0 %v1200_v33  ;;  %v2582_v43 = vld [vmem:[#allocation8 + $0xd8] sm:$0xff]   ;;  %v2588_v33 = vld [vmem:[#allocation8 + $0xf0] sm:$0xff]  }
  0xb6   : > { %2300 = vmatpush3.bf16.msra.mxu0 %v2561_v48  ;;  %2205 = vmatprep.subr.bf16.mxu1 %v2562_v51  ;;  %v2585_v48 = vld [vmem:[#allocation8 + $0x1e0] sm:$0xff]  }
  0xb7   : > { %2301 = vmatprep.subr.bf16.mxu0 %v2563_v63  ;;  %2199 = vmatprep.mubr.bf16.mxu1 %v3200_v2 }
  0xb8   : > { %2295 = vmatprep.mubr.bf16.mxu0 %v1201_v5 }
  0xb9   : > { %2206 = vmatpush3.bf16.msra.mxu1 %v2562_v51  ;;  %v2589_v51 = vld [vmem:[#allocation8 + $0x1f0] sm:$0xff]  }
  0xba   : > { %2302 = vmatpush3.bf16.msra.mxu0 %v2563_v63  ;;  %2207 = vmatprep.subr.bf16.mxu1 %v2564_v6 }
  0xbb   : > { %2303 = vmatprep.subr.bf16.mxu0 %v2565_v57 }
  0xbc   : > { %2200 = vmatmul.mubr.bf16.gmra.mrb[4].mxu1 %v501_v35 }
  0xbd   : > { %2208 = vmatpush3.bf16.msra.mxu1 %v2564_v6  ;;  %2296 = vmatmul.mubr.bf16.gmra.mrb[4].mxu0 %v1202_v9 }
  0xbe   : > { %2304 = vmatpush3.bf16.msra.mxu0 %v2565_v57  ;;  %2209 = vmatprep.subr.bf16.mxu1 %v2566_v11 }
  0xbf   : > { %2305 = vmatprep.subr.bf16.mxu0 %v2567_v13  ;;  %2219 = vmatprep.mubr.bf16.mxu1 %v814_v16 }
  0xc0   : > { %2315 = vmatprep.mubr.bf16.mxu0 %v499_v50  ;;  %v2587_v50 = vld [vmem:[#allocation8 + $0x1e8] sm:$0xff]  }
  0xc1   : > { %2210 = vmatpush3.bf16.msra.mxu1 %v2566_v11 }
  0xc2   : > { %2306 = vmatpush3.bf16.msra.mxu0 %v2567_v13  ;;  %2211 = vmatprep.subr.bf16.mxu1 %v2568_v18 }
  0xc3   : > { %2307 = vmatprep.subr.bf16.mxu0 %v2569_v19 }
  0xc5   : > { %2212 = vmatpush3.bf16.msra.mxu1 %v2568_v18 }
  0xc6   : > { %2308 = vmatpush3.bf16.msra.mxu0 %v2569_v19  ;;  %2213 = vmatprep.subr.bf16.mxu1 %v2570_v61 }
  0xc7   : > { %2309 = vmatprep.subr.bf16.mxu0 %v2571_v20 }
  0xc9   : > { %2214 = vmatpush3.bf16.msra.mxu1 %v2570_v61 }
  0xca   : > { %2310 = vmatpush3.bf16.msra.mxu0 %v2571_v20  ;;  %2215 = vmatprep.subr.bf16.mxu1 %v2572_v59 }
  0xcb   : > { %2311 = vmatprep.subr.bf16.mxu0 %v2573_v22 }
  0xcd   : > { %2216 = vmatpush3.bf16.msra.mxu1 %v2572_v59 }
  0xce   : > { %2312 = vmatpush3.bf16.msra.mxu0 %v2573_v22  ;;  %2217 = vmatprep.subr.bf16.mxu1 %v2574_v23 }
  0xcf   : > { %2313 = vmatprep.subr.bf16.mxu0 %v2575_v26 }
  0xd1   : > { %2218 = vmatpush3.bf16.msra.mxu1 %v2574_v23 }
  0xd2   : > { %2314 = vmatpush3.bf16.msra.mxu0 %v2575_v26  ;;  %2227 = vmatprep.subr.bf16.mxu1 %v2576_v30 }
  0xd3   : > { %2323 = vmatprep.subr.bf16.mxu0 %v2577_v31 }
  0xd4   : > { %2220 = vmatmul.mubr.bf16.vlgmr.msra.gmra.mrb[0].mxu1 %v3218_v56 }
  0xd5   : > { %2228 = vmatpush3.bf16.msra.mxu1 %v2576_v30  ;;  %2316 = vmatmul.mubr.bf16.vlgmr.msra.gmra.mrb[0].mxu0 %v3200_v2 }
  0xd6   : > { %2324 = vmatpush3.bf16.msra.mxu0 %v2577_v31  ;;  %2229 = vmatprep.subr.bf16.mxu1 %v2578_v34 }
  0xd7   : > { %2325 = vmatprep.subr.bf16.mxu0 %v2579_v36  ;;  %2223 = vmatprep.mubr.bf16.mxu1 %v3222_v40 }
  0xd8   : > { %2319 = vmatprep.mubr.bf16.mxu0 %v501_v35 }
  0xd9   : > { %2230 = vmatpush3.bf16.msra.mxu1 %v2578_v34 }
  0xda   : > { %2326 = vmatpush3.bf16.msra.mxu0 %v2579_v36  ;;  %2231 = vmatprep.subr.bf16.mxu1 %v2580_v39 }
  0xdb   : > { %2327 = vmatprep.subr.bf16.mxu0 %v2581_v60 }
  0xdc   : > { %2224 = vmatmul.mubr.bf16.gmra.mrb[4].mxu1 %v3229_v1 }
  0xdd   : > { %2232 = vmatpush3.bf16.msra.mxu1 %v2580_v39  ;;  %2320 = vmatmul.mubr.bf16.gmra.mrb[4].mxu0 %v1324_v41 }
  0xde   : > { %2328 = vmatpush3.bf16.msra.mxu0 %v2581_v60  ;;  %2233 = vmatprep.subr.bf16.mxu1 %v2582_v43 }
  0xdf   : > { %2329 = vmatprep.subr.bf16.mxu0 %v2583_v44  ;;  %2243 = vmatprep.mubr.bf16.mxu1 %v939_v28  ;;  %v2594_v28 = vld [vmem:[#allocation8 + $0x210] sm:$0xff]  }
  0xe0   : > { %2339 = vmatprep.mubr.bf16.mxu0 %v3089_v10  ;;  %v2593_v10 = vld [vmem:[#allocation8 + $0x208] sm:$0xff]  }
  0xe1   : > { %2234 = vmatpush3.bf16.msra.mxu1 %v2582_v43 }
  0xe2   : > { %2330 = vmatpush3.bf16.msra.mxu0 %v2583_v44  ;;  %2235 = vmatprep.subr.bf16.mxu1 %v2584_v46 }
  0xe3   : > { %2331 = vmatprep.subr.bf16.mxu0 %v2585_v48 }
  0xe5   : > { %2236 = vmatpush3.bf16.msra.mxu1 %v2584_v46 }
  0xe6   : > { %2332 = vmatpush3.bf16.msra.mxu0 %v2585_v48  ;;  %2237 = vmatprep.subr.bf16.mxu1 %v2586_v0 }
  0xe7   : > { %2333 = vmatprep.subr.bf16.mxu0 %v2587_v50 }
  0xe9   : > { %2238 = vmatpush3.bf16.msra.mxu1 %v2586_v0 }
  0xea   : > { %2334 = vmatpush3.bf16.msra.mxu0 %v2587_v50  ;;  %2239 = vmatprep.subr.bf16.mxu1 %v2588_v33 }
  0xeb   : > { %2335 = vmatprep.subr.bf16.mxu0 %v2589_v51 }
  0xed   : > { %2240 = vmatpush3.bf16.msra.mxu1 %v2588_v33 }
  0xee   : > { %2336 = vmatpush3.bf16.msra.mxu0 %v2589_v51  ;;  %2241 = vmatprep.subr.bf16.mxu1 %v2590_v38 }
  0xef   : > { %2337 = vmatprep.subr.bf16.mxu0 %v2591_v45 }
  0xf1   : > { %2242 = vmatpush3.bf16.msra.mxu1 %v2590_v38 }
  0xf2   : > { %2338 = vmatpush3.bf16.msra.mxu0 %v2591_v45  ;;  %2371 = vmatprep.subr.bf16.mxu1 %v2592_v47 }
  0xf3   : > { %2347 = vmatprep.subr.bf16.mxu0 %v2592_v47 }
  0xf4   : > { %2244 = vmatmul.mubr.bf16.vlgmr.msra.gmra.mrb[0].mxu1 %v940_v12  ;;  %v2598_v12 = vld [vmem:[#allocation8 + $0x230] sm:$0xff]  }
  0xf5   : > { %2340 = vmatmul.mubr.bf16.vlgmr.msra.gmra.mrb[0].mxu0 %v3120_v49  ;;  %2379 = vmatpush3.bf16.msra.mxu1 %v2592_v47 }
  0xf6   : > { %2348 = vmatpush3.bf16.msra.mxu0 %v2592_v47  ;;  %2372 = vmatprep.subr.bf16.mxu1 %v2593_v10 }
  0xf7   : > { %2349 = vmatprep.subr.bf16.mxu0 %v2593_v10  ;;  %2247 = vmatprep.mubr.bf16.mxu1 %v941_v42 }
  0xf8   : > { %2343 = vmatprep.mubr.bf16.mxu0 %v3148_v14 }
  0xf9   : > { %2380 = vmatpush3.bf16.msra.mxu1 %v2593_v10 }
  0xfa   : > { %2350 = vmatpush3.bf16.msra.mxu0 %v2593_v10  ;;  %2373 = vmatprep.subr.bf16.mxu1 %v2594_v28 }
  0xfb   : > { %2351 = vmatprep.subr.bf16.mxu0 %v2594_v28 }
  0xfc   : > { %2248 = vmatmul.mubr.bf16.gmra.mrb[4].mxu1 %v942_v21 }
  0xfd   : > { %2344 = vmatmul.mubr.bf16.gmra.mrb[4].mxu0 %v1452_v17  ;;  %2381 = vmatpush3.bf16.msra.mxu1 %v2594_v28 }
  0xfe   : > { %2352 = vmatpush3.bf16.msra.mxu0 %v2594_v28  ;;  %2374 = vmatprep.subr.bf16.mxu1 %v2595_v52 }
  0xff   : > { %2353 = vmatprep.subr.bf16.mxu0 %v2595_v52  ;;  %2363 = vmatprep.mubr.bf16.mxu0 %v3218_v56 }
 0x100   : > { %2367 = vmatprep.mubr.bf16.mxu1 %v3229_v1 }
 0x101   : > { %2382 = vmatpush3.bf16.msra.mxu1 %v2595_v52 }
 0x102   : > { %2354 = vmatpush3.bf16.msra.mxu0 %v2595_v52  ;;  %2375 = vmatprep.subr.bf16.mxu1 %v2596_v55 }
 0x103   : > { %2355 = vmatprep.subr.bf16.mxu0 %v2596_v55 }
 0x105   : > { %2383 = vmatpush3.bf16.msra.mxu1 %v2596_v55 }
 0x106   : > { %2356 = vmatpush3.bf16.msra.mxu0 %v2596_v55  ;;  %2376 = vmatprep.subr.bf16.mxu1 %v2597_v58 }
 0x107   : > { %2357 = vmatprep.subr.bf16.mxu0 %v2597_v58 }
 0x109   : > { %2384 = vmatpush3.bf16.msra.mxu1 %v2597_v58 }
 0x10a   : > { %2358 = vmatpush3.bf16.msra.mxu0 %v2597_v58  ;;  %2377 = vmatprep.subr.bf16.mxu1 %v2598_v12 }
 0x10b   : > { %2359 = vmatprep.subr.bf16.mxu0 %v2598_v12 }
 0x10d   : > { %2385 = vmatpush3.bf16.msra.mxu1 %v2598_v12 }
 0x10e   : > { %2360 = vmatpush3.bf16.msra.mxu0 %v2598_v12  ;;  %2378 = vmatprep.subr.bf16.mxu1 %v2599_v32 }
 0x10f   : > { %2361 = vmatprep.subr.bf16.mxu0 %v2599_v32 }
 0x111   : > { %2386 = vmatpush3.bf16.msra.mxu1 %v2599_v32 }
 0x112   : > { %2362 = vmatpush3.bf16.msra.mxu0 %v2599_v32 }
 0x114   : > { %2368 = vmatmul.mubr.bf16.vlgmr.msra.gmra.mrb[8].mxu1 %v1578_v27 }
 0x115   : > { %2364 = vmatmul.mubr.bf16.vlgmr.msra.gmra.mrb[0].mxu0 %v3222_v40 }
 0x1c7   : > { %v2245_v37 = vpop.f32.mrb[0].mxu1 }
 0x1c8   : > { %v1025_v42 = vpop.f32.mrb[1].mxu1 }
 0x1c9   : > { %v2246_v49 = vpop.f32.mrb[2].mxu1 }
 0x1ca   : > { %v1028_v54 = vpop.f32.mrb[3].mxu1 }
 0x1cf   : > { %v2249_v3 = vpop.f32.mrb[4].mxu1 }
 0x1d0   : > { %v2345_v14 = vpop.f32.mrb[4].mxu0  ;;  %v1041_v15 = vpop.f32.mrb[5].mxu1 }
 0x1d1   : > { %v2391_v21 = vadd.f32 %v2345_v14, %v2249_v3  ;;  %v1551_v29 = vpop.f32.mrb[5].mxu0  ;;  %v2250_v17 = vpop.f32.mrb[6].mxu1 }
 0x1d2   : > { %v2393_v53 = vadd.f32 %v1551_v29, %v1041_v15  ;;  %v2346_v62 = vpop.f32.mrb[6].mxu0  ;;  %v1044_v63 = vpop.f32.mrb[7].mxu1 }
 0x1d3   : > { %v2395_v2 = vadd.f32 %v2346_v62, %v2250_v17  ;;  %v1554_v4 = vpop.f32.mrb[7].mxu0 }
 0x1d4   : > { %v2397_v24 = vadd.f32 %v1554_v4, %v1044_v63 }
 0x1e7   : > { %v2369_v25 = vpop.f32.mrb[8].mxu1 }
 0x1e8   : > { %v2365_v27 = vpop.f32.mrb[0].mxu0  ;;  %v3258_v5 = vadd.f32 %v2391_v21, %v2369_v25  ;;  %v1677_v6 = vpop.f32.mrb[9].mxu1 }
 0x1e9   : > { %v2387_v7 = vadd.f32 %v2365_v27, %v2245_v37  ;;  %v1661_v57 = vpop.f32.mrb[1].mxu0  ;;  %v2394_v35 = vadd.f32 %v2393_v53, %v1677_v6  ;;  %v2370_v8 = vpop.f32.mrb[10].mxu1 }
 0x1ea   : > { %v2388_v9 = vadd.f32 %v1661_v57, %v1025_v42  ;;  %v2366_v11 = vpop.f32.mrb[2].mxu0  ;;  %v3262_v13 = vadd.f32 %v2395_v2, %v2370_v8  ;;  %v1680_v16 = vpop.f32.mrb[11].mxu1 }
 0x1eb   : > { %v2389_v18 = vadd.f32 %v2366_v11, %v2246_v49  ;;  %v1664_v19 = vpop.f32.mrb[3].mxu0  ;;  %v2398_v61 = vadd.f32 %v2397_v24, %v1680_v16  ;;  %v1732_v34 = vmul.f32 %v2387_v7, %v2387_v7 }
 0x1ec   : > { %v2039_v20 = vpack.c.bf16 %v3262_v13, %v3258_v5  ;;  %v2390_v59 = vadd.f32 %v1664_v19, %v1028_v54  ;;  %v1730_v26 = vmul.f32 %v2388_v9, %v2388_v9 }
 0x1ed   : > { %v2029_v22 = vpack.c.bf16 %v2389_v18, %v2387_v7  ;;  %v2034_v23 = vpack.c.bf16 %v2398_v61, %v2394_v35 }
 0x1ee   : > { %2046 = vst [vmem:[%s246_s26 + $0x18] sm:$0xff] %v2039_v20   ;;  %v2024_v30 = vpack.c.bf16 %v2390_v59, %v2388_v9  ;;  %v1716_v31 = vadd.f32 %v2390_v59, %v2388_v9  ;;  %v1731_v56 = vmul.f32 %v2390_v59, %v2390_v59 }
 0x1ef   : > { %2044 = vst [vmem:[%s246_s26 + $0x8] sm:$0xff] %v2029_v22   ;;  %2045 = vst [vmem:[%s246_s26 + $0x10] sm:$0xff] %v2034_v23  }
 0x1f0   : > { %2025 = vst [vmem:[%s246_s26] sm:$0xff] %v2024_v30   ;;  %v1717_v36 = vadd.f32 %v2387_v7, %v1716_v31  ;;  %v1738_v40 = vadd.f32 %v1731_v56, %v1730_v26 }
 0x1f1   : > { %2699 = shalt.err (!%p2696_p6)
}
 0x1f2   : > { %s2700_s11 = scalar_lea.hbm %s3272_s6, 512  ;;  %s2704_s9 = scalar_lea.hbm %s3356_s3, 1024 }
 0x1f3   : > { %p2701_p12 = scmp.ne.s32.totalorder %s3272_s6, %s2700_s11  ;;  %p2705_p11 = scmp.lt.u32.totalorder %s3272_s6, %s3356_s3 }
 0x1f4   : > { %p2706_p7 = scmp.lt.u32.totalorder %s2704_s9, %s2700_s11  ;;  %p2708_p8 = scmp.lt.u32.totalorder %s2700_s11, %s3272_s6 }
 0x1f5   : > { %p2702_p13 = pnand %p2701_p12, %p3378_p4 }
 0x1f6   : > { %p2707_p3 = por %p2706_p7, %p2705_p11 }
 0x1f7   : > { %p2703_p1 = pneg %p2702_p13 }
 0x1f8   : > { %p2709_p5 = por %p2708_p8, %p2707_p3 }
 0x1fa   : > { %p2710_p10 = pnand %p2709_p5, %p2703_p1 }
 0x1fc   : > { %2713 = shalt.err (!%p2710_p10)
}
 0x1fd   : > { %s2797_s26 = smov 64   ;;  %s2798_s23 = smov 4   ;;  %v1733_v39 = vmul.f32 %v2389_v18, %v2389_v18  ;;  %v1739_v60 = vadd.f32 %v1738_v40, %v1732_v34  ;;  %v1718_v1 = vadd.f32 %v2389_v18, %v1717_v36  ;;  %v1734_v41 = vmul.f32 %v2394_v35, %v2394_v35 }
 0x1fe   : > { %2461 = dma.vmem_to_hbm [thread:$0]  (%p3378_p4), %s3265_s29, 512, %s3272_s6, %s1753_s5, %s2797_s26, %s2797_s26, %s2798_s23   ;;  %v1735_v48 = vmul.f32 %v2398_v61, %v2398_v61  ;;  %v1736_v50 = vmul.f32 %v3258_v5, %v3258_v5  ;;  %v1737_v38 = vmul.f32 %v3262_v13, %v3262_v13 }
 0x1ff   : > { %v1719_v43 = vadd.f32 %v2394_v35, %v1718_v1  ;;  %v1740_v44 = vadd.f32 %v1739_v60, %v1733_v39  ;;  %s1921_s29 = sshll.u32 %s3000_s1, 1  ;;  %s2000_s25 = sshll.u32 %s2846_s19, 5 }
 0x200   : > { %s253_s20 = scalar_lea.vmem [#allocation10], %s1921_s29  ;;  %s3309_s12 = scalar_lea.hbm %s3357_s4, %s2000_s25 }
 0x201   : > { %v1720_v46 = vadd.f32 %v2398_v61, %v1719_v43  ;;  %v1741_v0 = vadd.f32 %v1740_v44, %v1734_v41  ;;  %s1787_s6 = sshll.u32 %s253_s20, 4  ;;  %s1758_s13 = scalar_lea.sflag [#allocation11], %s3000_s1  ;;  %s3311_s6 = int_to_ptr.vmem [resolvable:$true] %s1787_s6 }
 0x202   : > { %s2714_s8 = scalar_lea.vmem %s3311_s6, 32  ;;  %s2799_s19 = smov [#allocation10]  }
 0x203   : > { %v1721_v33 = vadd.f32 %v3258_v5, %v1720_v46  ;;  %v1742_v51 = vadd.f32 %v1741_v0, %v1735_v48  ;;  %p2715_p2 = scmp.ne.s32.totalorder %s3311_s6, %s2714_s8  ;;  %s2718_s11 = sshll.u32 %s2799_s19, 4  ;;  %s2719_s11 = int_to_ptr.vmem [resolvable:$false] %s2718_s11 }
 0x204   : > { %s2720_s14 = scalar_lea.vmem %s2719_s11, 64  ;;  %p2721_p6 = scmp.lt.s32.totalorder %s3311_s6, %s2719_s11 }
 0x205   : > { %v1722_v45 = vadd.f32 %v3262_v13, %v1721_v33  ;;  %v1743_v47 = vadd.f32 %v1742_v51, %v1736_v50  ;;  %p2716_p0 = pnand %p2715_p2, %p3378_p4  ;;  %p2722_p12 = scmp.lt.s32.totalorder %s2720_s14, %s2714_s8 }
 0x207   : > { %v1723_v10 = vrot.slane %v1722_v45, 4  ;;  %v1744_v28 = vadd.f32 %v1743_v47, %v1737_v38  ;;  %p2717_p9 = pneg %p2716_p0  ;;  %p2723_p13 = por %p2722_p12, %p2721_p6 }
 0x209   : > { %v1724_v52 = vadd.f32 %v1723_v10, %v1722_v45  ;;  %v1745_v55 = vrot.slane %v1744_v28, 4  ;;  %p2724_p1 = pnand %p2723_p13, %p2717_p9 }
 0x20b   : > { %v1725_v58 = vrot.slane %v1724_v52, 2  ;;  %v1746_v12 = vadd.f32 %v1745_v55, %v1744_v28 }
 0x20d   : > { %v1726_v32 = vadd.f32 %v1725_v58, %v1724_v52  ;;  %v1747_v37 = vrot.slane %v1746_v12, 2 }
 0x20f   : > { %v1727_v42 = vrot.slane %v1726_v32, 1  ;;  %v1748_v49 = vadd.f32 %v1747_v37, %v1746_v12 }
 0x211   : > { %v1728_v54 = vadd.f32 %v1727_v42, %v1726_v32  ;;  %v1749_v3 = vrot.slane %v1748_v49, 1 }
 0x213   : > { %1729 = vst [vmem:[%s253_s20] sm:$0x1] %v1728_v54  ;;  %v1750_v14 = vadd.f32 %v1749_v3, %v1748_v49 }
 0x215   : > { %1751 = vst [vmem:[%s253_s20 + $0x1] sm:$0x1] %v1750_v14 }
 0x216   : > { %2727 = shalt.err (!%p2724_p1)
}
 0x217   : > { %s2728_s1 = scalar_lea.hbm %s3309_s12, 32  ;;  %s2732_s30 = scalar_lea.hbm %s3357_s4, 64 }
 0x218   : > { %p2729_p11 = scmp.ne.s32.totalorder %s3309_s12, %s2728_s1  ;;  %p2733_p8 = scmp.lt.u32.totalorder %s3309_s12, %s3357_s4 }
 0x219   : > { %p2734_p5 = scmp.lt.u32.totalorder %s2732_s30, %s2728_s1  ;;  %p2736_p2 = scmp.lt.u32.totalorder %s2728_s1, %s3309_s12 }
 0x21a   : > { %p2730_p7 = pnand %p2729_p11, %p3378_p4 }
 0x21b   : > { %p2735_p10 = por %p2734_p5, %p2733_p8 }
 0x21c   : > { %p2731_p3 = pneg %p2730_p7 }
 0x21d   : > { %p2737_p0 = por %p2736_p2, %p2735_p10 }
 0x21f   : > { %p2738_p9 = pnand %p2737_p0, %p2731_p3 }
 0x221   : > { %2741 = shalt.err (!%p2738_p9)
}
 0x222   : > { %2462 = dma.vmem_to_hbm [thread:$0]  (%p3378_p4), %s3311_s6, 32, %s3309_s12, %s1758_s13  }
 0x223 PF: > { %s1799_s23 = sand.u32 1, %s2776_s15   ;;  %p3379_p6 = scmp.ne.s32.totalorder %s3367_s28, 0 }
 0x224   : > { %p3380_p12 = scmp.ge.s32.totalorder %s2788_s18, 2  ;;  %s1800_s29 = scalar_lea.sflag [#allocation5], %s1799_s23 }
 0x226   : > { %p2477_p13 = pnand %p3380_p12, %p3379_p6 }
 0x228   : > { %2767 = dma.done.wait (!%p2477_p13), %s1800_s29, 512  }
 0x229   : > { %2769 = vsyncadd (!%p2477_p13), %s1800_s29, 4294966784  ;;  %s1809_s25 = scalar_lea.sflag [#allocation11], %s1799_s23 }
 0x22a   : > { %2771 = dma.done.wait (!%p2477_p13), %s1809_s25, 32  }
 0x22b   : > { %2773 = vsyncadd (!%p2477_p13), %s1809_s25, 4294967264  ;;  %p22_p4 = scmp.ge.s32.totalorder %s2850_s21, 4   ;;  %s3381_s15 = smov %s2780_s16 }
 0x22c   : > { %s3382_s16 = smov %s2784_s17  ;;  %s3383_s17 = smov %s2862_s24 }
 0x22d   : > { %s3384_s18 = smov %s2850_s21  ;;  %24 = sbr.rel (!%p22_p4) target bundleno = 10 (0xa), region = 103 }
 0x234   :  { %1814 = vsyncpa [#allocation4], 1 }
 0x235   :  { %1816 = vsyncpa [#allocation4 + $0x1], 1 }
 0x236   :  { %1817 = vsyncpa [#allocation7], 1 }
 0x237   :  { %1818 = vsyncpa [#allocation5], 1 }
 0x238   :  { %1820 = vsyncpa [#allocation5 + $0x1], 1 }
 0x239   :  { %1821 = vsyncpa [#allocation11], 1 }
 0x23a   :  { %1823 = vsyncpa [#allocation11 + $0x1], 1 }

</bundles_post_ra>
